<compile_context>
chip_gen: v7x
topology: tpu7x:2x2x1
jax: 0.10.0
libtpu: 0.0.40
codegen_flags: <defaults>
</compile_context>

<pallas_src>
import functools

import jax
import jax.numpy as jnp
from jax.experimental import pallas as pl
from jax.experimental.pallas import tpu as pltpu

KER = 5  # same as famos/network.py

_LANE = 128
_WEIGHT_BLOCK_LIMIT = 8 * 1024 * 1024   # split N when one weight block exceeds this
_VMEM_BUDGET = 40 * 1024 * 1024         # block-size budget (v7x has 64 MiB/TC)
_VMEM_LIMIT = 48 * 1024 * 1024          # scoped VMEM limit handed to Mosaic


def _round_up(x, m):
    return (x + m - 1) // m * m


def _cdiv(a, b):
    return -(-a // b)


def _apply_act(x, act):
    if act == "lrelu":
        return jnp.where(x >= 0.0, x, 0.2 * x)
    if act == "relu":
        return jnp.maximum(x, 0.0)
    if act == "tanh":
        return jnp.tanh(x)
    return x


# ----------------------------------------------------------------------------
# Pallas kernels: full-K matmul + fused bias (+ activation / + BN statistics)
# ----------------------------------------------------------------------------
def _mm_kernel(a_ref, b_ref, bias_ref, o_ref, *, act):
    acc = jnp.dot(a_ref[...], b_ref[...], preferred_element_type=jnp.float32)
    acc = _apply_act(acc + bias_ref[...], act)
    o_ref[...] = acc.astype(o_ref.dtype)


def _mm_stats_kernel(a_ref, b_ref, bias_ref, o_ref, sum_ref, ssq_ref, *,
                     tm, m_valid, need_mask):
    i = pl.program_id(1)  # inner (M-row) grid axis
    acc = jnp.dot(a_ref[...], b_ref[...], preferred_element_type=jnp.float32)
    acc = acc + bias_ref[...]
    o_ref[...] = acc.astype(o_ref.dtype)

    if need_mask:  # zero padded rows so they don't pollute batch statistics
        row = i * tm + jax.lax.broadcasted_iota(jnp.int32, acc.shape, 0)
        acc = jnp.where(row < m_valid, acc, 0.0)

    @pl.when(i == 0)
    def _():
        sum_ref[...] = jnp.zeros_like(sum_ref)
        ssq_ref[...] = jnp.zeros_like(ssq_ref)

    sum_ref[...] += jnp.sum(acc, axis=0, keepdims=True)
    ssq_ref[...] += jnp.sum(acc * acc, axis=0, keepdims=True)


def _single_buffered_spec(shape, index_map):
    # Grid-invariant blocks (weights / bias) are never re-fetched; one VMEM
    # buffer suffices — halves their footprint vs. default double buffering.
    try:
        return pl.BlockSpec(shape, index_map, pipeline_mode=pl.Buffered(1))
    except Exception:  # pipeline_mode unsupported -> fall back to default
        return pl.BlockSpec(shape, index_map)


def matmul_bias_act(a, b, bias, *, n_valid, act="none",
                    out_dtype=jnp.float32, bn_stats=False):
    """(M,Kp) @ (Kp,Np) + bias(1,Np), optional fused activation or BN stats.

    a/b are bf16 (MXU); accumulation / bias / epilogue are f32. Kp and Np are
    already lane-padded by the caller; only the first n_valid output columns
    are meaningful and are sliced off here.
    """
    assert not (bn_stats and act != "none")
    M, Kp = a.shape
    Kp2, Np = b.shape
    assert Kp == Kp2 and bias.shape == (1, Np)
    out_bytes = jnp.dtype(out_dtype).itemsize

    # ---- N tiling: only for very large weight blocks (keeps v7x VMEM sane
    # and lets the megacore split the weight DMA instead of replicating it).
    tn = Np
    while tn > 256 and tn % 256 == 0 and Kp * tn * 2 > _WEIGHT_BLOCK_LIMIT:
        tn //= 2
    grid_n = Np // tn
    weight_bufs = 1 if grid_n == 1 else 2

    # ---- M tiling: single block when it fits the budget (no forced split on
    # single-TC chips); otherwise prefer a divisor tile so A needs no padding.
    per_row = 2 * Kp * 2 + 2 * tn * out_bytes          # A dbl-buf + out dbl-buf
    fixed = weight_bufs * Kp * tn * 2 + 8 * tn * 4     # weights + bias/stats
    tm_cap = max(8, min(1024, ((_VMEM_BUDGET - fixed) // max(per_row, 1)) // 8 * 8))
    M8 = _round_up(max(M, 1), 8)
    if M8 <= tm_cap:
        tm = M8
    else:
        tm = 8
        for t in range(min(tm_cap, M8), 7, -8):
            if M8 % t == 0:
                tm = t
                break
        if tm < max(64, tm_cap // 2):
            tm = tm_cap  # accept a small row pad instead of uselessly tiny tiles
    grid_m = _cdiv(M8, tm)
    Mp = grid_m * tm
    if Mp > M:
        # TODO(synk): mask the ragged last M block in-kernel instead of padding A.
        a = jnp.pad(a, ((0, Mp - M), (0, 0)))

    a_spec = pl.BlockSpec((tm, Kp), lambda j, i: (i, 0))
    if grid_n == 1:
        b_spec = _single_buffered_spec((Kp, tn), lambda j, i: (0, j))
        bias_spec = _single_buffered_spec((1, tn), lambda j, i: (0, j))
    else:
        b_spec = pl.BlockSpec((Kp, tn), lambda j, i: (0, j))
        bias_spec = pl.BlockSpec((1, tn), lambda j, i: (0, j))
    out_spec = pl.BlockSpec((tm, tn), lambda j, i: (i, j))

    comp = pltpu.CompilerParams(
        dimension_semantics=("parallel", "arbitrary" if bn_stats else "parallel"),
        vmem_limit_bytes=_VMEM_LIMIT)

    if bn_stats:
        kern = functools.partial(_mm_stats_kernel, tm=tm, m_valid=M,
                                 need_mask=(Mp > M))
        out, s, sq = pl.pallas_call(
            kern,
            out_shape=(jax.ShapeDtypeStruct((Mp, Np), out_dtype),
                       jax.ShapeDtypeStruct((1, Np), jnp.float32),
                       jax.ShapeDtypeStruct((1, Np), jnp.float32)),
            grid_spec=pltpu.PrefetchScalarGridSpec(
                num_scalar_prefetch=0,
                grid=(grid_n, grid_m),
                in_specs=[a_spec, b_spec, bias_spec],
                out_specs=[out_spec,
                           pl.BlockSpec((1, tn), lambda j, i: (0, j)),
                           pl.BlockSpec((1, tn), lambda j, i: (0, j))]),
            compiler_params=comp,
        )(a, b, bias)
        return out[:M, :n_valid], s[0, :n_valid], sq[0, :n_valid]

    kern = functools.partial(_mm_kernel, act=act)
    out = pl.pallas_call(
        kern,
        out_shape=jax.ShapeDtypeStruct((Mp, Np), out_dtype),
        grid_spec=pltpu.PrefetchScalarGridSpec(
            num_scalar_prefetch=0,
            grid=(grid_n, grid_m),
            in_specs=[a_spec, b_spec, bias_spec],
            out_specs=out_spec),
        compiler_params=comp,
    )(a, b, bias)
    return out[:M, :n_valid]


# ----------------------------------------------------------------------------
# Conv2d (zero padding, cross-correlation == PyTorch Conv2d) via im2col+Pallas
# ----------------------------------------------------------------------------
def _im2col(x, k, stride, k_total):
    """x: (B,H,W,C) -> (B,Ho,Wo,k_total); last dim zero-padded to k_total."""
    B, H, W, C = x.shape
    pad = k // 2
    xp = jnp.pad(x, ((0, 0), (pad, pad), (pad, pad), (0, 0)))
    Ho = (H + 2 * pad - k) // stride + 1
    Wo = (W + 2 * pad - k) // stride + 1
    cols = []
    for dy in range(k):
        for dx in range(k):
            cols.append(xp[:, dy:dy + stride * (Ho - 1) + 1:stride,
                           dx:dx + stride * (Wo - 1) + 1:stride, :])
    if k_total > k * k * C:  # K lane pad folded into the same concat (no extra pass)
        cols.append(jnp.zeros((B, Ho, Wo, k_total - k * k * C), x.dtype))
    return jnp.concatenate(cols, axis=-1), Ho, Wo


def conv2d(x, w, b, stride, act="none", out_dtype=jnp.float32, bn_stats=False):
    """x: (B,H,W,Cin), w: (KER,KER,Cin,Cout), b: (Cout,)."""
    k, _, cin, cout = w.shape
    K = k * k * cin
    Kp = _round_up(K, _LANE)
    # 256-align larger Cout for the 256-wide MXUs on v6e/v7x; 128 otherwise.
    Np = _round_up(cout, _LANE) if cout < 128 else _round_up(cout, 256)

    patches, Ho, Wo = _im2col(x.astype(jnp.bfloat16), k, stride, Kp)
    Bn = x.shape[0]
    a = patches.reshape(Bn * Ho * Wo, Kp)

    wmat = jnp.pad(w.reshape(K, cout).astype(jnp.bfloat16),
                   ((0, Kp - K), (0, Np - cout)))
    bias = jnp.pad(b.astype(jnp.float32), (0, Np - cout)).reshape(1, Np)

    res = matmul_bias_act(a, wmat, bias, n_valid=cout, act=act,
                          out_dtype=out_dtype, bn_stats=bn_stats)
    if bn_stats:
        out, s, sq = res
        return out.reshape(Bn, Ho, Wo, cout), s, sq
    return res.reshape(Bn, Ho, Wo, cout)


# ----------------------------------------------------------------------------
# Plain-JAX glue ops (match PyTorch semantics)
# ----------------------------------------------------------------------------
def bn_finish(y, ssum, ssq, count, weight, bias, eps=1e-5):
    # training-mode nn.BatchNorm2d: batch stats over (N,H,W), biased variance,
    # computed from the in-kernel f32 per-channel sums / sums-of-squares.
    mean = ssum / count
    var = jnp.maximum(ssq / count - mean * mean, 0.0)
    scale = weight * jax.lax.rsqrt(var + eps)
    return (y.astype(jnp.float32) - mean) * scale + bias


def avg_pool2d(x, sc):
    B, H, W, C = x.shape
    return x.reshape(B, H // sc, sc, W // sc, sc, C).mean(axis=(2, 4))


def upsample_nearest2(x):
    return jnp.repeat(jnp.repeat(x, 2, axis=1), 2, axis=2)


def get_template_mix_image(blendA, templates):
    # FAMOS getTemplateMixImage: sum_n blendA[:, n] * templates[:, n]
    # blendA: (B,H,W,N), templates: (B,N,H,W,3) -> (B,H,W,3)
    return jnp.einsum("bhwn,bnhwc->bhwc", blendA, templates)


def resnet_block(x, rb):
    # conv -> BN -> ReLU -> conv -> BN; BN stats are fused into the conv kernel.
    cnt = x.shape[0] * x.shape[1] * x.shape[2]
    h, s1, q1 = conv2d(x, rb["w1"], rb["b1"], stride=1, act="none",
                       out_dtype=jnp.bfloat16, bn_stats=True)
    h = jax.nn.relu(bn_finish(h, s1, q1, cnt, rb["bn1_w"], rb["bn1_b"]))
    h = h.astype(jnp.bfloat16)
    h, s2, q2 = conv2d(h, rb["w2"], rb["b2"], stride=1, act="none",
                       out_dtype=jnp.bfloat16, bn_stats=True)
    h = bn_finish(h, s2, q2, cnt, rb["bn2_w"], rb["bn2_b"])
    return (x + rb["gamma"] * h).astype(jnp.bfloat16)


# ----------------------------------------------------------------------------
# NetU_MultiScale forward (bfirstNoise=0, input2=None, bCopyIn=False,
# bSkip=True, bTanh=True, nz=0)
# ----------------------------------------------------------------------------
def net_forward(params, input1_nhwc, M, cfg):
    nDep, N = cfg["nDep"], cfg["N"]

    x = input1_nhwc                      # bfirstNoise==0 -> x = input1
    _inp1_35 = input1_nhwc[..., 3:5]     # mirrors input1[:, 3:5] (unused: bCopyIn=False)

    # ---------------- encoder ----------------
    skips = []
    for i in range(nDep):
        p = params["e"][i]
        has_bn = (i != 0)
        is_last = (i == nDep - 1)
        if has_bn:
            x, s, q = conv2d(x, p["w"], p["b"], stride=2, act="none",
                             out_dtype=jnp.bfloat16, bn_stats=True)
            cnt = x.shape[0] * x.shape[1] * x.shape[2]
            x = bn_finish(x, s, q, cnt, p["bn_w"], p["bn_b"])
            x = jnp.tanh(x) if is_last else jax.nn.leaky_relu(x, negative_slope=0.2)
            x = x.astype(jnp.bfloat16)
        else:
            fused = "tanh" if is_last else "lrelu"
            x = conv2d(x, p["w"], p["b"], stride=2, act=fused,
                       out_dtype=jnp.bfloat16)
        if not is_last:
            skips.append(x)

    # ---------------- multiscale templates (no_grad block) ----------------
    B, Nt, three, Hm, Wm = M.shape
    MM = jnp.transpose(M.reshape(B * Nt, 3, Hm, Wm), (0, 2, 3, 1))  # NHWC
    mFeat = []
    for i in range(1, nDep):
        sc = 2 ** i
        pooled = avg_pool2d(MM, sc)
        mFeat.append(pooled.reshape(B, Nt, Hm // sc, Wm // sc, 3))
    mFeat = mFeat[::-1]

    # ---------------- decoder ----------------
    for i in range(nDep):
        p = params["d"][i]
        for rb in p["resblocks"]:
            x = resnet_block(x, rb)
        x = upsample_nearest2(x)
        is_last = (i == nDep - 1)
        if is_last:
            x = conv2d(x, p["w"], p["b"], stride=1, act="tanh",
                       out_dtype=jnp.float32)                       # bTanh fused
        else:
            x, s, q = conv2d(x, p["w"], p["b"], stride=1, act="none",
                             out_dtype=jnp.bfloat16, bn_stats=True)
            cnt = x.shape[0] * x.shape[1] * x.shape[2]
            x = bn_finish(x, s, q, cnt, p["bn_w"], p["bn_b"])
            x = jax.nn.relu(x).astype(jnp.bfloat16)
        if i < nDep - 1:                                            # bSkip
            x = jnp.concatenate([x, skips[-1 - i]], axis=-1)
            blendA = 4.0 * jnp.tanh(x[..., :N].astype(jnp.float32))
            # softmax is shift-invariant; reference's global-max subtract is a no-op
            blendA = jax.nn.softmax(blendA, axis=-1)
            mixed = get_template_mix_image(blendA, mFeat[i]).astype(jnp.bfloat16)
            x = jnp.concatenate([x, mixed], axis=-1)
    return x


# ----------------------------------------------------------------------------
# Deterministic parameter init (shapes from NetU_MultiScale.__init__)
# ----------------------------------------------------------------------------
def init_params(key, cfg):
    ngf, nDep, nc, ncIn, nBlocks = (cfg["ngf"], cfg["nDep"], cfg["nc"],
                                    cfg["ncIn"], cfg["nBlocks"])
    Ubottleneck = ngf * 2 ** (nDep - 1)
    keys = iter(jax.random.split(key, 256))

    def conv_init(cin, cout):
        w = jax.random.normal(next(keys), (KER, KER, cin, cout), jnp.float32) * 0.05
        b = jax.random.normal(next(keys), (cout,), jnp.float32) * 0.01
        return w, b

    params = {"e": [], "d": []}

    of = ncIn  # bfirstNoise*nz == 0
    for i in range(nDep):
        nf = Ubottleneck if i == nDep - 1 else ngf * 2 ** i
        w, b = conv_init(of, nf)
        p = {"w": w, "b": b}
        if i != 0:
            p["bn_w"] = jnp.ones((nf,), jnp.float32)
            p["bn_b"] = jnp.zeros((nf,), jnp.float32)
        params["e"].append(p)
        of = nf

    of = Ubottleneck  # nz=0, bfirstNoise=0
    for i in range(nDep):
        nf = nc if i == nDep - 1 else ngf * 2 ** (nDep - 2 - i)
        if i > 0:      # bSkip
            of *= 2
        if i > 0:
            of += 3
        resblocks = []
        for _ in range(nBlocks):
            w1, b1 = conv_init(of, of)
            w2, b2 = conv_init(of, of)
            resblocks.append({
                "w1": w1, "b1": b1,
                "bn1_w": jnp.ones((of,), jnp.float32),
                "bn1_b": jnp.zeros((of,), jnp.float32),
                "w2": w2, "b2": b2,
                "bn2_w": jnp.ones((of,), jnp.float32),
                "bn2_b": jnp.zeros((of,), jnp.float32),
                # nn.Parameter(torch.zeros(1)) in ResnetBlock.__init__
                "gamma": jnp.zeros((), jnp.float32),
            })
        w, b = conv_init(of, nf)
        p = {"resblocks": resblocks, "w": w, "b": b}
        if i != nDep - 1:
            p["bn_w"] = jnp.ones((nf,), jnp.float32)
            p["bn_b"] = jnp.zeros((nf,), jnp.float32)
        params["d"].append(p)
        of = nf
    return params


# ----------------------------------------------------------------------------
if __name__ == "__main__":
    # small config consistent with the module:  ngf > opt.N + 10
    cfg = dict(ngf=16, nDep=2, nc=3, ncIn=5, N=3, nBlocks=1)
    assert cfg["ngf"] > cfg["N"] + 10

    B, H, W = 2, 16, 16
    key = jax.random.PRNGKey(0)
    k_in, k_m, k_p = jax.random.split(key, 3)

    # PyTorch-layout inputs (NCHW / (B,N,3,H,W)); input1 needs >=5 channels
    input1_nchw = jax.random.normal(k_in, (B, cfg["ncIn"], H, W), jnp.float32)
    M = jax.random.normal(k_m, (B, cfg["N"], 3, H, W), jnp.float32)

    params = init_params(k_p, cfg)

    fwd = jax.jit(functools.partial(net_forward, cfg=cfg))
    x_nhwc = jnp.transpose(input1_nchw, (0, 2, 3, 1))
    out_nhwc = fwd(params, x_nhwc, M)
    out = jnp.transpose(out_nhwc, (0, 3, 1, 2))  # back to NCHW
    jax.block_until_ready(out)

    assert out.shape == (B, cfg["nc"], H, W), out.shape
    assert bool(jnp.all(jnp.isfinite(out)))
    print("KERNEL_OK")
</pallas_src>

<mosaic_0001>
module attributes {stable_mosaic.version = 11 : i64} {
  func.func @_mm_kernel(%arg0: i32, %arg1: i32, %arg2: memref<128x128xbf16, #tpu.memory_space<vmem>>, %arg3: memref<128x128xbf16, #tpu.memory_space<vmem>>, %arg4: memref<1x128xf32, #tpu.memory_space<vmem>>, %arg5: memref<128x128xbf16, #tpu.memory_space<vmem>>) attributes {dimension_semantics = [#tpu.dimension_semantics<parallel>, #tpu.dimension_semantics<parallel>], iteration_bounds = array<i64: 1, 1>, scalar_prefetch = 0 : i64, scratch_operands = 0 : i64, tpu.core_type = #tpu.core_type<tc>, window_params = [{transform_indices = @transform_0, window_bounds = array<i64: 128, 128>}, {pipeline_mode = #tpu.pipeline_mode<synchronous>, transform_indices = @transform_1, window_bounds = array<i64: 128, 128>}, {pipeline_mode = #tpu.pipeline_mode<synchronous>, transform_indices = @transform_2, window_bounds = array<i64: 1, 128>}, {transform_indices = @transform_3, window_bounds = array<i64: 128, 128>}]} {
    %c0 = arith.constant 0 : index
    %c0_0 = arith.constant 0 : index
    %0 = vector.load %arg2[%c0, %c0_0] : memref<128x128xbf16, #tpu.memory_space<vmem>>, vector<128x128xbf16>
    %c0_1 = arith.constant 0 : index
    %c0_2 = arith.constant 0 : index
    %1 = vector.load %arg3[%c0_1, %c0_2] : memref<128x128xbf16, #tpu.memory_space<vmem>>, vector<128x128xbf16>
    %cst = arith.constant dense<0.000000e+00> : vector<128x128xf32>
    %2 = tpu.matmul %0, %1, %cst {dimension_numbers = #tpu.dot_dimension_numbers<[1], [0], [0], [1], [0, 0, 1, 1], [], []>} : vector<128x128xbf16>, vector<128x128xbf16>, vector<128x128xf32> -> vector<128x128xf32>
    %c0_3 = arith.constant 0 : index
    %c0_4 = arith.constant 0 : index
    %3 = vector.load %arg4[%c0_3, %c0_4] : memref<1x128xf32, #tpu.memory_space<vmem>>, vector<1x128xf32>
    %4 = vector.broadcast %3 : vector<1x128xf32> to vector<128x128xf32>
    %5 = arith.addf %2, %4 : vector<128x128xf32>
    %cst_5 = arith.constant 0.000000e+00 : f32
    %6 = vector.broadcast %cst_5 : f32 to vector<128x128xf32>
    %7 = arith.cmpf oge, %5, %6 : vector<128x128xf32>
    %cst_6 = arith.constant 2.000000e-01 : f32
    %8 = vector.broadcast %cst_6 : f32 to vector<128x128xf32>
    %9 = arith.mulf %8, %5 : vector<128x128xf32>
    %10 = arith.select %7, %5, %9 : vector<128x128xi1>, vector<128x128xf32>
    %11 = arith.truncf %10 : vector<128x128xf32> to vector<128x128xbf16>
    %c0_7 = arith.constant 0 : index
    %c0_8 = arith.constant 0 : index
    %12 = vector.load %arg5[%c0_7, %c0_8] : memref<128x128xbf16, #tpu.memory_space<vmem>>, vector<128x128xbf16>
    tpu.vector_store %arg5[%c0_7, %c0_8], %11 {strides = array<i32>} : memref<128x128xbf16, #tpu.memory_space<vmem>>, vector<128x128xbf16>,
    return
  }
  func.func @transform_0(%arg0: i32, %arg1: i32) -> (i32, i32) {
    %c0_i32 = arith.constant 0 : i32
    %c0_i32_0 = arith.constant 0 : i32
    return %arg1, %c0_i32 : i32, i32
  }
  func.func @transform_1(%arg0: i32, %arg1: i32) -> (i32, i32) {
    %c0_i32 = arith.constant 0 : i32
    %c0_i32_0 = arith.constant 0 : i32
    return %c0_i32, %arg0 : i32, i32
  }
  func.func @transform_2(%arg0: i32, %arg1: i32) -> (i32, i32) {
    %c0_i32 = arith.constant 0 : i32
    %c0_i32_0 = arith.constant 0 : i32
    return %c0_i32, %arg0 : i32, i32
  }
  func.func @transform_3(%arg0: i32, %arg1: i32) -> (i32, i32) {
    %c0_i32 = arith.constant 0 : i32
    return %arg1, %arg0 : i32, i32
  }
}

module attributes {stable_mosaic.version = 11 : i64} {
  func.func @_mm_stats_kernel(%arg0: i32, %arg1: i32, %arg2: memref<32x512xbf16, #tpu.memory_space<vmem>>, %arg3: memref<512x128xbf16, #tpu.memory_space<vmem>>, %arg4: memref<1x128xf32, #tpu.memory_space<vmem>>, %arg5: memref<32x128xbf16, #tpu.memory_space<vmem>>, %arg6: memref<1x128xf32, #tpu.memory_space<vmem>>, %arg7: memref<1x128xf32, #tpu.memory_space<vmem>>) attributes {dimension_semantics = [#tpu.dimension_semantics<parallel>, #tpu.dimension_semantics<arbitrary>], iteration_bounds = array<i64: 1, 1>, scalar_prefetch = 0 : i64, scratch_operands = 0 : i64, tpu.core_type = #tpu.core_type<tc>, window_params = [{transform_indices = @transform_0, window_bounds = array<i64: 32, 512>}, {pipeline_mode = #tpu.pipeline_mode<synchronous>, transform_indices = @transform_1, window_bounds = array<i64: 512, 128>}, {pipeline_mode = #tpu.pipeline_mode<synchronous>, transform_indices = @transform_2, window_bounds = array<i64: 1, 128>}, {transform_indices = @transform_3, window_bounds = array<i64: 32, 128>}, {transform_indices = @transform_4, window_bounds = array<i64: 1, 128>}, {transform_indices = @transform_5, window_bounds = array<i64: 1, 128>}]} {
    %c0 = arith.constant 0 : index
    %c0_0 = arith.constant 0 : index
    %0 = vector.load %arg2[%c0, %c0_0] : memref<32x512xbf16, #tpu.memory_space<vmem>>, vector<32x512xbf16>
    %c0_1 = arith.constant 0 : index
    %c0_2 = arith.constant 0 : index
    %1 = vector.load %arg3[%c0_1, %c0_2] : memref<512x128xbf16, #tpu.memory_space<vmem>>, vector<512x128xbf16>
    %cst = arith.constant dense<0.000000e+00> : vector<32x128xf32>
    %2 = tpu.matmul %0, %1, %cst {dimension_numbers = #tpu.dot_dimension_numbers<[1], [0], [0], [1], [0, 0, 1, 1], [], []>} : vector<32x512xbf16>, vector<512x128xbf16>, vector<32x128xf32> -> vector<32x128xf32>
    %c0_3 = arith.constant 0 : index
    %c0_4 = arith.constant 0 : index
    %3 = vector.load %arg4[%c0_3, %c0_4] : memref<1x128xf32, #tpu.memory_space<vmem>>, vector<1x128xf32>
    %4 = vector.broadcast %3 : vector<1x128xf32> to vector<32x128xf32>
    %5 = arith.addf %2, %4 : vector<32x128xf32>
    %6 = arith.truncf %5 : vector<32x128xf32> to vector<32x128xbf16>
    %c0_5 = arith.constant 0 : index
    %c0_6 = arith.constant 0 : index
    %7 = vector.load %arg5[%c0_5, %c0_6] : memref<32x128xbf16, #tpu.memory_space<vmem>>, vector<32x128xbf16>
    tpu.vector_store %arg5[%c0_5, %c0_6], %6 {strides = array<i32>} : memref<32x128xbf16, #tpu.memory_space<vmem>>, vector<32x128xbf16>,
    %c0_i32 = arith.constant 0 : i32
    %8 = arith.cmpi eq, %arg1, %c0_i32 : i32
    %9 = arith.extui %8 : i1 to i32
    %c0_i32_7 = arith.constant 0 : i32
    %10 = arith.cmpi ne, %9, %c0_i32_7 : i32
    scf.if %10 {
      %cst_18 = arith.constant 0.000000e+00 : f32
      %22 = vector.broadcast %cst_18 : f32 to vector<1x128xf32>
      %c0_19 = arith.constant 0 : index
      %c0_20 = arith.constant 0 : index
      %23 = vector.load %arg6[%c0_19, %c0_20] : memref<1x128xf32, #tpu.memory_space<vmem>>, vector<1x128xf32>
      tpu.vector_store %arg6[%c0_19, %c0_20], %22 {strides = array<i32>} : memref<1x128xf32, #tpu.memory_space<vmem>>, vector<1x128xf32>,
      %cst_21 = arith.constant 0.000000e+00 : f32
      %24 = vector.broadcast %cst_21 : f32 to vector<1x128xf32>
      %c0_22 = arith.constant 0 : index
      %c0_23 = arith.constant 0 : index
      %25 = vector.load %arg7[%c0_22, %c0_23] : memref<1x128xf32, #tpu.memory_space<vmem>>, vector<1x128xf32>
      tpu.vector_store %arg7[%c0_22, %c0_23], %24 {strides = array<i32>} : memref<1x128xf32, #tpu.memory_space<vmem>>, vector<1x128xf32>,
    } else {
    }
    %c0_8 = arith.constant 0 : index
    %c0_9 = arith.constant 0 : index
    %11 = vector.load %arg6[%c0_8, %c0_9] : memref<1x128xf32, #tpu.memory_space<vmem>>, vector<1x128xf32>
    %cst_10 = arith.constant dense<0.000000e+00> : vector<128xf32>
    %12 = vector.multi_reduction <add>, %5, %cst_10 [0] : vector<32x128xf32> to vector<128xf32>
    %13 = vector.shape_cast %12 : vector<128xf32> to vector<1x128xf32>
    %14 = arith.addf %11, %13 : vector<1x128xf32>
    %c0_11 = arith.constant 0 : index
    %c0_12 = arith.constant 0 : index
    %15 = vector.load %arg6[%c0_11, %c0_12] : memref<1x128xf32, #tpu.memory_space<vmem>>, vector<1x128xf32>
    tpu.vector_store %arg6[%c0_11, %c0_12], %14 {strides = array<i32>} : memref<1x128xf32, #tpu.memory_space<vmem>>, vector<1x128xf32>,
    %c0_13 = arith.constant 0 : index
    %c0_14 = arith.constant 0 : index
    %16 = vector.load %arg7[%c0_13, %c0_14] : memref<1x128xf32, #tpu.memory_space<vmem>>, vector<1x128xf32>
    %17 = arith.mulf %5, %5 : vector<32x128xf32>
    %cst_15 = arith.constant dense<0.000000e+00> : vector<128xf32>
    %18 = vector.multi_reduction <add>, %17, %cst_15 [0] : vector<32x128xf32> to vector<128xf32>
    %19 = vector.shape_cast %18 : vector<128xf32> to vector<1x128xf32>
    %20 = arith.addf %16, %19 : vector<1x128xf32>
    %c0_16 = arith.constant 0 : index
    %c0_17 = arith.constant 0 : index
    %21 = vector.load %arg7[%c0_16, %c0_17] : memref<1x128xf32, #tpu.memory_space<vmem>>, vector<1x128xf32>
    tpu.vector_store %arg7[%c0_16, %c0_17], %20 {strides = array<i32>} : memref<1x128xf32, #tpu.memory_space<vmem>>, vector<1x128xf32>,
    return
  }
  func.func @transform_0(%arg0: i32, %arg1: i32) -> (i32, i32) {
    %c0_i32 = arith.constant 0 : i32
    %c0_i32_0 = arith.constant 0 : i32
    return %arg1, %c0_i32 : i32, i32
  }
  func.func @transform_1(%arg0: i32, %arg1: i32) -> (i32, i32) {
    %c0_i32 = arith.constant 0 : i32
    %c0_i32_0 = arith.constant 0 : i32
    return %c0_i32, %arg0 : i32, i32
  }
  func.func @transform_2(%arg0: i32, %arg1: i32) -> (i32, i32) {
    %c0_i32 = arith.constant 0 : i32
    %c0_i32_0 = arith.constant 0 : i32
    return %c0_i32, %arg0 : i32, i32
  }
  func.func @transform_3(%arg0: i32, %arg1: i32) -> (i32, i32) {
    %c0_i32 = arith.constant 0 : i32
    return %arg1, %arg0 : i32, i32
  }
  func.func @transform_4(%arg0: i32, %arg1: i32) -> (i32, i32) {
    %c0_i32 = arith.constant 0 : i32
    %c0_i32_0 = arith.constant 0 : i32
    return %c0_i32, %arg0 : i32, i32
  }
  func.func @transform_5(%arg0: i32, %arg1: i32) -> (i32, i32) {
    %c0_i32 = arith.constant 0 : i32
    %c0_i32_0 = arith.constant 0 : i32
    return %c0_i32, %arg0 : i32, i32
  }
}

module attributes {stable_mosaic.version = 11 : i64} {
  func.func @_mm_stats_kernel(%arg0: i32, %arg1: i32, %arg2: memref<32x896xbf16, #tpu.memory_space<vmem>>, %arg3: memref<896x128xbf16, #tpu.memory_space<vmem>>, %arg4: memref<1x128xf32, #tpu.memory_space<vmem>>, %arg5: memref<32x128xbf16, #tpu.memory_space<vmem>>, %arg6: memref<1x128xf32, #tpu.memory_space<vmem>>, %arg7: memref<1x128xf32, #tpu.memory_space<vmem>>) attributes {dimension_semantics = [#tpu.dimension_semantics<parallel>, #tpu.dimension_semantics<arbitrary>], iteration_bounds = array<i64: 1, 1>, scalar_prefetch = 0 : i64, scratch_operands = 0 : i64, tpu.core_type = #tpu.core_type<tc>, window_params = [{transform_indices = @transform_0, window_bounds = array<i64: 32, 896>}, {pipeline_mode = #tpu.pipeline_mode<synchronous>, transform_indices = @transform_1, window_bounds = array<i64: 896, 128>}, {pipeline_mode = #tpu.pipeline_mode<synchronous>, transform_indices = @transform_2, window_bounds = array<i64: 1, 128>}, {transform_indices = @transform_3, window_bounds = array<i64: 32, 128>}, {transform_indices = @transform_4, window_bounds = array<i64: 1, 128>}, {transform_indices = @transform_5, window_bounds = array<i64: 1, 128>}]} {
    %c0 = arith.constant 0 : index
    %c0_0 = arith.constant 0 : index
    %0 = vector.load %arg2[%c0, %c0_0] : memref<32x896xbf16, #tpu.memory_space<vmem>>, vector<32x896xbf16>
    %c0_1 = arith.constant 0 : index
    %c0_2 = arith.constant 0 : index
    %1 = vector.load %arg3[%c0_1, %c0_2] : memref<896x128xbf16, #tpu.memory_space<vmem>>, vector<896x128xbf16>
    %cst = arith.constant dense<0.000000e+00> : vector<32x128xf32>
    %2 = tpu.matmul %0, %1, %cst {dimension_numbers = #tpu.dot_dimension_numbers<[1], [0], [0], [1], [0, 0, 1, 1], [], []>} : vector<32x896xbf16>, vector<896x128xbf16>, vector<32x128xf32> -> vector<32x128xf32>
    %c0_3 = arith.constant 0 : index
    %c0_4 = arith.constant 0 : index
    %3 = vector.load %arg4[%c0_3, %c0_4] : memref<1x128xf32, #tpu.memory_space<vmem>>, vector<1x128xf32>
    %4 = vector.broadcast %3 : vector<1x128xf32> to vector<32x128xf32>
    %5 = arith.addf %2, %4 : vector<32x128xf32>
    %6 = arith.truncf %5 : vector<32x128xf32> to vector<32x128xbf16>
    %c0_5 = arith.constant 0 : index
    %c0_6 = arith.constant 0 : index
    %7 = vector.load %arg5[%c0_5, %c0_6] : memref<32x128xbf16, #tpu.memory_space<vmem>>, vector<32x128xbf16>
    tpu.vector_store %arg5[%c0_5, %c0_6], %6 {strides = array<i32>} : memref<32x128xbf16, #tpu.memory_space<vmem>>, vector<32x128xbf16>,
    %c0_i32 = arith.constant 0 : i32
    %8 = arith.cmpi eq, %arg1, %c0_i32 : i32
    %9 = arith.extui %8 : i1 to i32
    %c0_i32_7 = arith.constant 0 : i32
    %10 = arith.cmpi ne, %9, %c0_i32_7 : i32
    scf.if %10 {
      %cst_18 = arith.constant 0.000000e+00 : f32
      %22 = vector.broadcast %cst_18 : f32 to vector<1x128xf32>
      %c0_19 = arith.constant 0 : index
      %c0_20 = arith.constant 0 : index
      %23 = vector.load %arg6[%c0_19, %c0_20] : memref<1x128xf32, #tpu.memory_space<vmem>>, vector<1x128xf32>
      tpu.vector_store %arg6[%c0_19, %c0_20], %22 {strides = array<i32>} : memref<1x128xf32, #tpu.memory_space<vmem>>, vector<1x128xf32>,
      %cst_21 = arith.constant 0.000000e+00 : f32
      %24 = vector.broadcast %cst_21 : f32 to vector<1x128xf32>
      %c0_22 = arith.constant 0 : index
      %c0_23 = arith.constant 0 : index
      %25 = vector.load %arg7[%c0_22, %c0_23] : memref<1x128xf32, #tpu.memory_space<vmem>>, vector<1x128xf32>
      tpu.vector_store %arg7[%c0_22, %c0_23], %24 {strides = array<i32>} : memref<1x128xf32, #tpu.memory_space<vmem>>, vector<1x128xf32>,
    } else {
    }
    %c0_8 = arith.constant 0 : index
    %c0_9 = arith.constant 0 : index
    %11 = vector.load %arg6[%c0_8, %c0_9] : memref<1x128xf32, #tpu.memory_space<vmem>>, vector<1x128xf32>
    %cst_10 = arith.constant dense<0.000000e+00> : vector<128xf32>
    %12 = vector.multi_reduction <add>, %5, %cst_10 [0] : vector<32x128xf32> to vector<128xf32>
    %13 = vector.shape_cast %12 : vector<128xf32> to vector<1x128xf32>
    %14 = arith.addf %11, %13 : vector<1x128xf32>
    %c0_11 = arith.constant 0 : index
    %c0_12 = arith.constant 0 : index
    %15 = vector.load %arg6[%c0_11, %c0_12] : memref<1x128xf32, #tpu.memory_space<vmem>>, vector<1x128xf32>
    tpu.vector_store %arg6[%c0_11, %c0_12], %14 {strides = array<i32>} : memref<1x128xf32, #tpu.memory_space<vmem>>, vector<1x128xf32>,
    %c0_13 = arith.constant 0 : index
    %c0_14 = arith.constant 0 : index
    %16 = vector.load %arg7[%c0_13, %c0_14] : memref<1x128xf32, #tpu.memory_space<vmem>>, vector<1x128xf32>
    %17 = arith.mulf %5, %5 : vector<32x128xf32>
    %cst_15 = arith.constant dense<0.000000e+00> : vector<128xf32>
    %18 = vector.multi_reduction <add>, %17, %cst_15 [0] : vector<32x128xf32> to vector<128xf32>
    %19 = vector.shape_cast %18 : vector<128xf32> to vector<1x128xf32>
    %20 = arith.addf %16, %19 : vector<1x128xf32>
    %c0_16 = arith.constant 0 : index
    %c0_17 = arith.constant 0 : index
    %21 = vector.load %arg7[%c0_16, %c0_17] : memref<1x128xf32, #tpu.memory_space<vmem>>, vector<1x128xf32>
    tpu.vector_store %arg7[%c0_16, %c0_17], %20 {strides = array<i32>} : memref<1x128xf32, #tpu.memory_space<vmem>>, vector<1x128xf32>,
    return
  }
  func.func @transform_0(%arg0: i32, %arg1: i32) -> (i32, i32) {
    %c0_i32 = arith.constant 0 : i32
    %c0_i32_0 = arith.constant 0 : i32
    return %arg1, %c0_i32 : i32, i32
  }
  func.func @transform_1(%arg0: i32, %arg1: i32) -> (i32, i32) {
    %c0_i32 = arith.constant 0 : i32
    %c0_i32_0 = arith.constant 0 : i32
    return %c0_i32, %arg0 : i32, i32
  }
  func.func @transform_2(%arg0: i32, %arg1: i32) -> (i32, i32) {
    %c0_i32 = arith.constant 0 : i32
    %c0_i32_0 = arith.constant 0 : i32
    return %c0_i32, %arg0 : i32, i32
  }
  func.func @transform_3(%arg0: i32, %arg1: i32) -> (i32, i32) {
    %c0_i32 = arith.constant 0 : i32
    return %arg1, %arg0 : i32, i32
  }
  func.func @transform_4(%arg0: i32, %arg1: i32) -> (i32, i32) {
    %c0_i32 = arith.constant 0 : i32
    %c0_i32_0 = arith.constant 0 : i32
    return %c0_i32, %arg0 : i32, i32
  }
  func.func @transform_5(%arg0: i32, %arg1: i32) -> (i32, i32) {
    %c0_i32 = arith.constant 0 : i32
    %c0_i32_0 = arith.constant 0 : i32
    return %c0_i32, %arg0 : i32, i32
  }
}

module attributes {stable_mosaic.version = 11 : i64} {
  func.func @_mm_stats_kernel(%arg0: i32, %arg1: i32, %arg2: memref<128x896xbf16, #tpu.memory_space<vmem>>, %arg3: memref<896x128xbf16, #tpu.memory_space<vmem>>, %arg4: memref<1x128xf32, #tpu.memory_space<vmem>>, %arg5: memref<128x128xbf16, #tpu.memory_space<vmem>>, %arg6: memref<1x128xf32, #tpu.memory_space<vmem>>, %arg7: memref<1x128xf32, #tpu.memory_space<vmem>>) attributes {dimension_semantics = [#tpu.dimension_semantics<parallel>, #tpu.dimension_semantics<arbitrary>], iteration_bounds = array<i64: 1, 1>, scalar_prefetch = 0 : i64, scratch_operands = 0 : i64, tpu.core_type = #tpu.core_type<tc>, window_params = [{transform_indices = @transform_0, window_bounds = array<i64: 128, 896>}, {pipeline_mode = #tpu.pipeline_mode<synchronous>, transform_indices = @transform_1, window_bounds = array<i64: 896, 128>}, {pipeline_mode = #tpu.pipeline_mode<synchronous>, transform_indices = @transform_2, window_bounds = array<i64: 1, 128>}, {transform_indices = @transform_3, window_bounds = array<i64: 128, 128>}, {transform_indices = @transform_4, window_bounds = array<i64: 1, 128>}, {transform_indices = @transform_5, window_bounds = array<i64: 1, 128>}]} {
    %c0 = arith.constant 0 : index
    %c0_0 = arith.constant 0 : index
    %0 = vector.load %arg2[%c0, %c0_0] : memref<128x896xbf16, #tpu.memory_space<vmem>>, vector<128x896xbf16>
    %c0_1 = arith.constant 0 : index
    %c0_2 = arith.constant 0 : index
    %1 = vector.load %arg3[%c0_1, %c0_2] : memref<896x128xbf16, #tpu.memory_space<vmem>>, vector<896x128xbf16>
    %cst = arith.constant dense<0.000000e+00> : vector<128x128xf32>
    %2 = tpu.matmul %0, %1, %cst {dimension_numbers = #tpu.dot_dimension_numbers<[1], [0], [0], [1], [0, 0, 1, 1], [], []>} : vector<128x896xbf16>, vector<896x128xbf16>, vector<128x128xf32> -> vector<128x128xf32>
    %c0_3 = arith.constant 0 : index
    %c0_4 = arith.constant 0 : index
    %3 = vector.load %arg4[%c0_3, %c0_4] : memref<1x128xf32, #tpu.memory_space<vmem>>, vector<1x128xf32>
    %4 = vector.broadcast %3 : vector<1x128xf32> to vector<128x128xf32>
    %5 = arith.addf %2, %4 : vector<128x128xf32>
    %6 = arith.truncf %5 : vector<128x128xf32> to vector<128x128xbf16>
    %c0_5 = arith.constant 0 : index
    %c0_6 = arith.constant 0 : index
    %7 = vector.load %arg5[%c0_5, %c0_6] : memref<128x128xbf16, #tpu.memory_space<vmem>>, vector<128x128xbf16>
    tpu.vector_store %arg5[%c0_5, %c0_6], %6 {strides = array<i32>} : memref<128x128xbf16, #tpu.memory_space<vmem>>, vector<128x128xbf16>,
    %c0_i32 = arith.constant 0 : i32
    %8 = arith.cmpi eq, %arg1, %c0_i32 : i32
    %9 = arith.extui %8 : i1 to i32
    %c0_i32_7 = arith.constant 0 : i32
    %10 = arith.cmpi ne, %9, %c0_i32_7 : i32
    scf.if %10 {
      %cst_18 = arith.constant 0.000000e+00 : f32
      %22 = vector.broadcast %cst_18 : f32 to vector<1x128xf32>
      %c0_19 = arith.constant 0 : index
      %c0_20 = arith.constant 0 : index
      %23 = vector.load %arg6[%c0_19, %c0_20] : memref<1x128xf32, #tpu.memory_space<vmem>>, vector<1x128xf32>
      tpu.vector_store %arg6[%c0_19, %c0_20], %22 {strides = array<i32>} : memref<1x128xf32, #tpu.memory_space<vmem>>, vector<1x128xf32>,
      %cst_21 = arith.constant 0.000000e+00 : f32
      %24 = vector.broadcast %cst_21 : f32 to vector<1x128xf32>
      %c0_22 = arith.constant 0 : index
      %c0_23 = arith.constant 0 : index
      %25 = vector.load %arg7[%c0_22, %c0_23] : memref<1x128xf32, #tpu.memory_space<vmem>>, vector<1x128xf32>
      tpu.vector_store %arg7[%c0_22, %c0_23], %24 {strides = array<i32>} : memref<1x128xf32, #tpu.memory_space<vmem>>, vector<1x128xf32>,
    } else {
    }
    %c0_8 = arith.constant 0 : index
    %c0_9 = arith.constant 0 : index
    %11 = vector.load %arg6[%c0_8, %c0_9] : memref<1x128xf32, #tpu.memory_space<vmem>>, vector<1x128xf32>
    %cst_10 = arith.constant dense<0.000000e+00> : vector<128xf32>
    %12 = vector.multi_reduction <add>, %5, %cst_10 [0] : vector<128x128xf32> to vector<128xf32>
    %13 = vector.shape_cast %12 : vector<128xf32> to vector<1x128xf32>
    %14 = arith.addf %11, %13 : vector<1x128xf32>
    %c0_11 = arith.constant 0 : index
    %c0_12 = arith.constant 0 : index
    %15 = vector.load %arg6[%c0_11, %c0_12] : memref<1x128xf32, #tpu.memory_space<vmem>>, vector<1x128xf32>
    tpu.vector_store %arg6[%c0_11, %c0_12], %14 {strides = array<i32>} : memref<1x128xf32, #tpu.memory_space<vmem>>, vector<1x128xf32>,
    %c0_13 = arith.constant 0 : index
    %c0_14 = arith.constant 0 : index
    %16 = vector.load %arg7[%c0_13, %c0_14] : memref<1x128xf32, #tpu.memory_space<vmem>>, vector<1x128xf32>
    %17 = arith.mulf %5, %5 : vector<128x128xf32>
    %cst_15 = arith.constant dense<0.000000e+00> : vector<128xf32>
    %18 = vector.multi_reduction <add>, %17, %cst_15 [0] : vector<128x128xf32> to vector<128xf32>
    %19 = vector.shape_cast %18 : vector<128xf32> to vector<1x128xf32>
    %20 = arith.addf %16, %19 : vector<1x128xf32>
    %c0_16 = arith.constant 0 : index
    %c0_17 = arith.constant 0 : index
    %21 = vector.load %arg7[%c0_16, %c0_17] : memref<1x128xf32, #tpu.memory_space<vmem>>, vector<1x128xf32>
    tpu.vector_store %arg7[%c0_16, %c0_17], %20 {strides = array<i32>} : memref<1x128xf32, #tpu.memory_space<vmem>>, vector<1x128xf32>,
    return
  }
  func.func @transform_0(%arg0: i32, %arg1: i32) -> (i32, i32) {
    %c0_i32 = arith.constant 0 : i32
    %c0_i32_0 = arith.constant 0 : i32
    return %arg1, %c0_i32 : i32, i32
  }
  func.func @transform_1(%arg0: i32, %arg1: i32) -> (i32, i32) {
    %c0_i32 = arith.constant 0 : i32
    %c0_i32_0 = arith.constant 0 : i32
    return %c0_i32, %arg0 : i32, i32
  }
  func.func @transform_2(%arg0: i32, %arg1: i32) -> (i32, i32) {
    %c0_i32 = arith.constant 0 : i32
    %c0_i32_0 = arith.constant 0 : i32
    return %c0_i32, %arg0 : i32, i32
  }
  func.func @transform_3(%arg0: i32, %arg1: i32) -> (i32, i32) {
    %c0_i32 = arith.constant 0 : i32
    return %arg1, %arg0 : i32, i32
  }
  func.func @transform_4(%arg0: i32, %arg1: i32) -> (i32, i32) {
    %c0_i32 = arith.constant 0 : i32
    %c0_i32_0 = arith.constant 0 : i32
    return %c0_i32, %arg0 : i32, i32
  }
  func.func @transform_5(%arg0: i32, %arg1: i32) -> (i32, i32) {
    %c0_i32 = arith.constant 0 : i32
    %c0_i32_0 = arith.constant 0 : i32
    return %c0_i32, %arg0 : i32, i32
  }
}

module attributes {stable_mosaic.version = 11 : i64} {
  func.func @_mm_kernel(%arg0: i32, %arg1: i32, %arg2: memref<512x896xbf16, #tpu.memory_space<vmem>>, %arg3: memref<896x128xbf16, #tpu.memory_space<vmem>>, %arg4: memref<1x128xf32, #tpu.memory_space<vmem>>, %arg5: memref<512x128xf32, #tpu.memory_space<vmem>>) attributes {dimension_semantics = [#tpu.dimension_semantics<parallel>, #tpu.dimension_semantics<parallel>], iteration_bounds = array<i64: 1, 1>, scalar_prefetch = 0 : i64, scratch_operands = 0 : i64, tpu.core_type = #tpu.core_type<tc>, window_params = [{transform_indices = @transform_0, window_bounds = array<i64: 512, 896>}, {pipeline_mode = #tpu.pipeline_mode<synchronous>, transform_indices = @transform_1, window_bounds = array<i64: 896, 128>}, {pipeline_mode = #tpu.pipeline_mode<synchronous>, transform_indices = @transform_2, window_bounds = array<i64: 1, 128>}, {transform_indices = @transform_3, window_bounds = array<i64: 512, 128>}]} {
    %c0 = arith.constant 0 : index
    %c0_0 = arith.constant 0 : index
    %0 = vector.load %arg2[%c0, %c0_0] : memref<512x896xbf16, #tpu.memory_space<vmem>>, vector<512x896xbf16>
    %c0_1 = arith.constant 0 : index
    %c0_2 = arith.constant 0 : index
    %1 = vector.load %arg3[%c0_1, %c0_2] : memref<896x128xbf16, #tpu.memory_space<vmem>>, vector<896x128xbf16>
    %cst = arith.constant dense<0.000000e+00> : vector<512x128xf32>
    %2 = tpu.matmul %0, %1, %cst {dimension_numbers = #tpu.dot_dimension_numbers<[1], [0], [0], [1], [0, 0, 1, 1], [], []>} : vector<512x896xbf16>, vector<896x128xbf16>, vector<512x128xf32> -> vector<512x128xf32>
    %c0_3 = arith.constant 0 : index
    %c0_4 = arith.constant 0 : index
    %3 = vector.load %arg4[%c0_3, %c0_4] : memref<1x128xf32, #tpu.memory_space<vmem>>, vector<1x128xf32>
    %4 = vector.broadcast %3 : vector<1x128xf32> to vector<512x128xf32>
    %5 = arith.addf %2, %4 : vector<512x128xf32>
    %6 = math.tanh %5 : vector<512x128xf32>
    %c0_5 = arith.constant 0 : index
    %c0_6 = arith.constant 0 : index
    %7 = vector.load %arg5[%c0_5, %c0_6] : memref<512x128xf32, #tpu.memory_space<vmem>>, vector<512x128xf32>
    tpu.vector_store %arg5[%c0_5, %c0_6], %6 {strides = array<i32>} : memref<512x128xf32, #tpu.memory_space<vmem>>, vector<512x128xf32>,
    return
  }
  func.func @transform_0(%arg0: i32, %arg1: i32) -> (i32, i32) {
    %c0_i32 = arith.constant 0 : i32
    %c0_i32_0 = arith.constant 0 : i32
    return %arg1, %c0_i32 : i32, i32
  }
  func.func @transform_1(%arg0: i32, %arg1: i32) -> (i32, i32) {
    %c0_i32 = arith.constant 0 : i32
    %c0_i32_0 = arith.constant 0 : i32
    return %c0_i32, %arg0 : i32, i32
  }
  func.func @transform_2(%arg0: i32, %arg1: i32) -> (i32, i32) {
    %c0_i32 = arith.constant 0 : i32
    %c0_i32_0 = arith.constant 0 : i32
    return %c0_i32, %arg0 : i32, i32
  }
  func.func @transform_3(%arg0: i32, %arg1: i32) -> (i32, i32) {
    %c0_i32 = arith.constant 0 : i32
    return %arg1, %arg0 : i32, i32
  }
}

</mosaic_0001>

<bundles_post_ra>
// kernel: net_forward.8
= control target key start
LH: loop header
LB: loop body
LE: loop exit
PB: predicated region body
PF: predicated region fallthrough
CT: control target
= control target key end

     0   :  { %s672_s1 = inlined_call_operand.vmem [shape: bf16[128,128], index: 1, kind: input, shape index: {}]   ;;  %s673_s0 = inlined_call_operand.vmem [shape: bf16[128,128], index: 0, kind: input, shape index: {}]   ;;  %s674_s2 = inlined_call_operand.vmem [shape: f32[1,128], index: 2, kind: input, shape index: {}]   ;;  %s675_s3 = inlined_call_operand.vmem [shape: bf16[128,128], index: 3, kind: output, shape index: {}]  }
   0x1   :  { %v539_v0 = vld [vmem:[%s672_s1] sm:$0xff]   ;;  %v540_v1 = vld [vmem:[%s672_s1 + $0x8] sm:$0xff]   ;;  %v541_v2 = vld [vmem:[%s672_s1 + $0x10] sm:$0xff]  }
   0x2   :  { %491 = vmatprep.subr.bf16.mxu0 %v539_v0  ;;  %523 = vmatprep.subr.bf16.mxu1 %v539_v0  ;;  %v542_v3 = vld [vmem:[%s672_s1 + $0x18] sm:$0xff]   ;;  %v547_v4 = vld [vmem:[%s673_s0] sm:$0xff]   ;;  %v544_v7 = vld [vmem:[%s672_s1 + $0x28] sm:$0xff]  }
   0x3   :  { %492 = vmatpush3.bf16.msra.mxu0 %v539_v0  ;;  %531 = vmatpush3.bf16.msra.mxu1 %v539_v0  ;;  %v548_v5 = vld [vmem:[%s673_s0 + $0x20] sm:$0xff]   ;;  %v545_v8 = vld [vmem:[%s672_s1 + $0x30] sm:$0xff]   ;;  %v546_v9 = vld [vmem:[%s672_s1 + $0x38] sm:$0xff]  }
   0x4   :  { %493 = vmatprep.subr.bf16.mxu0 %v540_v1  ;;  %524 = vmatprep.subr.bf16.mxu1 %v540_v1  ;;  %v543_v6 = vld [vmem:[%s672_s1 + $0x20] sm:$0xff]   ;;  %v549_v10 = vld [vmem:[%s673_s0 + $0x8] sm:$0xff]   ;;  %v551_v12 = vld [vmem:[%s673_s0 + $0x10] sm:$0xff]  }
   0x5   :  { %507 = vmatprep.mubr.bf16.mxu0 %v547_v4  ;;  %515 = vmatprep.mubr.bf16.mxu1 %v548_v5  ;;  %v550_v11 = vld [vmem:[%s673_s0 + $0x28] sm:$0xff]   ;;  %v552_v13 = vld [vmem:[%s673_s0 + $0x30] sm:$0xff]   ;;  %v553_v14 = vld [vmem:[%s673_s0 + $0x18] sm:$0xff]  }
   0x6   :  { %v554_v15 = vld [vmem:[%s673_s0 + $0x38] sm:$0xff]   ;;  %v626_v16 = vld [vmem:[%s674_s2] ss:$0 sm:$0xff] }
   0x7   :  { %494 = vmatpush3.bf16.msra.mxu0 %v540_v1  ;;  %532 = vmatpush3.bf16.msra.mxu1 %v540_v1 }
   0x8   :  { %495 = vmatprep.subr.bf16.mxu0 %v541_v2  ;;  %525 = vmatprep.subr.bf16.mxu1 %v541_v2 }
   0xb   :  { %496 = vmatpush3.bf16.msra.mxu0 %v541_v2  ;;  %533 = vmatpush3.bf16.msra.mxu1 %v541_v2 }
   0xc   :  { %497 = vmatprep.subr.bf16.mxu0 %v542_v3  ;;  %526 = vmatprep.subr.bf16.mxu1 %v542_v3 }
   0xf   :  { %498 = vmatpush3.bf16.msra.mxu0 %v542_v3  ;;  %534 = vmatpush3.bf16.msra.mxu1 %v542_v3 }
  0x10   :  { %499 = vmatprep.subr.bf16.mxu0 %v543_v6  ;;  %527 = vmatprep.subr.bf16.mxu1 %v543_v6 }
  0x13   :  { %500 = vmatpush3.bf16.msra.mxu0 %v543_v6  ;;  %535 = vmatpush3.bf16.msra.mxu1 %v543_v6 }
  0x14   :  { %501 = vmatprep.subr.bf16.mxu0 %v544_v7  ;;  %528 = vmatprep.subr.bf16.mxu1 %v544_v7 }
  0x17   :  { %502 = vmatpush3.bf16.msra.mxu0 %v544_v7  ;;  %536 = vmatpush3.bf16.msra.mxu1 %v544_v7 }
  0x18   :  { %503 = vmatprep.subr.bf16.mxu0 %v545_v8  ;;  %529 = vmatprep.subr.bf16.mxu1 %v545_v8 }
  0x1b   :  { %504 = vmatpush3.bf16.msra.mxu0 %v545_v8  ;;  %537 = vmatpush3.bf16.msra.mxu1 %v545_v8 }
  0x1c   :  { %505 = vmatprep.subr.bf16.mxu0 %v546_v9  ;;  %530 = vmatprep.subr.bf16.mxu1 %v546_v9 }
  0x1f   :  { %506 = vmatpush3.bf16.msra.mxu0 %v546_v9  ;;  %538 = vmatpush3.bf16.msra.mxu1 %v546_v9 }
  0x22   :  { %508 = vmatmul.mubr.bf16.vlgmr.msra.gmra.mrb[0].mxu0 %v549_v10  ;;  %516 = vmatmul.mubr.bf16.vlgmr.msra.gmra.mrb[0].mxu1 %v550_v11 }
  0x23   :  { %511 = vmatprep.mubr.bf16.mxu0 %v551_v12  ;;  %519 = vmatprep.mubr.bf16.mxu1 %v552_v13 }
  0x2a   :  { %512 = vmatmul.mubr.bf16.gmra.mrb[4].mxu0 %v553_v14  ;;  %520 = vmatmul.mubr.bf16.gmra.mrb[4].mxu1 %v554_v15 }
  0xf5   :  { %v509_v17 = vpop.f32.mrb[0].mxu0  ;;  %v517_v18 = vpop.f32.mrb[0].mxu1 }
  0xf6   :  { %v193_v19 = vadd.f32 %v509_v17, %v626_v16  ;;  %v225_v20 = vadd.f32 %v517_v18, %v626_v16  ;;  %v184_v21 = vpop.f32.mrb[1].mxu0  ;;  %v216_v22 = vpop.f32.mrb[1].mxu1 }
  0xf7   :  { %v185_v23 = vadd.f32 %v626_v16, %v184_v21  ;;  %v217_v24 = vadd.f32 %v626_v16, %v216_v22  ;;  %v510_v25 = vpop.f32.mrb[2].mxu0  ;;  %v518_v26 = vpop.f32.mrb[2].mxu1 }
  0xf8   :  { %vm249_vm0 = vcmp.ge.f32.partialorder %v193_v19, 0.0  ;;  %v265_v27 = vmul.f32 0.2, %v193_v19  ;;  %vm257_vm1 = vcmp.ge.f32.partialorder %v225_v20, 0.0  ;;  %v273_v28 = vmul.f32 0.2, %v225_v20 }
  0xf9   :  { %vm247_vm2 = vcmp.ge.f32.partialorder %v185_v23, 0.0  ;;  %v263_v29 = vmul.f32 0.2, %v185_v23  ;;  %vm255_vm3 = vcmp.ge.f32.partialorder %v217_v24, 0.0  ;;  %v271_v30 = vmul.f32 0.2, %v217_v24 }
  0xfa   :  { %v196_v31 = vadd.f32 %v510_v25, %v626_v16  ;;  %v228_v32 = vadd.f32 %v518_v26, %v626_v16  ;;  %v187_v33 = vpop.f32.mrb[3].mxu0  ;;  %v219_v34 = vpop.f32.mrb[3].mxu1  ;;  %v281_v35 = vsel %vm249_vm0, %v193_v19, %v265_v27  ;;  %v289_v36 = vsel %vm257_vm1, %v225_v20, %v273_v28 }
  0xfb   :  { %v188_v37 = vadd.f32 %v626_v16, %v187_v33  ;;  %v220_v38 = vadd.f32 %v626_v16, %v219_v34  ;;  %v279_v43 = vsel %vm247_vm2, %v185_v23, %v263_v29  ;;  %v287_v44 = vsel %vm255_vm3, %v217_v24, %v271_v30 }
  0xfc   :  { %vm250_vm4 = vcmp.ge.f32.partialorder %v196_v31, 0.0  ;;  %v266_v39 = vmul.f32 0.2, %v196_v31  ;;  %vm258_vm5 = vcmp.ge.f32.partialorder %v228_v32, 0.0  ;;  %v274_v40 = vmul.f32 0.2, %v228_v32 }
  0xfd   :  { %vm248_vm6 = vcmp.ge.f32.partialorder %v188_v37, 0.0  ;;  %v264_v41 = vmul.f32 0.2, %v188_v37  ;;  %vm256_vm7 = vcmp.ge.f32.partialorder %v220_v38, 0.0  ;;  %v272_v42 = vmul.f32 0.2, %v220_v38 }
  0xfe   :  { %v282_v45 = vsel %vm250_vm4, %v196_v31, %v266_v39  ;;  %v290_v46 = vsel %vm258_vm5, %v228_v32, %v274_v40  ;;  %v513_v47 = vpop.f32.mrb[4].mxu0  ;;  %v521_v48 = vpop.f32.mrb[4].mxu1 }
  0xff   :  { %v436_v49 = vpack.c.bf16 %v282_v45, %v281_v35  ;;  %v456_v50 = vpack.c.bf16 %v290_v46, %v289_v36  ;;  %v280_v51 = vsel %vm248_vm6, %v188_v37, %v264_v41  ;;  %v288_v52 = vsel %vm256_vm7, %v220_v38, %v272_v42  ;;  %v200_v53 = vpop.f32.mrb[5].mxu0  ;;  %v232_v54 = vpop.f32.mrb[5].mxu1 }
 0x100   :  { %v431_v55 = vpack.c.bf16 %v280_v51, %v279_v43  ;;  %v451_v56 = vpack.c.bf16 %v288_v52, %v287_v44  ;;  %v209_v57 = vadd.f32 %v513_v47, %v626_v16  ;;  %v241_v58 = vadd.f32 %v521_v48, %v626_v16  ;;  %v514_v59 = vpop.f32.mrb[6].mxu0  ;;  %v522_v60 = vpop.f32.mrb[6].mxu1 }
 0x101   :  { %468 = vst [vmem:[%s675_s3 + $0x8] sm:$0xff] %v436_v49   ;;  %472 = vst [vmem:[%s675_s3 + $0x28] sm:$0xff] %v456_v50   ;;  %v201_v61 = vadd.f32 %v626_v16, %v200_v53  ;;  %v233_v62 = vadd.f32 %v626_v16, %v232_v54  ;;  %v212_v63 = vadd.f32 %v514_v59, %v626_v16  ;;  %v203_v1 = vpop.f32.mrb[7].mxu0  ;;  %v235_v2 = vpop.f32.mrb[7].mxu1 }
 0x102   :  { %v244_v0 = vadd.f32 %v522_v60, %v626_v16  ;;  %432 = vst [vmem:[%s675_s3] sm:$0xff] %v431_v55   ;;  %471 = vst [vmem:[%s675_s3 + $0x20] sm:$0xff] %v451_v56   ;;  %v269_v3 = vmul.f32 0.2, %v209_v57  ;;  %vm253_vm8 = vcmp.ge.f32.partialorder %v209_v57, 0.0  ;;  %v277_v4 = vmul.f32 0.2, %v241_v58 }
 0x103   :  { %vm261_vm9 = vcmp.ge.f32.partialorder %v241_v58, 0.0  ;;  %vm251_vm10 = vcmp.ge.f32.partialorder %v201_v61, 0.0  ;;  %vm254_vm11 = vcmp.ge.f32.partialorder %v212_v63, 0.0  ;;  %v270_v5 = vmul.f32 0.2, %v212_v63 }
 0x104   :  { %v267_v6 = vmul.f32 0.2, %v201_v61  ;;  %vm259_vm12 = vcmp.ge.f32.partialorder %v233_v62, 0.0  ;;  %vm262_vm13 = vcmp.ge.f32.partialorder %v244_v0, 0.0  ;;  %v278_v7 = vmul.f32 0.2, %v244_v0 }
 0x105   :  { %v285_v8 = vsel %vm253_vm8, %v209_v57, %v269_v3  ;;  %v286_v9 = vsel %vm254_vm11, %v212_v63, %v270_v5  ;;  %v204_v10 = vadd.f32 %v626_v16, %v203_v1  ;;  %v236_v11 = vadd.f32 %v626_v16, %v235_v2 }
 0x106   :  { %v293_v12 = vsel %vm261_vm9, %v241_v58, %v277_v4  ;;  %v275_v13 = vmul.f32 0.2, %v233_v62  ;;  %v446_v14 = vpack.c.bf16 %v286_v9, %v285_v8  ;;  %v294_v15 = vsel %vm262_vm13, %v244_v0, %v278_v7 }
 0x107   :  { %v466_v17 = vpack.c.bf16 %v294_v15, %v293_v12  ;;  %vm252_vm14 = vcmp.ge.f32.partialorder %v204_v10, 0.0  ;;  %v268_v18 = vmul.f32 0.2, %v204_v10  ;;  %vm260_vm15 = vcmp.ge.f32.partialorder %v236_v11, 0.0 }
 0x108   :  { %470 = vst [vmem:[%s675_s3 + $0x18] sm:$0xff] %v446_v14   ;;  %v276_v19 = vmul.f32 0.2, %v236_v11  ;;  %v283_v20 = vsel %vm251_vm10, %v201_v61, %v267_v6  ;;  %v291_v21 = vsel %vm259_vm12, %v233_v62, %v275_v13 }
 0x109   :  { %474 = vst [vmem:[%s675_s3 + $0x38] sm:$0xff] %v466_v17   ;;  %v284_v16 = vsel %vm252_vm14, %v204_v10, %v268_v18 }
 0x10a   :  { %v441_v22 = vpack.c.bf16 %v284_v16, %v283_v20  ;;  %v292_v23 = vsel %vm260_vm15, %v236_v11, %v276_v19 }
 0x10b   :  { %v461_v24 = vpack.c.bf16 %v292_v23, %v291_v21 }
 0x10c   :  { %469 = vst [vmem:[%s675_s3 + $0x10] sm:$0xff] %v441_v22  }
 0x10d   :  { %473 = vst [vmem:[%s675_s3 + $0x30] sm:$0xff] %v461_v24  }

// kernel: net_forward.9
= control target key start
LH: loop header
LB: loop body
LE: loop exit
PB: predicated region body
PF: predicated region fallthrough
CT: control target
= control target key end

     0   :  { %v654_v40 = vmov 0.0   ;;  %s832_s1 = inlined_call_operand.vmem [shape: bf16[512,128], index: 1, kind: input, shape index: {}]   ;;  %s833_s0 = inlined_call_operand.vmem [shape: bf16[32,512], index: 0, kind: input, shape index: {}]   ;;  %s834_s4 = inlined_call_operand.vmem [shape: f32[1,128], index: 4, kind: output, shape index: {1}]   ;;  %s835_s5 = inlined_call_operand.vmem [shape: f32[1,128], index: 5, kind: output, shape index: {2}]   ;;  %s836_s2 = inlined_call_operand.vmem [shape: f32[1,128], index: 2, kind: input, shape index: {}]   ;;  %s837_s3 = inlined_call_operand.vmem [shape: bf16[32,128], index: 3, kind: output, shape index: {0}]  }
   0x1   :  { %v610_v0 = vld [vmem:[%s832_s1 + $0x40] sm:$0xff]   ;;  %v614_v4 = vld [vmem:[%s832_s1 + $0x48] sm:$0xff]   ;;  %v618_v8 = vld [vmem:[%s832_s1 + $0x50] sm:$0xff]   ;;  %451 = vst [vmem:[%s834_s4] sm:$0x1] %v654_v40 }
   0x2   :  { %v611_v1 = vld [vmem:[%s832_s1 + $0xc0] sm:$0xff]   ;;  %553 = vmatprep.subr.bf16.mxu0 %v610_v0  ;;  %v615_v5 = vld [vmem:[%s832_s1 + $0xc8] sm:$0xff]   ;;  %v619_v9 = vld [vmem:[%s832_s1 + $0xd0] sm:$0xff]   ;;  %452 = vst [vmem:[%s835_s5] sm:$0x1] %v654_v40 }
   0x3   :  { %v612_v2 = vld [vmem:[%s832_s1] sm:$0xff]   ;;  %581 = vmatprep.subr.bf16.mxu1 %v611_v1  ;;  %v616_v6 = vld [vmem:[%s832_s1 + $0x8] sm:$0xff]   ;;  %v620_v10 = vld [vmem:[%s832_s1 + $0x10] sm:$0xff]  }
   0x4   :  { %v613_v3 = vld [vmem:[%s832_s1 + $0x80] sm:$0xff]   ;;  %554 = vmatpush3.bf16.msra.mxu0 %v612_v2  ;;  %v617_v7 = vld [vmem:[%s832_s1 + $0x88] sm:$0xff]   ;;  %v621_v11 = vld [vmem:[%s832_s1 + $0x90] sm:$0xff]  }
   0x5   :  { %582 = vmatpush3.bf16.msra.mxu1 %v613_v3  ;;  %555 = vmatprep.subr.bf16.mxu0 %v614_v4  ;;  %v622_v12 = vld [vmem:[%s832_s1 + $0x58] sm:$0xff]   ;;  %v626_v16 = vld [vmem:[%s832_s1 + $0x60] sm:$0xff]   ;;  %v630_v20 = vld [vmem:[%s832_s1 + $0x68] sm:$0xff]  }
   0x6   :  { %583 = vmatprep.subr.bf16.mxu1 %v615_v5  ;;  %v623_v13 = vld [vmem:[%s832_s1 + $0xd8] sm:$0xff]   ;;  %v627_v17 = vld [vmem:[%s832_s1 + $0xe0] sm:$0xff]   ;;  %v631_v21 = vld [vmem:[%s832_s1 + $0xe8] sm:$0xff]  }
   0x7   :  { %v624_v14 = vld [vmem:[%s832_s1 + $0x18] sm:$0xff]   ;;  %v628_v18 = vld [vmem:[%s832_s1 + $0x20] sm:$0xff]   ;;  %v632_v22 = vld [vmem:[%s832_s1 + $0x28] sm:$0xff]  }
   0x8   :  { %556 = vmatpush3.bf16.msra.mxu0 %v616_v6  ;;  %v625_v15 = vld [vmem:[%s832_s1 + $0x98] sm:$0xff]   ;;  %v629_v19 = vld [vmem:[%s832_s1 + $0xa0] sm:$0xff]   ;;  %v633_v23 = vld [vmem:[%s832_s1 + $0xa8] sm:$0xff]  }
   0x9   :  { %584 = vmatpush3.bf16.msra.mxu1 %v617_v7  ;;  %557 = vmatprep.subr.bf16.mxu0 %v618_v8  ;;  %v634_v24 = vld [vmem:[%s832_s1 + $0x70] sm:$0xff]   ;;  %v638_v28 = vld [vmem:[%s832_s1 + $0x78] sm:$0xff]   ;;  %v493_v43 = vld [vmem:[%s836_s2] ss:$0 sm:$0xff] }
   0xa   :  { %585 = vmatprep.subr.bf16.mxu1 %v619_v9  ;;  %v635_v25 = vld [vmem:[%s832_s1 + $0xf0] sm:$0xff]   ;;  %v639_v29 = vld [vmem:[%s832_s1 + $0xf8] sm:$0xff]  }
   0xb   :  { %v636_v26 = vld [vmem:[%s832_s1 + $0x30] sm:$0xff]   ;;  %v640_v30 = vld [vmem:[%s832_s1 + $0x38] sm:$0xff]  }
   0xc   :  { %558 = vmatpush3.bf16.msra.mxu0 %v620_v10  ;;  %v637_v27 = vld [vmem:[%s832_s1 + $0xb0] sm:$0xff]   ;;  %v641_v31 = vld [vmem:[%s832_s1 + $0xb8] sm:$0xff]  }
   0xd   :  { %586 = vmatpush3.bf16.msra.mxu1 %v621_v11  ;;  %559 = vmatprep.subr.bf16.mxu0 %v622_v12  ;;  %v642_v32 = vld [vmem:[%s833_s0] ss:$16 sps:$4 sm:$0xff]   ;;  %v644_v33 = vld [vmem:[%s833_s0 + $0x4] ss:$16 sps:$4 sm:$0xff]   ;;  %v645_v34 = vld [vmem:[%s833_s0 + $0x8] ss:$16 sps:$4 sm:$0xff]  }
   0xe   :  { %587 = vmatprep.subr.bf16.mxu1 %v623_v13  ;;  %v647_v35 = vld [vmem:[%s833_s0 + $0xc] ss:$16 sps:$4 sm:$0xff]   ;;  %361 = vmatprep.mubr.bf16.mxu0 %v644_v33  ;;  %v648_v36 = vld [vmem:[%s833_s0 + $0x24] ss:$16 sps:$4 sm:$0xff]   ;;  %v652_v38 = vld [vmem:[%s833_s0 + $0x20] ss:$16 sps:$4 sm:$0xff]  }
   0xf   :  { %410 = vmatprep.mubr.bf16.mxu1 %v647_v35  ;;  %v650_v37 = vld [vmem:[%s833_s0 + $0x2c] ss:$16 sps:$4 sm:$0xff]   ;;  %v653_v39 = vld [vmem:[%s833_s0 + $0x28] ss:$16 sps:$4 sm:$0xff]  }
  0x10   :  { %560 = vmatpush3.bf16.msra.mxu0 %v624_v14 }
  0x11   :  { %588 = vmatpush3.bf16.msra.mxu1 %v625_v15  ;;  %561 = vmatprep.subr.bf16.mxu0 %v626_v16 }
  0x12   :  { %589 = vmatprep.subr.bf16.mxu1 %v627_v17 }
  0x14   :  { %562 = vmatpush3.bf16.msra.mxu0 %v628_v18 }
  0x15   :  { %590 = vmatpush3.bf16.msra.mxu1 %v629_v19  ;;  %563 = vmatprep.subr.bf16.mxu0 %v630_v20 }
  0x16   :  { %591 = vmatprep.subr.bf16.mxu1 %v631_v21 }
  0x18   :  { %564 = vmatpush3.bf16.msra.mxu0 %v632_v22 }
  0x19   :  { %592 = vmatpush3.bf16.msra.mxu1 %v633_v23  ;;  %565 = vmatprep.subr.bf16.mxu0 %v634_v24 }
  0x1a   :  { %593 = vmatprep.subr.bf16.mxu1 %v635_v25 }
  0x1c   :  { %566 = vmatpush3.bf16.msra.mxu0 %v636_v26 }
  0x1d   :  { %594 = vmatpush3.bf16.msra.mxu1 %v637_v27  ;;  %567 = vmatprep.subr.bf16.mxu0 %v638_v28 }
  0x1e   :  { %595 = vmatprep.subr.bf16.mxu1 %v639_v29 }
  0x20   :  { %568 = vmatpush3.bf16.msra.mxu0 %v640_v30 }
  0x21   :  { %596 = vmatpush3.bf16.msra.mxu1 %v641_v31  ;;  %v453_v31 = vld [vmem:[%s834_s4] sm:$0x1] }
  0x23   :  { %362 = vmatmul.mubr.bf16.vlgmr.msra.gmra.mrb[0].mxu0 %v642_v32 }
  0x24   :  { %411 = vmatmul.mubr.bf16.vlgmr.msra.gmra.mrb[0].mxu1 %v645_v34  ;;  %369 = vmatprep.mubr.bf16.mxu0 %v648_v36  ;;  %v465_v34 = vld [vmem:[%s835_s5] sm:$0x1] }
  0x25   :  { %418 = vmatprep.mubr.bf16.mxu1 %v650_v37 }
  0x2b   :  { %370 = vmatmul.mubr.bf16.gmra.mrb[4].mxu0 %v652_v38 }
  0x2c   :  { %419 = vmatmul.mubr.bf16.gmra.mrb[4].mxu1 %v653_v39 }
  0xf6   :  { %v569_v41 = vpop.f32.mrb[0].mxu0 }
  0xf7   :  { %v597_v42 = vpop.f32.mrb[0].mxu1  ;;  %v570_v44 = vpop.f32.mrb[1].mxu0 }
  0xf8   :  { %v571_v45 = vadd.f32 %v570_v44, %v569_v41  ;;  %v598_v46 = vpop.f32.mrb[1].mxu1  ;;  %v572_v47 = vpop.f32.mrb[2].mxu0 }
  0xf9   :  { %v599_v48 = vadd.f32 %v598_v46, %v597_v42  ;;  %v600_v49 = vpop.f32.mrb[2].mxu1  ;;  %v573_v50 = vpop.f32.mrb[3].mxu0 }
  0xfa   :  { %v364_v51 = vadd.f32 %v571_v45, %v493_v43  ;;  %v574_v52 = vadd.f32 %v573_v50, %v572_v47  ;;  %v601_v53 = vpop.f32.mrb[3].mxu1 }
  0xfb   :  { %v602_v54 = vadd.f32 %v601_v53, %v600_v49 }
  0xfc   :  { %v413_v55 = vadd.f32 %v599_v48, %v364_v51  ;;  %v367_v56 = vadd.f32 %v574_v52, %v493_v43 }
  0xfe   :  { %v416_v57 = vadd.f32 %v602_v54, %v367_v56  ;;  %v575_v58 = vpop.f32.mrb[4].mxu0  ;;  %v466_v59 = vmul.f32 %v413_v55, %v413_v55 }
  0xff   :  { %v603_v60 = vpop.f32.mrb[4].mxu1  ;;  %v576_v61 = vpop.f32.mrb[5].mxu0 }
 0x100   :  { %v545_v62 = vpack.c.bf16 %v416_v57, %v413_v55  ;;  %v454_v63 = vadd.f32 %v416_v57, %v413_v55  ;;  %v467_v0 = vmul.f32 %v416_v57, %v416_v57  ;;  %v577_v1 = vadd.f32 %v576_v61, %v575_v58  ;;  %v604_v2 = vpop.f32.mrb[5].mxu1  ;;  %v578_v3 = vpop.f32.mrb[6].mxu0 }
 0x101   :  { %v605_v4 = vadd.f32 %v604_v2, %v603_v60  ;;  %v606_v5 = vpop.f32.mrb[6].mxu1  ;;  %v579_v6 = vpop.f32.mrb[7].mxu0 }
 0x102   :  { %546 = vst [vmem:[%s837_s3] sm:$0xff] %v545_v62   ;;  %v470_v7 = vadd.f32 %v467_v0, %v466_v59  ;;  %v372_v8 = vadd.f32 %v577_v1, %v493_v43  ;;  %v580_v9 = vadd.f32 %v579_v6, %v578_v3  ;;  %v607_v10 = vpop.f32.mrb[7].mxu1 }
 0x103   :  { %v608_v11 = vadd.f32 %v607_v10, %v606_v5 }
 0x104   :  { %v421_v12 = vadd.f32 %v605_v4, %v372_v8  ;;  %v375_v13 = vadd.f32 %v580_v9, %v493_v43 }
 0x106   :  { %v455_v14 = vadd.f32 %v454_v63, %v421_v12  ;;  %v468_v15 = vmul.f32 %v421_v12, %v421_v12  ;;  %v424_v16 = vadd.f32 %v608_v11, %v375_v13 }
 0x108   :  { %v471_v17 = vadd.f32 %v470_v7, %v468_v15  ;;  %v550_v18 = vpack.c.bf16 %v424_v16, %v421_v12  ;;  %v456_v19 = vadd.f32 %v455_v14, %v424_v16  ;;  %v469_v20 = vmul.f32 %v424_v16, %v424_v16 }
 0x10a   :  { %552 = vst [vmem:[%s837_s3 + $0x8] sm:$0xff] %v550_v18   ;;  %v457_v21 = vrot.slane %v456_v19, 4  ;;  %v472_v22 = vadd.f32 %v471_v17, %v469_v20 }
 0x10c   :  { %v458_v23 = vadd.f32 %v457_v21, %v456_v19  ;;  %v473_v24 = vrot.slane %v472_v22, 4 }
 0x10e   :  { %v459_v25 = vrot.slane %v458_v23, 2  ;;  %v474_v26 = vadd.f32 %v473_v24, %v472_v22 }
 0x110   :  { %v460_v27 = vadd.f32 %v459_v25, %v458_v23  ;;  %v475_v28 = vrot.slane %v474_v26, 2 }
 0x112   :  { %v461_v29 = vrot.slane %v460_v27, 1  ;;  %v476_v30 = vadd.f32 %v475_v28, %v474_v26 }
 0x114   :  { %v462_v32 = vadd.f32 %v461_v29, %v460_v27  ;;  %v477_v33 = vrot.slane %v476_v30, 1 }
 0x116   :  { %v463_v35 = vadd.f32 %v462_v32, %v453_v31  ;;  %v478_v36 = vadd.f32 %v477_v33, %v476_v30 }
 0x118   :  { %464 = vst [vmem:[%s834_s4] sm:$0x1] %v463_v35  ;;  %v479_v37 = vadd.f32 %v478_v36, %v465_v34 }
 0x11a   :  { %480 = vst [vmem:[%s835_s5] sm:$0x1] %v479_v37 }

// kernel: net_forward.10
= control target key start
LH: loop header
LB: loop body
LE: loop exit
PB: predicated region body
PF: predicated region fallthrough
CT: control target
= control target key end

     0   :  { %s1372_s1 = inlined_call_operand.vmem [shape: bf16[896,128], index: 1, kind: input, shape index: {}]   ;;  %s1373_s0 = inlined_call_operand.vmem [shape: bf16[32,896], index: 0, kind: input, shape index: {}]   ;;  %s1374_s4 = inlined_call_operand.vmem [shape: f32[1,128], index: 4, kind: output, shape index: {1}]   ;;  %s1375_s5 = inlined_call_operand.vmem [shape: f32[1,128], index: 5, kind: output, shape index: {2}]   ;;  %s1376_s2 = inlined_call_operand.vmem [shape: f32[1,128], index: 2, kind: input, shape index: {}]   ;;  %s1377_s3 = inlined_call_operand.vmem [shape: bf16[32,128], index: 3, kind: output, shape index: {0}]  }
   0x1   :  { %v1028_v0 = vld [vmem:[%s1372_s1 + $0x40] sm:$0xff]   ;;  %v1032_v4 = vld [vmem:[%s1372_s1 + $0x48] sm:$0xff]   ;;  %v1036_v8 = vld [vmem:[%s1372_s1 + $0x50] sm:$0xff]  }
   0x2   :  { %v1029_v1 = vld [vmem:[%s1372_s1] sm:$0xff]   ;;  %913 = vmatprep.subr.bf16.mxu0 %v1028_v0  ;;  %v1033_v5 = vld [vmem:[%s1372_s1 + $0x8] sm:$0xff]   ;;  %v1037_v9 = vld [vmem:[%s1372_s1 + $0x10] sm:$0xff]  }
   0x3   :  { %v1030_v2 = vld [vmem:[%s1372_s1 + $0xc0] sm:$0xff]   ;;  %914 = vmatpush3.bf16.msra.mxu0 %v1029_v1  ;;  %v1034_v6 = vld [vmem:[%s1372_s1 + $0xc8] sm:$0xff]   ;;  %v1038_v10 = vld [vmem:[%s1372_s1 + $0xd0] sm:$0xff]  }
   0x4   :  { %v1031_v3 = vld [vmem:[%s1372_s1 + $0x80] sm:$0xff]   ;;  %941 = vmatprep.subr.bf16.mxu1 %v1030_v2  ;;  %915 = vmatprep.subr.bf16.mxu0 %v1032_v4  ;;  %v1035_v7 = vld [vmem:[%s1372_s1 + $0x88] sm:$0xff]   ;;  %v1039_v11 = vld [vmem:[%s1372_s1 + $0x90] sm:$0xff]  }
   0x5   :  { %942 = vmatpush3.bf16.msra.mxu1 %v1031_v3  ;;  %v1040_v12 = vld [vmem:[%s1372_s1 + $0x58] sm:$0xff]   ;;  %v1044_v16 = vld [vmem:[%s1372_s1 + $0x60] sm:$0xff]   ;;  %v1048_v20 = vld [vmem:[%s1372_s1 + $0x68] sm:$0xff]  }
   0x6   :  { %943 = vmatprep.subr.bf16.mxu1 %v1034_v6  ;;  %v1041_v13 = vld [vmem:[%s1372_s1 + $0x18] sm:$0xff]   ;;  %v1045_v17 = vld [vmem:[%s1372_s1 + $0x20] sm:$0xff]   ;;  %v1049_v21 = vld [vmem:[%s1372_s1 + $0x28] sm:$0xff]   ;;  %v1104_v6 = vmov 0.0  }
   0x7   :  { %916 = vmatpush3.bf16.msra.mxu0 %v1033_v5  ;;  %v1042_v14 = vld [vmem:[%s1372_s1 + $0xd8] sm:$0xff]   ;;  %v1046_v18 = vld [vmem:[%s1372_s1 + $0xe0] sm:$0xff]   ;;  %v1050_v22 = vld [vmem:[%s1372_s1 + $0xe8] sm:$0xff]   ;;  %781 = vst [vmem:[%s1374_s4] sm:$0x1] %v1104_v6 }
   0x8   :  { %917 = vmatprep.subr.bf16.mxu0 %v1036_v8  ;;  %v1043_v15 = vld [vmem:[%s1372_s1 + $0x98] sm:$0xff]   ;;  %v1047_v19 = vld [vmem:[%s1372_s1 + $0xa0] sm:$0xff]   ;;  %v1051_v23 = vld [vmem:[%s1372_s1 + $0xa8] sm:$0xff]   ;;  %782 = vst [vmem:[%s1375_s5] sm:$0x1] %v1104_v6 }
   0x9   :  { %944 = vmatpush3.bf16.msra.mxu1 %v1035_v7  ;;  %v1052_v24 = vld [vmem:[%s1372_s1 + $0x70] sm:$0xff]   ;;  %v1056_v28 = vld [vmem:[%s1372_s1 + $0x78] sm:$0xff]   ;;  %v1061_v32 = vld [vmem:[%s1373_s0 + $0x4] ss:$28 sps:$4 sm:$0xff]  }
   0xa   :  { %945 = vmatprep.subr.bf16.mxu1 %v1038_v10  ;;  %v1053_v25 = vld [vmem:[%s1372_s1 + $0x30] sm:$0xff]   ;;  %v1057_v29 = vld [vmem:[%s1372_s1 + $0x38] sm:$0xff]   ;;  %593 = vmatprep.mubr.bf16.mxu0 %v1061_v32  ;;  %v1063_v34 = vld [vmem:[%s1372_s1 + $0x140] sm:$0xff]  }
   0xb   :  { %918 = vmatpush3.bf16.msra.mxu0 %v1037_v9  ;;  %v1054_v26 = vld [vmem:[%s1372_s1 + $0xf0] sm:$0xff]   ;;  %v1058_v30 = vld [vmem:[%s1372_s1 + $0xf8] sm:$0xff]   ;;  %v1064_v35 = vld [vmem:[%s1373_s0 + $0x8] ss:$28 sps:$4 sm:$0xff]  }
   0xc   :  { %919 = vmatprep.subr.bf16.mxu0 %v1040_v12  ;;  %v1055_v27 = vld [vmem:[%s1372_s1 + $0xb0] sm:$0xff]   ;;  %v1059_v31 = vld [vmem:[%s1373_s0] ss:$28 sps:$4 sm:$0xff]   ;;  %v1066_v36 = vld [vmem:[%s1373_s0 + $0xc] ss:$28 sps:$4 sm:$0xff]  }
   0xd   :  { %946 = vmatpush3.bf16.msra.mxu1 %v1039_v11  ;;  %v1062_v33 = vld [vmem:[%s1372_s1 + $0xb8] sm:$0xff]   ;;  %v1067_v37 = vld [vmem:[%s1372_s1 + $0x100] sm:$0xff]   ;;  %642 = vmatprep.mubr.bf16.mxu1 %v1066_v36  ;;  %v1068_v38 = vld [vmem:[%s1372_s1 + $0x148] sm:$0xff]  }
   0xe   :  { %947 = vmatprep.subr.bf16.mxu1 %v1042_v14  ;;  %v1069_v39 = vld [vmem:[%s1372_s1 + $0x180] sm:$0xff]   ;;  %v1070_v40 = vld [vmem:[%s1372_s1 + $0x108] sm:$0xff]   ;;  %v1071_v41 = vld [vmem:[%s1372_s1 + $0x150] sm:$0xff]  }
   0xf   :  { %920 = vmatpush3.bf16.msra.mxu0 %v1041_v13  ;;  %v1072_v42 = vld [vmem:[%s1372_s1 + $0x188] sm:$0xff]   ;;  %v1073_v43 = vld [vmem:[%s1372_s1 + $0x110] sm:$0xff]   ;;  %v1074_v44 = vld [vmem:[%s1372_s1 + $0x158] sm:$0xff]  }
  0x10   :  { %921 = vmatprep.subr.bf16.mxu0 %v1044_v16  ;;  %v1075_v45 = vld [vmem:[%s1372_s1 + $0x190] sm:$0xff]   ;;  %v1076_v46 = vld [vmem:[%s1372_s1 + $0x118] sm:$0xff]   ;;  %v1077_v47 = vld [vmem:[%s1372_s1 + $0x160] sm:$0xff]  }
  0x11   :  { %948 = vmatpush3.bf16.msra.mxu1 %v1043_v15  ;;  %v1078_v48 = vld [vmem:[%s1372_s1 + $0x198] sm:$0xff]   ;;  %v1079_v49 = vld [vmem:[%s1372_s1 + $0x120] sm:$0xff]   ;;  %v1082_v51 = vld [vmem:[%s1372_s1 + $0x168] sm:$0xff]  }
  0x12   :  { %949 = vmatprep.subr.bf16.mxu1 %v1046_v18  ;;  %v1080_v50 = vld [vmem:[%s1373_s0 + $0x3c] ss:$28 sps:$4 sm:$0xff]   ;;  %v1083_v52 = vld [vmem:[%s1372_s1 + $0x1a0] sm:$0xff]   ;;  %v1085_v54 = vld [vmem:[%s1372_s1 + $0x128] sm:$0xff]  }
  0x13   :  { %922 = vmatpush3.bf16.msra.mxu0 %v1045_v17  ;;  %v1084_v53 = vld [vmem:[%s1373_s0 + $0x38] ss:$28 sps:$4 sm:$0xff]   ;;  %v1086_v55 = vld [vmem:[%s1373_s0 + $0x44] ss:$28 sps:$4 sm:$0xff]   ;;  %v1090_v58 = vld [vmem:[%s1372_s1 + $0x1a8] sm:$0xff]  }
  0x14   :  { %923 = vmatprep.subr.bf16.mxu0 %v1048_v20  ;;  %v1088_v56 = vld [vmem:[%s1373_s0 + $0x40] ss:$28 sps:$4 sm:$0xff]   ;;  %v1089_v57 = vld [vmem:[%s1372_s1 + $0x170] sm:$0xff]   ;;  %v1101_v3 = vld [vmem:[%s1373_s0 + $0x4c] ss:$28 sps:$4 sm:$0xff]  }
  0x15   :  { %950 = vmatpush3.bf16.msra.mxu1 %v1047_v19  ;;  %v1091_v59 = vld [vmem:[%s1372_s1 + $0x130] sm:$0xff]   ;;  %v1092_v60 = vld [vmem:[%s1372_s1 + $0x178] sm:$0xff]   ;;  %v1103_v5 = vld [vmem:[%s1373_s0 + $0x48] ss:$28 sps:$4 sm:$0xff]  }
  0x16   :  { %951 = vmatprep.subr.bf16.mxu1 %v1050_v22  ;;  %v1093_v61 = vld [vmem:[%s1372_s1 + $0x1b0] sm:$0xff]   ;;  %v1094_v62 = vld [vmem:[%s1372_s1 + $0x138] sm:$0xff]   ;;  %v823_v8 = vld [vmem:[%s1376_s2] ss:$0 sm:$0xff] }
  0x17   :  { %924 = vmatpush3.bf16.msra.mxu0 %v1049_v21  ;;  %v1097_v63 = vld [vmem:[%s1373_s0 + $0x14] ss:$28 sps:$4 sm:$0xff]   ;;  %v1098_v0 = vld [vmem:[%s1372_s1 + $0x1b8] sm:$0xff]  }
  0x18   :  { %925 = vmatprep.subr.bf16.mxu0 %v1052_v24  ;;  %v1099_v1 = vld [vmem:[%s1373_s0 + $0x18] ss:$28 sps:$4 sm:$0xff]   ;;  %v1095_v2 = vld [vmem:[%s1373_s0 + $0x10] ss:$28 sps:$4 sm:$0xff]  }
  0x19   :  { %952 = vmatpush3.bf16.msra.mxu1 %v1051_v23  ;;  %v1100_v4 = vld [vmem:[%s1373_s0 + $0x50] ss:$28 sps:$4 sm:$0xff]  }
  0x1a   :  { %953 = vmatprep.subr.bf16.mxu1 %v1054_v26 }
  0x1b   :  { %926 = vmatpush3.bf16.msra.mxu0 %v1053_v25 }
  0x1c   :  { %927 = vmatprep.subr.bf16.mxu0 %v1056_v28 }
  0x1d   :  { %954 = vmatpush3.bf16.msra.mxu1 %v1055_v27 }
  0x1e   :  { %955 = vmatprep.subr.bf16.mxu1 %v1058_v30 }
  0x1f   :  { %928 = vmatpush3.bf16.msra.mxu0 %v1057_v29 }
  0x20   :  { %969 = vmatprep.subr.bf16.mxu0 %v1063_v34 }
  0x21   :  { %956 = vmatpush3.bf16.msra.mxu1 %v1062_v33 }
  0x22   :  { %594 = vmatmul.mubr.bf16.vlgmr.msra.gmra.mrb[0].mxu0 %v1059_v31  ;;  %1007 = vmatprep.subr.bf16.mxu1 %v1069_v39 }
  0x23   :  { %970 = vmatpush3.bf16.msra.mxu0 %v1067_v37  ;;  %601 = vmatprep.mubr.bf16.mxu0 %v1080_v50 }
  0x24   :  { %643 = vmatmul.mubr.bf16.vlgmr.msra.gmra.mrb[0].mxu1 %v1064_v35  ;;  %971 = vmatprep.subr.bf16.mxu0 %v1068_v38 }
  0x25   :  { %1008 = vmatpush3.bf16.msra.mxu1 %v1069_v39  ;;  %650 = vmatprep.mubr.bf16.mxu1 %v1086_v55 }
  0x26   :  { %1009 = vmatprep.subr.bf16.mxu1 %v1072_v42 }
  0x27   :  { %972 = vmatpush3.bf16.msra.mxu0 %v1070_v40 }
  0x28   :  { %973 = vmatprep.subr.bf16.mxu0 %v1071_v41 }
  0x29   :  { %1010 = vmatpush3.bf16.msra.mxu1 %v1072_v42 }
  0x2a   :  { %1011 = vmatprep.subr.bf16.mxu1 %v1075_v45  ;;  %602 = vmatmul.mubr.bf16.gmra.mrb[4].mxu0 %v1084_v53 }
  0x2b   :  { %974 = vmatpush3.bf16.msra.mxu0 %v1073_v43  ;;  %691 = vmatprep.mubr.bf16.mxu0 %v1097_v63 }
  0x2c   :  { %975 = vmatprep.subr.bf16.mxu0 %v1074_v44  ;;  %651 = vmatmul.mubr.bf16.gmra.mrb[4].mxu1 %v1088_v56 }
  0x2d   :  { %1012 = vmatpush3.bf16.msra.mxu1 %v1075_v45  ;;  %1023 = vmatprep.mubr.bf16.mxu1 %v1099_v1 }
  0x2e   :  { %1013 = vmatprep.subr.bf16.mxu1 %v1078_v48 }
  0x2f   :  { %976 = vmatpush3.bf16.msra.mxu0 %v1076_v46 }
  0x30   :  { %977 = vmatprep.subr.bf16.mxu0 %v1077_v47 }
  0x31   :  { %1014 = vmatpush3.bf16.msra.mxu1 %v1078_v48 }
  0x32   :  { %1015 = vmatprep.subr.bf16.mxu1 %v1083_v52 }
  0x33   :  { %978 = vmatpush3.bf16.msra.mxu0 %v1079_v49 }
  0x34   :  { %979 = vmatprep.subr.bf16.mxu0 %v1082_v51 }
  0x35   :  { %1016 = vmatpush3.bf16.msra.mxu1 %v1083_v52 }
  0x36   :  { %1017 = vmatprep.subr.bf16.mxu1 %v1090_v58 }
  0x37   :  { %980 = vmatpush3.bf16.msra.mxu0 %v1085_v54 }
  0x38   :  { %981 = vmatprep.subr.bf16.mxu0 %v1089_v57 }
  0x39   :  { %1018 = vmatpush3.bf16.msra.mxu1 %v1090_v58 }
  0x3a   :  { %1019 = vmatprep.subr.bf16.mxu1 %v1093_v61 }
  0x3b   :  { %982 = vmatpush3.bf16.msra.mxu0 %v1091_v59 }
  0x3c   :  { %983 = vmatprep.subr.bf16.mxu0 %v1092_v60 }
  0x3d   :  { %1020 = vmatpush3.bf16.msra.mxu1 %v1093_v61 }
  0x3e   :  { %1021 = vmatprep.subr.bf16.mxu1 %v1098_v0 }
  0x3f   :  { %984 = vmatpush3.bf16.msra.mxu0 %v1094_v62 }
  0x41   :  { %1022 = vmatpush3.bf16.msra.mxu1 %v1098_v0 }
  0x42   :  { %692 = vmatmul.mubr.bf16.vlgmr.msra.gmra.mrb[8].mxu0 %v1095_v2 }
  0x43   :  { %699 = vmatprep.mubr.bf16.mxu0 %v1101_v3 }
  0x44   :  { %1024 = vmatmul.mubr.bf16.vlgmr.msra.gmra.mrb[8].mxu1 %v1100_v4 }
  0x4a   :  { %700 = vmatmul.mubr.bf16.gmra.mrb[12].mxu0 %v1103_v5 }
  0xf5   :  { %v929_v7 = vpop.f32.mrb[0].mxu0 }
  0xf6   :  { %v930_v9 = vpop.f32.mrb[1].mxu0 }
  0xf7   :  { %v931_v10 = vadd.f32 %v930_v9, %v929_v7  ;;  %v932_v11 = vpop.f32.mrb[2].mxu0  ;;  %v957_v12 = vpop.f32.mrb[0].mxu1 }
  0xf8   :  { %v933_v13 = vpop.f32.mrb[3].mxu0  ;;  %v958_v16 = vpop.f32.mrb[1].mxu1 }
  0xf9   :  { %v596_v14 = vadd.f32 %v931_v10, %v823_v8  ;;  %v934_v15 = vadd.f32 %v933_v13, %v932_v11  ;;  %v959_v17 = vadd.f32 %v958_v16, %v957_v12  ;;  %v960_v18 = vpop.f32.mrb[2].mxu1 }
  0xfa   :  { %v961_v20 = vpop.f32.mrb[3].mxu1 }
  0xfb   :  { %v599_v19 = vadd.f32 %v934_v15, %v823_v8  ;;  %v645_v21 = vadd.f32 %v959_v17, %v596_v14  ;;  %v962_v22 = vadd.f32 %v961_v20, %v960_v18 }
  0xfd   :  { %v648_v23 = vadd.f32 %v962_v22, %v599_v19  ;;  %v935_v24 = vpop.f32.mrb[4].mxu0 }
  0xfe   :  { %v936_v25 = vpop.f32.mrb[5].mxu0 }
  0xff   :  { %v937_v26 = vadd.f32 %v936_v25, %v935_v24  ;;  %v938_v27 = vpop.f32.mrb[6].mxu0  ;;  %v963_v28 = vpop.f32.mrb[4].mxu1  ;;  %v795_v24 = vld [vmem:[%s1375_s5] sm:$0x1] }
 0x100   :  { %v939_v29 = vpop.f32.mrb[7].mxu0  ;;  %v964_v32 = vpop.f32.mrb[5].mxu1 }
 0x101   :  { %v604_v30 = vadd.f32 %v937_v26, %v823_v8  ;;  %v940_v31 = vadd.f32 %v939_v29, %v938_v27  ;;  %v965_v33 = vadd.f32 %v964_v32, %v963_v28  ;;  %v966_v34 = vpop.f32.mrb[6].mxu1 }
 0x102   :  { %v967_v36 = vpop.f32.mrb[7].mxu1 }
 0x103   :  { %v607_v35 = vadd.f32 %v940_v31, %v823_v8  ;;  %v653_v37 = vadd.f32 %v965_v33, %v604_v30  ;;  %v968_v38 = vadd.f32 %v967_v36, %v966_v34 }
 0x105   :  { %v656_v39 = vadd.f32 %v968_v38, %v607_v35 }
 0x115   :  { %v985_v40 = vpop.f32.mrb[8].mxu0 }
 0x116   :  { %v986_v41 = vpop.f32.mrb[9].mxu0 }
 0x117   :  { %v987_v42 = vadd.f32 %v986_v41, %v985_v40  ;;  %v988_v43 = vpop.f32.mrb[10].mxu0  ;;  %v1025_v45 = vpop.f32.mrb[8].mxu1 }
 0x118   :  { %v989_v44 = vpop.f32.mrb[11].mxu0  ;;  %v742_v48 = vpop.f32.mrb[9].mxu1 }
 0x119   :  { %v990_v46 = vadd.f32 %v989_v44, %v988_v43  ;;  %v694_v47 = vadd.f32 %v987_v42, %v645_v21  ;;  %v1026_v49 = vpop.f32.mrb[10].mxu1  ;;  %v783_v21 = vld [vmem:[%s1374_s4] sm:$0x1] }
 0x11a   :  { %v745_v52 = vpop.f32.mrb[11].mxu1 }
 0x11b   :  { %v743_v50 = vadd.f32 %v742_v48, %v694_v47  ;;  %v697_v51 = vadd.f32 %v990_v46, %v648_v23 }
 0x11d   :  { %v746_v53 = vadd.f32 %v745_v52, %v697_v51  ;;  %v991_v54 = vpop.f32.mrb[12].mxu0  ;;  %v796_v55 = vmul.f32 %v743_v50, %v743_v50 }
 0x11e   :  { %v992_v56 = vpop.f32.mrb[13].mxu0 }
 0x11f   :  { %v905_v57 = vpack.c.bf16 %v746_v53, %v743_v50  ;;  %v784_v58 = vadd.f32 %v746_v53, %v743_v50  ;;  %v797_v59 = vmul.f32 %v746_v53, %v746_v53  ;;  %v993_v60 = vadd.f32 %v992_v56, %v991_v54  ;;  %v994_v61 = vpop.f32.mrb[14].mxu0 }
 0x120   :  { %v995_v62 = vpop.f32.mrb[15].mxu0 }
 0x121   :  { %906 = vst [vmem:[%s1377_s3] sm:$0xff] %v905_v57   ;;  %v800_v63 = vadd.f32 %v797_v59, %v796_v55  ;;  %v702_v0 = vadd.f32 %v993_v60, %v653_v37  ;;  %v996_v1 = vadd.f32 %v995_v62, %v994_v61 }
 0x123   :  { %v751_v2 = vadd.f32 %v1025_v45, %v702_v0  ;;  %v705_v3 = vadd.f32 %v996_v1, %v656_v39 }
 0x125   :  { %v785_v4 = vadd.f32 %v784_v58, %v751_v2  ;;  %v798_v5 = vmul.f32 %v751_v2, %v751_v2  ;;  %v754_v6 = vadd.f32 %v1026_v49, %v705_v3 }
 0x127   :  { %v801_v7 = vadd.f32 %v800_v63, %v798_v5  ;;  %v910_v8 = vpack.c.bf16 %v754_v6, %v751_v2  ;;  %v786_v9 = vadd.f32 %v785_v4, %v754_v6  ;;  %v799_v10 = vmul.f32 %v754_v6, %v754_v6 }
 0x129   :  { %912 = vst [vmem:[%s1377_s3 + $0x8] sm:$0xff] %v910_v8   ;;  %v787_v11 = vrot.slane %v786_v9, 4  ;;  %v802_v12 = vadd.f32 %v801_v7, %v799_v10 }
 0x12b   :  { %v788_v13 = vadd.f32 %v787_v11, %v786_v9  ;;  %v803_v14 = vrot.slane %v802_v12, 4 }
 0x12d   :  { %v789_v15 = vrot.slane %v788_v13, 2  ;;  %v804_v16 = vadd.f32 %v803_v14, %v802_v12 }
 0x12f   :  { %v790_v17 = vadd.f32 %v789_v15, %v788_v13  ;;  %v805_v18 = vrot.slane %v804_v16, 2 }
 0x131   :  { %v791_v19 = vrot.slane %v790_v17, 1  ;;  %v806_v20 = vadd.f32 %v805_v18, %v804_v16 }
 0x133   :  { %v792_v22 = vadd.f32 %v791_v19, %v790_v17  ;;  %v807_v23 = vrot.slane %v806_v20, 1 }
 0x135   :  { %v793_v25 = vadd.f32 %v792_v22, %v783_v21  ;;  %v808_v26 = vadd.f32 %v807_v23, %v806_v20 }
 0x137   :  { %794 = vst [vmem:[%s1374_s4] sm:$0x1] %v793_v25  ;;  %v809_v27 = vadd.f32 %v808_v26, %v795_v24 }
 0x139   :  { %810 = vst [vmem:[%s1375_s5] sm:$0x1] %v809_v27 }

// kernel: net_forward.12
= control target key start
LH: loop header
LB: loop body
LE: loop exit
PB: predicated region body
PF: predicated region fallthrough
CT: control target
= control target key end

     0   :  { %s2431_s1 = inlined_call_operand.vmem [shape: bf16[896,128], index: 1, kind: input, shape index: {}]   ;;  %s2432_s0 = inlined_call_operand.vmem [shape: bf16[128,896], index: 0, kind: input, shape index: {}]   ;;  %s2433_s2 = inlined_call_operand.vmem [shape: f32[1,128], index: 2, kind: input, shape index: {}]   ;;  %s2434_s4 = inlined_call_operand.vmem [shape: f32[1,128], index: 4, kind: output, shape index: {1}]   ;;  %s2435_s5 = inlined_call_operand.vmem [shape: f32[1,128], index: 5, kind: output, shape index: {2}]   ;;  %s2436_s3 = inlined_call_operand.vmem [shape: bf16[128,128], index: 3, kind: output, shape index: {0}]  }
   0x1   :  { %v1808_v0 = vld [vmem:[%s2431_s1 + $0x40] sm:$0xff]   ;;  %v1812_v4 = vld [vmem:[%s2431_s1 + $0x48] sm:$0xff]   ;;  %v1816_v8 = vld [vmem:[%s2431_s1 + $0x50] sm:$0xff]  }
   0x2   :  { %v1809_v1 = vld [vmem:[%s2431_s1] sm:$0xff]   ;;  %1567 = vmatprep.subr.bf16.mxu0 %v1808_v0  ;;  %v1813_v5 = vld [vmem:[%s2431_s1 + $0x8] sm:$0xff]   ;;  %v1817_v9 = vld [vmem:[%s2431_s1 + $0x10] sm:$0xff]  }
   0x3   :  { %v1810_v2 = vld [vmem:[%s2431_s1 + $0xc0] sm:$0xff]   ;;  %1568 = vmatpush3.bf16.msra.mxu0 %v1809_v1  ;;  %v1814_v6 = vld [vmem:[%s2431_s1 + $0xc8] sm:$0xff]   ;;  %v1818_v10 = vld [vmem:[%s2431_s1 + $0xd0] sm:$0xff]  }
   0x4   :  { %v1811_v3 = vld [vmem:[%s2431_s1 + $0x80] sm:$0xff]   ;;  %1631 = vmatprep.subr.bf16.mxu1 %v1810_v2  ;;  %1569 = vmatprep.subr.bf16.mxu0 %v1812_v4  ;;  %v1815_v7 = vld [vmem:[%s2431_s1 + $0x88] sm:$0xff]   ;;  %v1819_v11 = vld [vmem:[%s2431_s1 + $0x90] sm:$0xff]  }
   0x5   :  { %1632 = vmatpush3.bf16.msra.mxu1 %v1811_v3  ;;  %v1820_v12 = vld [vmem:[%s2431_s1 + $0x58] sm:$0xff]   ;;  %v1824_v16 = vld [vmem:[%s2431_s1 + $0x60] sm:$0xff]   ;;  %v1828_v20 = vld [vmem:[%s2431_s1 + $0x68] sm:$0xff]  }
   0x6   :  { %1633 = vmatprep.subr.bf16.mxu1 %v1814_v6  ;;  %v1821_v13 = vld [vmem:[%s2431_s1 + $0x18] sm:$0xff]   ;;  %v1825_v17 = vld [vmem:[%s2431_s1 + $0x20] sm:$0xff]   ;;  %v1829_v21 = vld [vmem:[%s2431_s1 + $0x28] sm:$0xff]  }
   0x7   :  { %1570 = vmatpush3.bf16.msra.mxu0 %v1813_v5  ;;  %v1822_v14 = vld [vmem:[%s2431_s1 + $0xd8] sm:$0xff]   ;;  %v1826_v18 = vld [vmem:[%s2431_s1 + $0xe0] sm:$0xff]   ;;  %v1830_v22 = vld [vmem:[%s2431_s1 + $0xe8] sm:$0xff]  }
   0x8   :  { %1571 = vmatprep.subr.bf16.mxu0 %v1816_v8  ;;  %v1823_v15 = vld [vmem:[%s2431_s1 + $0x98] sm:$0xff]   ;;  %v1827_v19 = vld [vmem:[%s2431_s1 + $0xa0] sm:$0xff]   ;;  %v1831_v23 = vld [vmem:[%s2431_s1 + $0xa8] sm:$0xff]  }
   0x9   :  { %1634 = vmatpush3.bf16.msra.mxu1 %v1815_v7  ;;  %v1832_v24 = vld [vmem:[%s2431_s1 + $0x70] sm:$0xff]   ;;  %v1836_v28 = vld [vmem:[%s2431_s1 + $0x78] sm:$0xff]   ;;  %v1841_v32 = vld [vmem:[%s2432_s0 + $0x4] ss:$28 sps:$4 sm:$0xff]  }
   0xa   :  { %1635 = vmatprep.subr.bf16.mxu1 %v1818_v10  ;;  %v1833_v25 = vld [vmem:[%s2431_s1 + $0x30] sm:$0xff]   ;;  %v1837_v29 = vld [vmem:[%s2431_s1 + $0x38] sm:$0xff]   ;;  %857 = vmatprep.mubr.bf16.mxu0 %v1841_v32  ;;  %v1843_v34 = vld [vmem:[%s2431_s1 + $0x140] sm:$0xff]  }
   0xb   :  { %1572 = vmatpush3.bf16.msra.mxu0 %v1817_v9  ;;  %v1834_v26 = vld [vmem:[%s2431_s1 + $0xf0] sm:$0xff]   ;;  %v1838_v30 = vld [vmem:[%s2431_s1 + $0xf8] sm:$0xff]   ;;  %v1844_v35 = vld [vmem:[%s2432_s0 + $0x8] ss:$28 sps:$4 sm:$0xff]  }
   0xc   :  { %1573 = vmatprep.subr.bf16.mxu0 %v1820_v12  ;;  %v1835_v27 = vld [vmem:[%s2431_s1 + $0xb0] sm:$0xff]   ;;  %v1839_v31 = vld [vmem:[%s2432_s0] ss:$28 sps:$4 sm:$0xff]   ;;  %v1846_v36 = vld [vmem:[%s2432_s0 + $0xc] ss:$28 sps:$4 sm:$0xff]  }
   0xd   :  { %1636 = vmatpush3.bf16.msra.mxu1 %v1819_v11  ;;  %v1842_v33 = vld [vmem:[%s2431_s1 + $0xb8] sm:$0xff]   ;;  %v1847_v37 = vld [vmem:[%s2431_s1 + $0x100] sm:$0xff]   ;;  %954 = vmatprep.mubr.bf16.mxu1 %v1846_v36  ;;  %v1851_v40 = vld [vmem:[%s2431_s1 + $0x148] sm:$0xff]  }
   0xe   :  { %1637 = vmatprep.subr.bf16.mxu1 %v1822_v14  ;;  %v1848_v38 = vld [vmem:[%s2432_s0 + $0x3c] ss:$28 sps:$4 sm:$0xff]   ;;  %v1852_v41 = vld [vmem:[%s2432_s0 + $0x44] ss:$28 sps:$4 sm:$0xff]   ;;  %v1854_v42 = vld [vmem:[%s2431_s1 + $0x108] sm:$0xff]  }
   0xf   :  { %1574 = vmatpush3.bf16.msra.mxu0 %v1821_v13  ;;  %v1850_v39 = vld [vmem:[%s2432_s0 + $0x38] ss:$28 sps:$4 sm:$0xff]   ;;  %v1855_v43 = vld [vmem:[%s2432_s0 + $0x40] ss:$28 sps:$4 sm:$0xff]   ;;  %v1858_v48 = vld [vmem:[%s2432_s0 + $0x70] ss:$28 sps:$4 sm:$0xff]  }
  0x10   :  { %1575 = vmatprep.subr.bf16.mxu0 %v1824_v16  ;;  %v1856_v44 = vld [vmem:[%s2432_s0 + $0x74] ss:$28 sps:$4 sm:$0xff]   ;;  %v1860_v46 = vld [vmem:[%s2432_s0 + $0x7c] ss:$28 sps:$4 sm:$0xff]   ;;  %v1864_v49 = vld [vmem:[%s2432_s0 + $0xac] ss:$28 sps:$4 sm:$0xff]  }
  0x11   :  { %1638 = vmatpush3.bf16.msra.mxu1 %v1823_v15  ;;  %v1859_v45 = vld [vmem:[%s2431_s1 + $0x150] sm:$0xff]   ;;  %v1867_v50 = vld [vmem:[%s2431_s1 + $0x158] sm:$0xff]   ;;  %v1875_v54 = vld [vmem:[%s2431_s1 + $0x160] sm:$0xff]  }
  0x12   :  { %1639 = vmatprep.subr.bf16.mxu1 %v1826_v18  ;;  %v1862_v47 = vld [vmem:[%s2431_s1 + $0x110] sm:$0xff]   ;;  %v1870_v52 = vld [vmem:[%s2431_s1 + $0x118] sm:$0xff]   ;;  %v1876_v55 = vld [vmem:[%s2431_s1 + $0x180] sm:$0xff]  }
  0x13   :  { %1576 = vmatpush3.bf16.msra.mxu0 %v1825_v17  ;;  %v1863_v51 = vld [vmem:[%s2432_s0 + $0x78] ss:$28 sps:$4 sm:$0xff]   ;;  %v1866_v56 = vld [vmem:[%s2432_s0 + $0xa8] ss:$28 sps:$4 sm:$0xff]   ;;  %v1871_v59 = vld [vmem:[%s2432_s0 + $0xb0] ss:$28 sps:$4 sm:$0xff]  }
  0x14   :  { %1577 = vmatprep.subr.bf16.mxu0 %v1828_v20  ;;  %v1868_v53 = vld [vmem:[%s2432_s0 + $0xb4] ss:$28 sps:$4 sm:$0xff]   ;;  %v1879_v57 = vld [vmem:[%s2431_s1 + $0x120] sm:$0xff]   ;;  %v1877_v60 = vld [vmem:[%s2432_s0 + $0xec] ss:$28 sps:$4 sm:$0xff]  }
  0x15   :  { %1640 = vmatpush3.bf16.msra.mxu1 %v1827_v19  ;;  %v1872_v58 = vld [vmem:[%s2432_s0 + $0xe4] ss:$28 sps:$4 sm:$0xff]   ;;  %v1884_v61 = vld [vmem:[%s2431_s1 + $0x168] sm:$0xff]   ;;  %v1890_v0 = vld [vmem:[%s2431_s1 + $0x190] sm:$0xff]  }
  0x16   :  { %1641 = vmatprep.subr.bf16.mxu1 %v1830_v22  ;;  %v1885_v62 = vld [vmem:[%s2431_s1 + $0x188] sm:$0xff]   ;;  %v1874_v1 = vld [vmem:[%s2432_s0 + $0xe0] ss:$28 sps:$4 sm:$0xff]   ;;  %v1894_v4 = vld [vmem:[%s2431_s1 + $0x170] sm:$0xff]  }
  0x17   :  { %1578 = vmatpush3.bf16.msra.mxu0 %v1829_v21  ;;  %v1888_v63 = vld [vmem:[%s2431_s1 + $0x128] sm:$0xff]   ;;  %v1881_v3 = vld [vmem:[%s2432_s0 + $0x11c] ss:$28 sps:$4 sm:$0xff]   ;;  %v1886_v6 = vld [vmem:[%s2432_s0 + $0x124] ss:$28 sps:$4 sm:$0xff]  }
  0x18   :  { %1579 = vmatprep.subr.bf16.mxu0 %v1832_v24  ;;  %v1880_v2 = vld [vmem:[%s2432_s0 + $0xe8] ss:$28 sps:$4 sm:$0xff]   ;;  %v1895_v5 = vld [vmem:[%s2431_s1 + $0x198] sm:$0xff]   ;;  %v1898_v7 = vld [vmem:[%s2431_s1 + $0x130] sm:$0xff]  }
  0x19   :  { %1642 = vmatpush3.bf16.msra.mxu1 %v1831_v23  ;;  %v1900_v8 = vld [vmem:[%s2431_s1 + $0x1a0] sm:$0xff]   ;;  %v1883_v9 = vld [vmem:[%s2432_s0 + $0x118] ss:$28 sps:$4 sm:$0xff]   ;;  %v1905_v13 = vld [vmem:[%s2431_s1 + $0x1a8] sm:$0xff]  }
  0x1a   :  { %1643 = vmatprep.subr.bf16.mxu1 %v1834_v26  ;;  %v1904_v10 = vld [vmem:[%s2431_s1 + $0x178] sm:$0xff]   ;;  %v1891_v12 = vld [vmem:[%s2432_s0 + $0x154] ss:$28 sps:$4 sm:$0xff]   ;;  %v1901_v18 = vld [vmem:[%s2432_s0 + $0x18c] ss:$28 sps:$4 sm:$0xff]  }
  0x1b   :  { %1580 = vmatpush3.bf16.msra.mxu0 %v1833_v25  ;;  %v1889_v11 = vld [vmem:[%s2432_s0 + $0x120] ss:$28 sps:$4 sm:$0xff]   ;;  %v1910_v16 = vld [vmem:[%s2431_s1 + $0x1b0] sm:$0xff]   ;;  %v1903_v22 = vld [vmem:[%s2432_s0 + $0x188] ss:$28 sps:$4 sm:$0xff]  }
  0x1c   :  { %1581 = vmatprep.subr.bf16.mxu0 %v1836_v28  ;;  %v1908_v14 = vld [vmem:[%s2431_s1 + $0x138] sm:$0xff]   ;;  %v1893_v17 = vld [vmem:[%s2432_s0 + $0x150] ss:$28 sps:$4 sm:$0xff]  }
  0x1d   :  { %1644 = vmatpush3.bf16.msra.mxu1 %v1835_v27  ;;  %v1896_v15 = vld [vmem:[%s2432_s0 + $0x15c] ss:$28 sps:$4 sm:$0xff]   ;;  %v1906_v21 = vld [vmem:[%s2432_s0 + $0x194] ss:$28 sps:$4 sm:$0xff]   ;;  %v1917_v27 = vld [vmem:[%s2432_s0 + $0x4c] ss:$28 sps:$4 sm:$0xff]  }
  0x1e   :  { %1645 = vmatprep.subr.bf16.mxu1 %v1838_v30  ;;  %v1914_v19 = vld [vmem:[%s2431_s1 + $0x1b8] sm:$0xff]   ;;  %v1913_v23 = vld [vmem:[%s2432_s0 + $0x14] ss:$28 sps:$4 sm:$0xff]   ;;  %v1919_v30 = vld [vmem:[%s2432_s0 + $0x48] ss:$28 sps:$4 sm:$0xff]  }
  0x1f   :  { %1582 = vmatpush3.bf16.msra.mxu0 %v1837_v29  ;;  %v1899_v20 = vld [vmem:[%s2432_s0 + $0x158] ss:$28 sps:$4 sm:$0xff]   ;;  %v1909_v24 = vld [vmem:[%s2432_s0 + $0x190] ss:$28 sps:$4 sm:$0xff]   ;;  %v1923_v29 = vld [vmem:[%s2432_s0 + $0x88] ss:$28 sps:$4 sm:$0xff]  }
  0x20   :  { %1695 = vmatprep.subr.bf16.mxu0 %v1843_v34  ;;  %v1915_v25 = vld [vmem:[%s2432_s0 + $0x18] ss:$28 sps:$4 sm:$0xff]   ;;  %v1911_v26 = vld [vmem:[%s2432_s0 + $0x10] ss:$28 sps:$4 sm:$0xff]   ;;  %v1924_v32 = vld [vmem:[%s2432_s0 + $0xc0] ss:$28 sps:$4 sm:$0xff]  }
  0x21   :  { %1646 = vmatpush3.bf16.msra.mxu1 %v1842_v33  ;;  %v1916_v28 = vld [vmem:[%s2432_s0 + $0x50] ss:$28 sps:$4 sm:$0xff]   ;;  %v1931_v33 = vld [vmem:[%s2432_s0 + $0xf8] ss:$28 sps:$4 sm:$0xff]   ;;  %v1922_v34 = vld [vmem:[%s2432_s0 + $0x80] ss:$28 sps:$4 sm:$0xff]  }
  0x22   :  { %858 = vmatmul.mubr.bf16.vlgmr.msra.gmra.mrb[0].mxu0 %v1839_v31  ;;  %1775 = vmatprep.subr.bf16.mxu1 %v1876_v55  ;;  %v1920_v31 = vld [vmem:[%s2432_s0 + $0x84] ss:$28 sps:$4 sm:$0xff]   ;;  %v1932_v36 = vld [vmem:[%s2432_s0 + $0x130] ss:$28 sps:$4 sm:$0xff]  }
  0x23   :  { %1696 = vmatpush3.bf16.msra.mxu0 %v1847_v37  ;;  %865 = vmatprep.mubr.bf16.mxu0 %v1848_v38  ;;  %v1939_v37 = vld [vmem:[%s2432_s0 + $0x168] ss:$28 sps:$4 sm:$0xff]   ;;  %v1927_v38 = vld [vmem:[%s2432_s0 + $0xb8] ss:$28 sps:$4 sm:$0xff]  }
  0x24   :  { %955 = vmatmul.mubr.bf16.vlgmr.msra.gmra.mrb[0].mxu1 %v1844_v35  ;;  %1697 = vmatprep.subr.bf16.mxu0 %v1851_v40  ;;  %v1925_v35 = vld [vmem:[%s2432_s0 + $0xbc] ss:$28 sps:$4 sm:$0xff]  }
  0x25   :  { %962 = vmatprep.mubr.bf16.mxu1 %v1852_v41  ;;  %1776 = vmatpush3.bf16.msra.mxu1 %v1876_v55  ;;  %v1940_v40 = vld [vmem:[%s2432_s0 + $0x1a0] ss:$28 sps:$4 sm:$0xff]   ;;  %v1930_v41 = vld [vmem:[%s2432_s0 + $0xf0] ss:$28 sps:$4 sm:$0xff]  }
  0x26   :  { %1777 = vmatprep.subr.bf16.mxu1 %v1885_v62 }
  0x27   :  { %1698 = vmatpush3.bf16.msra.mxu0 %v1854_v42  ;;  %v1933_v42 = vld [vmem:[%s2432_s0 + $0x12c] ss:$28 sps:$4 sm:$0xff]  }
  0x28   :  { %1699 = vmatprep.subr.bf16.mxu0 %v1859_v45  ;;  %v1938_v45 = vld [vmem:[%s2432_s0 + $0x160] ss:$28 sps:$4 sm:$0xff]  }
  0x29   :  { %1778 = vmatpush3.bf16.msra.mxu1 %v1885_v62 }
  0x2a   :  { %866 = vmatmul.mubr.bf16.gmra.mrb[4].mxu0 %v1850_v39  ;;  %1779 = vmatprep.subr.bf16.mxu1 %v1890_v0  ;;  %v1928_v39 = vld [vmem:[%s2432_s0 + $0xf4] ss:$28 sps:$4 sm:$0xff]  }
  0x2b   :  { %873 = vmatprep.mubr.bf16.mxu0 %v1856_v44  ;;  %1700 = vmatpush3.bf16.msra.mxu0 %v1862_v47  ;;  %v1936_v44 = vld [vmem:[%s2432_s0 + $0x164] ss:$28 sps:$4 sm:$0xff]   ;;  %v1943_v47 = vld [vmem:[%s2432_s0 + $0x198] ss:$28 sps:$4 sm:$0xff]  }
  0x2c   :  { %963 = vmatmul.mubr.bf16.gmra.mrb[4].mxu1 %v1855_v43  ;;  %1701 = vmatprep.subr.bf16.mxu0 %v1867_v50  ;;  %v1935_v43 = vld [vmem:[%s2432_s0 + $0x128] ss:$28 sps:$4 sm:$0xff]  }
  0x2d   :  { %970 = vmatprep.mubr.bf16.mxu1 %v1860_v46  ;;  %1780 = vmatpush3.bf16.msra.mxu1 %v1890_v0  ;;  %v1941_v46 = vld [vmem:[%s2432_s0 + $0x19c] ss:$28 sps:$4 sm:$0xff]  }
  0x2e   :  { %1781 = vmatprep.subr.bf16.mxu1 %v1895_v5 }
  0x2f   :  { %1702 = vmatpush3.bf16.msra.mxu0 %v1870_v52 }
  0x30   :  { %1703 = vmatprep.subr.bf16.mxu0 %v1875_v54 }
  0x31   :  { %1782 = vmatpush3.bf16.msra.mxu1 %v1895_v5 }
  0x32   :  { %874 = vmatmul.mubr.bf16.gmra.mrb[8].mxu0 %v1858_v48  ;;  %1783 = vmatprep.subr.bf16.mxu1 %v1900_v8 }
  0x33   :  { %881 = vmatprep.mubr.bf16.mxu0 %v1864_v49  ;;  %1704 = vmatpush3.bf16.msra.mxu0 %v1879_v57  ;;  %v2314_v49 = vld [vmem:[%s2433_s2] ss:$0 sm:$0xff] }
  0x34   :  { %971 = vmatmul.mubr.bf16.gmra.mrb[8].mxu1 %v1863_v51  ;;  %1705 = vmatprep.subr.bf16.mxu0 %v1884_v61 }
  0x35   :  { %978 = vmatprep.mubr.bf16.mxu1 %v1868_v53  ;;  %1784 = vmatpush3.bf16.msra.mxu1 %v1900_v8 }
  0x36   :  { %1785 = vmatprep.subr.bf16.mxu1 %v1905_v13 }
  0x37   :  { %1706 = vmatpush3.bf16.msra.mxu0 %v1888_v63 }
  0x38   :  { %1707 = vmatprep.subr.bf16.mxu0 %v1894_v4 }
  0x39   :  { %1786 = vmatpush3.bf16.msra.mxu1 %v1905_v13 }
  0x3a   :  { %882 = vmatmul.mubr.bf16.gmra.mrb[12].mxu0 %v1866_v56  ;;  %1787 = vmatprep.subr.bf16.mxu1 %v1910_v16 }
  0x3b   :  { %889 = vmatprep.mubr.bf16.mxu0 %v1872_v58  ;;  %1708 = vmatpush3.bf16.msra.mxu0 %v1898_v7 }
  0x3c   :  { %979 = vmatmul.mubr.bf16.gmra.mrb[12].mxu1 %v1871_v59  ;;  %1709 = vmatprep.subr.bf16.mxu0 %v1904_v10 }
  0x3d   :  { %986 = vmatprep.mubr.bf16.mxu1 %v1877_v60  ;;  %1788 = vmatpush3.bf16.msra.mxu1 %v1910_v16  ;;  %v1944_v60 = vmov 0.0  }
  0x3e   :  { %1789 = vmatprep.subr.bf16.mxu1 %v1914_v19  ;;  %1297 = vst [vmem:[%s2434_s4] sm:$0x1] %v1944_v60  ;;  %1298 = vst [vmem:[%s2435_s5] sm:$0x1] %v1944_v60 }
  0x3f   :  { %1710 = vmatpush3.bf16.msra.mxu0 %v1908_v14 }
  0x41   :  { %1790 = vmatpush3.bf16.msra.mxu1 %v1914_v19 }
  0x42   :  { %890 = vmatmul.mubr.bf16.gmra.mrb[16].mxu0 %v1874_v1 }
  0x43   :  { %897 = vmatprep.mubr.bf16.mxu0 %v1881_v3 }
  0x44   :  { %987 = vmatmul.mubr.bf16.gmra.mrb[16].mxu1 %v1880_v2 }
  0x45   :  { %994 = vmatprep.mubr.bf16.mxu1 %v1886_v6 }
  0x4a   :  { %898 = vmatmul.mubr.bf16.gmra.mrb[20].mxu0 %v1883_v9 }
  0x4b   :  { %905 = vmatprep.mubr.bf16.mxu0 %v1891_v12 }
  0x4c   :  { %995 = vmatmul.mubr.bf16.gmra.mrb[20].mxu1 %v1889_v11 }
  0x4d   :  { %1002 = vmatprep.mubr.bf16.mxu1 %v1896_v15 }
  0x52   :  { %906 = vmatmul.mubr.bf16.gmra.mrb[24].mxu0 %v1893_v17 }
  0x53   :  { %913 = vmatprep.mubr.bf16.mxu0 %v1901_v18 }
  0x54   :  { %1003 = vmatmul.mubr.bf16.gmra.mrb[24].mxu1 %v1899_v20 }
  0x55   :  { %1010 = vmatprep.mubr.bf16.mxu1 %v1906_v21 }
  0x5a   :  { %914 = vmatmul.mubr.bf16.gmra.mrb[28].mxu0 %v1903_v22 }
  0x5b   :  { %1051 = vmatprep.mubr.bf16.mxu0 %v1913_v23 }
  0x5c   :  { %1011 = vmatmul.mubr.bf16.gmra.mrb[28].mxu1 %v1909_v24 }
  0x5d   :  { %1791 = vmatprep.mubr.bf16.mxu1 %v1915_v25 }
  0x62   :  { %1052 = vmatmul.mubr.bf16.vlgmr.msra.gmra.mrb[32].mxu0 %v1911_v26 }
  0x63   :  { %1059 = vmatprep.mubr.bf16.mxu0 %v1917_v27 }
  0x64   :  { %1792 = vmatmul.mubr.bf16.vlgmr.msra.gmra.mrb[32].mxu1 %v1916_v28 }
  0x65   :  { %1795 = vmatprep.mubr.bf16.mxu1 %v1923_v29 }
  0x6a   :  { %1060 = vmatmul.mubr.bf16.gmra.mrb[36].mxu0 %v1919_v30 }
  0x6b   :  { %1067 = vmatprep.mubr.bf16.mxu0 %v1920_v31 }
  0x6c   :  { %1796 = vmatmul.mubr.bf16.gmra.mrb[36].mxu1 %v1924_v32 }
  0x6d   :  { %1799 = vmatprep.mubr.bf16.mxu1 %v1931_v33 }
  0x72   :  { %1068 = vmatmul.mubr.bf16.gmra.mrb[40].mxu0 %v1922_v34 }
  0x73   :  { %1075 = vmatprep.mubr.bf16.mxu0 %v1925_v35 }
  0x74   :  { %1800 = vmatmul.mubr.bf16.gmra.mrb[40].mxu1 %v1932_v36 }
  0x75   :  { %1803 = vmatprep.mubr.bf16.mxu1 %v1939_v37 }
  0x7a   :  { %1076 = vmatmul.mubr.bf16.gmra.mrb[44].mxu0 %v1927_v38 }
  0x7b   :  { %1083 = vmatprep.mubr.bf16.mxu0 %v1928_v39 }
  0x7c   :  { %1804 = vmatmul.mubr.bf16.gmra.mrb[44].mxu1 %v1940_v40 }
  0x82   :  { %1084 = vmatmul.mubr.bf16.gmra.mrb[48].mxu0 %v1930_v41 }
  0x83   :  { %1091 = vmatprep.mubr.bf16.mxu0 %v1933_v42 }
  0x8a   :  { %1092 = vmatmul.mubr.bf16.gmra.mrb[52].mxu0 %v1935_v43 }
  0x8b   :  { %1099 = vmatprep.mubr.bf16.mxu0 %v1936_v44 }
  0x92   :  { %1100 = vmatmul.mubr.bf16.gmra.mrb[56].mxu0 %v1938_v45 }
  0x93   :  { %1107 = vmatprep.mubr.bf16.mxu0 %v1941_v46 }
  0x9a   :  { %1108 = vmatmul.mubr.bf16.gmra.mrb[60].mxu0 %v1943_v47 }
  0xf5   :  { %v1583_v48 = vpop.f32.mrb[0].mxu0 }
  0xf6   :  { %v1584_v50 = vpop.f32.mrb[1].mxu0 }
  0xf7   :  { %v1585_v51 = vadd.f32 %v1584_v50, %v1583_v48  ;;  %v1586_v52 = vpop.f32.mrb[2].mxu0  ;;  %v1647_v53 = vpop.f32.mrb[0].mxu1 }
  0xf8   :  { %v1587_v54 = vpop.f32.mrb[3].mxu0  ;;  %v1648_v57 = vpop.f32.mrb[1].mxu1 }
  0xf9   :  { %v860_v55 = vadd.f32 %v1585_v51, %v2314_v49  ;;  %v1588_v56 = vadd.f32 %v1587_v54, %v1586_v52  ;;  %v1649_v58 = vadd.f32 %v1648_v57, %v1647_v53  ;;  %v1650_v59 = vpop.f32.mrb[2].mxu1 }
  0xfa   :  { %v1651_v62 = vpop.f32.mrb[3].mxu1 }
  0xfb   :  { %v863_v61 = vadd.f32 %v1588_v56, %v2314_v49  ;;  %v2324_v63 = vadd.f32 %v1649_v58, %v860_v55  ;;  %v1652_v0 = vadd.f32 %v1651_v62, %v1650_v59 }
  0xfd   :  { %v1589_v1 = vpop.f32.mrb[4].mxu0  ;;  %v2326_v2 = vadd.f32 %v1652_v0, %v863_v61 }
  0xfe   :  { %v1590_v3 = vpop.f32.mrb[5].mxu0 }
  0xff   :  { %v1591_v4 = vadd.f32 %v1590_v3, %v1589_v1  ;;  %v1592_v5 = vpop.f32.mrb[6].mxu0  ;;  %v1653_v6 = vpop.f32.mrb[4].mxu1 }
 0x100   :  { %v1593_v7 = vpop.f32.mrb[7].mxu0  ;;  %v1654_v10 = vpop.f32.mrb[5].mxu1 }
 0x101   :  { %v868_v8 = vadd.f32 %v1591_v4, %v2314_v49  ;;  %v1594_v9 = vadd.f32 %v1593_v7, %v1592_v5  ;;  %v1655_v11 = vadd.f32 %v1654_v10, %v1653_v6  ;;  %v1656_v12 = vpop.f32.mrb[6].mxu1 }
 0x102   :  { %v1657_v14 = vpop.f32.mrb[7].mxu1 }
 0x103   :  { %v871_v13 = vadd.f32 %v1594_v9, %v2314_v49  ;;  %v2330_v15 = vadd.f32 %v1655_v11, %v868_v8  ;;  %v1658_v16 = vadd.f32 %v1657_v14, %v1656_v12 }
 0x105   :  { %v1595_v17 = vpop.f32.mrb[8].mxu0  ;;  %v2332_v18 = vadd.f32 %v1658_v16, %v871_v13 }
 0x106   :  { %v1596_v19 = vpop.f32.mrb[9].mxu0 }
 0x107   :  { %v1597_v20 = vadd.f32 %v1596_v19, %v1595_v17  ;;  %v1598_v21 = vpop.f32.mrb[10].mxu0  ;;  %v1659_v22 = vpop.f32.mrb[8].mxu1 }
 0x108   :  { %v1599_v23 = vpop.f32.mrb[11].mxu0  ;;  %v1660_v26 = vpop.f32.mrb[9].mxu1 }
 0x109   :  { %v876_v24 = vadd.f32 %v1597_v20, %v2314_v49  ;;  %v1600_v25 = vadd.f32 %v1599_v23, %v1598_v21  ;;  %v1661_v27 = vadd.f32 %v1660_v26, %v1659_v22  ;;  %v1662_v28 = vpop.f32.mrb[10].mxu1 }
 0x10a   :  { %v1663_v30 = vpop.f32.mrb[11].mxu1 }
 0x10b   :  { %v879_v29 = vadd.f32 %v1600_v25, %v2314_v49  ;;  %v2336_v31 = vadd.f32 %v1661_v27, %v876_v24  ;;  %v1664_v32 = vadd.f32 %v1663_v30, %v1662_v28 }
 0x10d   :  { %v1601_v33 = vpop.f32.mrb[12].mxu0  ;;  %v2338_v34 = vadd.f32 %v1664_v32, %v879_v29 }
 0x10e   :  { %v1602_v35 = vpop.f32.mrb[13].mxu0 }
 0x10f   :  { %v1603_v36 = vadd.f32 %v1602_v35, %v1601_v33  ;;  %v1604_v37 = vpop.f32.mrb[14].mxu0  ;;  %v1665_v38 = vpop.f32.mrb[12].mxu1 }
 0x110   :  { %v1605_v39 = vpop.f32.mrb[15].mxu0  ;;  %v1666_v42 = vpop.f32.mrb[13].mxu1 }
 0x111   :  { %v884_v40 = vadd.f32 %v1603_v36, %v2314_v49  ;;  %v1606_v41 = vadd.f32 %v1605_v39, %v1604_v37  ;;  %v1667_v43 = vadd.f32 %v1666_v42, %v1665_v38  ;;  %v1668_v44 = vpop.f32.mrb[14].mxu1 }
 0x112   :  { %v1669_v46 = vpop.f32.mrb[15].mxu1 }
 0x113   :  { %v887_v45 = vadd.f32 %v1606_v41, %v2314_v49  ;;  %v2342_v47 = vadd.f32 %v1667_v43, %v884_v40  ;;  %v1670_v48 = vadd.f32 %v1669_v46, %v1668_v44 }
 0x115   :  { %v1607_v50 = vpop.f32.mrb[16].mxu0  ;;  %v2344_v51 = vadd.f32 %v1670_v48, %v887_v45 }
 0x116   :  { %v1608_v52 = vpop.f32.mrb[17].mxu0 }
 0x117   :  { %v1609_v53 = vadd.f32 %v1608_v52, %v1607_v50  ;;  %v1610_v54 = vpop.f32.mrb[18].mxu0  ;;  %v1671_v55 = vpop.f32.mrb[16].mxu1 }
 0x118   :  { %v1611_v56 = vpop.f32.mrb[19].mxu0  ;;  %v1672_v59 = vpop.f32.mrb[17].mxu1 }
 0x119   :  { %v892_v57 = vadd.f32 %v1609_v53, %v2314_v49  ;;  %v1612_v58 = vadd.f32 %v1611_v56, %v1610_v54  ;;  %v1673_v60 = vadd.f32 %v1672_v59, %v1671_v55  ;;  %v1674_v61 = vpop.f32.mrb[18].mxu1 }
 0x11a   :  { %v1675_v0 = vpop.f32.mrb[19].mxu1 }
 0x11b   :  { %v895_v62 = vadd.f32 %v1612_v58, %v2314_v49  ;;  %v2348_v1 = vadd.f32 %v1673_v60, %v892_v57  ;;  %v1676_v3 = vadd.f32 %v1675_v0, %v1674_v61 }
 0x11d   :  { %v1613_v4 = vpop.f32.mrb[20].mxu0  ;;  %v2350_v5 = vadd.f32 %v1676_v3, %v895_v62 }
 0x11e   :  { %v1614_v6 = vpop.f32.mrb[21].mxu0 }
 0x11f   :  { %v1615_v7 = vadd.f32 %v1614_v6, %v1613_v4  ;;  %v1616_v8 = vpop.f32.mrb[22].mxu0  ;;  %v1677_v9 = vpop.f32.mrb[20].mxu1 }
 0x120   :  { %v1617_v10 = vpop.f32.mrb[23].mxu0  ;;  %v1678_v13 = vpop.f32.mrb[21].mxu1 }
 0x121   :  { %v900_v11 = vadd.f32 %v1615_v7, %v2314_v49  ;;  %v1618_v12 = vadd.f32 %v1617_v10, %v1616_v8  ;;  %v1679_v14 = vadd.f32 %v1678_v13, %v1677_v9  ;;  %v1680_v16 = vpop.f32.mrb[22].mxu1 }
 0x122   :  { %v1681_v19 = vpop.f32.mrb[23].mxu1 }
 0x123   :  { %v903_v17 = vadd.f32 %v1618_v12, %v2314_v49  ;;  %v2354_v20 = vadd.f32 %v1679_v14, %v900_v11  ;;  %v1682_v21 = vadd.f32 %v1681_v19, %v1680_v16 }
 0x125   :  { %v1619_v22 = vpop.f32.mrb[24].mxu0  ;;  %v2356_v23 = vadd.f32 %v1682_v21, %v903_v17 }
 0x126   :  { %v1620_v24 = vpop.f32.mrb[25].mxu0 }
 0x127   :  { %v1621_v25 = vadd.f32 %v1620_v24, %v1619_v22  ;;  %v1622_v26 = vpop.f32.mrb[26].mxu0  ;;  %v1683_v27 = vpop.f32.mrb[24].mxu1 }
 0x128   :  { %v1623_v28 = vpop.f32.mrb[27].mxu0  ;;  %v1684_v32 = vpop.f32.mrb[25].mxu1 }
 0x129   :  { %v908_v29 = vadd.f32 %v1621_v25, %v2314_v49  ;;  %v1624_v30 = vadd.f32 %v1623_v28, %v1622_v26  ;;  %v1685_v33 = vadd.f32 %v1684_v32, %v1683_v27  ;;  %v1686_v35 = vpop.f32.mrb[26].mxu1 }
 0x12a   :  { %v1687_v37 = vpop.f32.mrb[27].mxu1 }
 0x12b   :  { %v911_v36 = vadd.f32 %v1624_v30, %v2314_v49  ;;  %v2360_v38 = vadd.f32 %v1685_v33, %v908_v29  ;;  %v1688_v39 = vadd.f32 %v1687_v37, %v1686_v35 }
 0x12d   :  { %v1625_v40 = vpop.f32.mrb[28].mxu0  ;;  %v2362_v41 = vadd.f32 %v1688_v39, %v911_v36 }
 0x12e   :  { %v1626_v42 = vpop.f32.mrb[29].mxu0 }
 0x12f   :  { %v1627_v43 = vadd.f32 %v1626_v42, %v1625_v40  ;;  %v1628_v44 = vpop.f32.mrb[30].mxu0  ;;  %v1689_v45 = vpop.f32.mrb[28].mxu1 }
 0x130   :  { %v1629_v46 = vpop.f32.mrb[31].mxu0  ;;  %v1690_v52 = vpop.f32.mrb[29].mxu1 }
 0x131   :  { %v916_v48 = vadd.f32 %v1627_v43, %v2314_v49  ;;  %v1630_v50 = vadd.f32 %v1629_v46, %v1628_v44  ;;  %v1691_v53 = vadd.f32 %v1690_v52, %v1689_v45  ;;  %v1692_v54 = vpop.f32.mrb[30].mxu1 }
 0x132   :  { %v1693_v56 = vpop.f32.mrb[31].mxu1 }
 0x133   :  { %v919_v55 = vadd.f32 %v1630_v50, %v2314_v49  ;;  %v2366_v57 = vadd.f32 %v1691_v53, %v916_v48  ;;  %v1694_v58 = vadd.f32 %v1693_v56, %v1692_v54 }
 0x135   :  { %v1711_v59 = vpop.f32.mrb[32].mxu0  ;;  %v2368_v60 = vadd.f32 %v1694_v58, %v919_v55 }
 0x136   :  { %v1712_v61 = vpop.f32.mrb[33].mxu0 }
 0x137   :  { %v1713_v62 = vadd.f32 %v1712_v61, %v1711_v59  ;;  %v1714_v0 = vpop.f32.mrb[34].mxu0  ;;  %v1793_v4 = vpop.f32.mrb[32].mxu1 }
 0x138   :  { %v1715_v3 = vpop.f32.mrb[35].mxu0  ;;  %v1150_v8 = vpop.f32.mrb[33].mxu1 }
 0x139   :  { %v1716_v6 = vadd.f32 %v1715_v3, %v1714_v0  ;;  %v1054_v7 = vadd.f32 %v1713_v62, %v2324_v63  ;;  %v1794_v9 = vpop.f32.mrb[34].mxu1 }
 0x13a   :  { %v1153_v11 = vpop.f32.mrb[35].mxu1 }
 0x13b   :  { %v1151_v10 = vadd.f32 %v1150_v8, %v1054_v7  ;;  %v1057_v49 = vadd.f32 %v1716_v6, %v2326_v2 }
 0x13d   :  { %v1154_v12 = vadd.f32 %v1153_v11, %v1057_v49  ;;  %v1717_v13 = vpop.f32.mrb[36].mxu0  ;;  %v1324_v14 = vmul.f32 %v1151_v10, %v1151_v10 }
 0x13e   :  { %v1718_v16 = vpop.f32.mrb[37].mxu0 }
 0x13f   :  { %v1523_v17 = vpack.c.bf16 %v1154_v12, %v1151_v10  ;;  %v1300_v19 = vadd.f32 %v1154_v12, %v1151_v10  ;;  %v1325_v21 = vmul.f32 %v1154_v12, %v1154_v12  ;;  %v1719_v22 = vadd.f32 %v1718_v16, %v1717_v13  ;;  %v1720_v24 = vpop.f32.mrb[38].mxu0  ;;  %v1797_v26 = vpop.f32.mrb[36].mxu1 }
 0x140   :  { %v1721_v25 = vpop.f32.mrb[39].mxu0  ;;  %v1166_v28 = vpop.f32.mrb[37].mxu1 }
 0x141   :  { %1524 = vst [vmem:[%s2436_s3] sm:$0xff] %v1523_v17   ;;  %v1340_v63 = vadd.f32 %v1325_v21, %v1324_v14  ;;  %v1062_v27 = vadd.f32 %v1719_v22, %v2330_v15  ;;  %v1722_v2 = vadd.f32 %v1721_v25, %v1720_v24  ;;  %v1798_v29 = vpop.f32.mrb[38].mxu1 }
 0x142   :  { %v1169_v33 = vpop.f32.mrb[39].mxu1 }
 0x143   :  { %v1159_v30 = vadd.f32 %v1793_v4, %v1062_v27  ;;  %v1065_v32 = vadd.f32 %v1722_v2, %v2332_v18 }
 0x145   :  { %v1326_v35 = vmul.f32 %v1159_v30, %v1159_v30  ;;  %v1162_v36 = vadd.f32 %v1794_v9, %v1065_v32  ;;  %v1723_v37 = vpop.f32.mrb[40].mxu0  ;;  %v1301_v39 = vadd.f32 %v1300_v19, %v1159_v30 }
 0x146   :  { %v1724_v40 = vpop.f32.mrb[41].mxu0 }
 0x147   :  { %v1528_v42 = vpack.c.bf16 %v1162_v36, %v1159_v30  ;;  %v1327_v43 = vmul.f32 %v1162_v36, %v1162_v36  ;;  %v1725_v44 = vadd.f32 %v1724_v40, %v1723_v37  ;;  %v1726_v45 = vpop.f32.mrb[42].mxu0  ;;  %v1302_v46 = vadd.f32 %v1301_v39, %v1162_v36  ;;  %v2377_v15 = vpop.f32.mrb[40].mxu1 }
 0x148   :  { %v1727_v48 = vpop.f32.mrb[43].mxu0  ;;  %v1341_v50 = vadd.f32 %v1340_v63, %v1326_v35  ;;  %v1182_v53 = vpop.f32.mrb[41].mxu1 }
 0x149   :  { %1560 = vst [vmem:[%s2436_s3 + $0x8] sm:$0xff] %v1528_v42   ;;  %v1728_v18 = vadd.f32 %v1727_v48, %v1726_v45  ;;  %v1070_v52 = vadd.f32 %v1725_v44, %v2336_v31  ;;  %v1802_v55 = vpop.f32.mrb[42].mxu1 }
 0x14a   :  { %v1342_v54 = vadd.f32 %v1341_v50, %v1327_v43  ;;  %v1185_v59 = vpop.f32.mrb[43].mxu1 }
 0x14b   :  { %v1167_v56 = vadd.f32 %v1166_v28, %v1070_v52  ;;  %v1073_v58 = vadd.f32 %v1728_v18, %v2338_v34 }
 0x14d   :  { %v1303_v61 = vadd.f32 %v1302_v46, %v1167_v56  ;;  %v1328_v62 = vmul.f32 %v1167_v56, %v1167_v56  ;;  %v1170_v0 = vadd.f32 %v1169_v33, %v1073_v58  ;;  %v1729_v3 = vpop.f32.mrb[44].mxu0 }
 0x14e   :  { %v1730_v4 = vpop.f32.mrb[45].mxu0 }
 0x14f   :  { %v1343_v6 = vadd.f32 %v1342_v54, %v1328_v62  ;;  %v1533_v7 = vpack.c.bf16 %v1170_v0, %v1167_v56  ;;  %v1304_v8 = vadd.f32 %v1303_v61, %v1170_v0  ;;  %v1329_v9 = vmul.f32 %v1170_v0, %v1170_v0  ;;  %v1732_v10 = vpop.f32.mrb[46].mxu0  ;;  %v2384_v31 = vpop.f32.mrb[44].mxu1 }
 0x150   :  { %v1731_v49 = vadd.f32 %v1730_v4, %v1729_v3  ;;  %v1733_v11 = vpop.f32.mrb[47].mxu0  ;;  %v1198_v13 = vpop.f32.mrb[45].mxu1 }
 0x151   :  { %1561 = vst [vmem:[%s2436_s3 + $0x10] sm:$0xff] %v1533_v7   ;;  %v1344_v34 = vadd.f32 %v1343_v6, %v1329_v9  ;;  %v1734_v12 = vadd.f32 %v1733_v11, %v1732_v10  ;;  %v2390_v16 = vpop.f32.mrb[46].mxu1 }
 0x152   :  { %v1078_v14 = vadd.f32 %v1731_v49, %v2342_v47  ;;  %v1201_v19 = vpop.f32.mrb[47].mxu1 }
 0x153   :  { %v1081_v17 = vadd.f32 %v1734_v12, %v2344_v51 }
 0x154   :  { %v1175_v21 = vadd.f32 %v1797_v26, %v1078_v14 }
 0x155   :  { %v1178_v22 = vadd.f32 %v1798_v29, %v1081_v17  ;;  %v1735_v24 = vpop.f32.mrb[48].mxu0 }
 0x156   :  { %v1330_v25 = vmul.f32 %v1175_v21, %v1175_v21  ;;  %v1736_v63 = vpop.f32.mrb[49].mxu0  ;;  %v1305_v27 = vadd.f32 %v1304_v8, %v1175_v21 }
 0x157   :  { %v1538_v2 = vpack.c.bf16 %v1178_v22, %v1175_v21  ;;  %v1331_v28 = vmul.f32 %v1178_v22, %v1178_v22  ;;  %v1737_v30 = vadd.f32 %v1736_v63, %v1735_v24  ;;  %v1738_v32 = vpop.f32.mrb[50].mxu0 }
 0x158   :  { %v1739_v33 = vpop.f32.mrb[51].mxu0  ;;  %v1306_v35 = vadd.f32 %v1305_v27, %v1178_v22  ;;  %v1345_v36 = vadd.f32 %v1344_v34, %v1330_v25 }
 0x159   :  { %1562 = vst [vmem:[%s2436_s3 + $0x18] sm:$0xff] %v1538_v2   ;;  %v1740_v47 = vadd.f32 %v1739_v33, %v1738_v32  ;;  %v1086_v51 = vadd.f32 %v1737_v30, %v2348_v1 }
 0x15a   :  { %v1346_v26 = vadd.f32 %v1345_v36, %v1331_v28 }
 0x15b   :  { %v1183_v29 = vadd.f32 %v1182_v53, %v1086_v51  ;;  %v1089_v37 = vadd.f32 %v1740_v47, %v2350_v5 }
 0x15d   :  { %v1307_v39 = vadd.f32 %v1306_v35, %v1183_v29  ;;  %v1332_v40 = vmul.f32 %v1183_v29, %v1183_v29  ;;  %v1186_v42 = vadd.f32 %v1185_v59, %v1089_v37  ;;  %v1741_v43 = vpop.f32.mrb[52].mxu0 }
 0x15e   :  { %v1742_v44 = vpop.f32.mrb[53].mxu0 }
 0x15f   :  { %v1347_v45 = vadd.f32 %v1346_v26, %v1332_v40  ;;  %v1543_v46 = vpack.c.bf16 %v1186_v42, %v1183_v29  ;;  %v1308_v48 = vadd.f32 %v1307_v39, %v1186_v42  ;;  %v1333_v50 = vmul.f32 %v1186_v42, %v1186_v42  ;;  %v1744_v18 = vpop.f32.mrb[54].mxu0 }
 0x160   :  { %v1743_v52 = vadd.f32 %v1742_v44, %v1741_v43  ;;  %v1745_v54 = vpop.f32.mrb[55].mxu0  ;;  %v1299_v44 = vld [vmem:[%s2434_s4] sm:$0x1] }
 0x161   :  { %1563 = vst [vmem:[%s2436_s3 + $0x20] sm:$0xff] %v1543_v46   ;;  %v1348_v1 = vadd.f32 %v1347_v45, %v1333_v50  ;;  %v1746_v53 = vadd.f32 %v1745_v54, %v1744_v18 }
 0x162   :  { %v1094_v5 = vadd.f32 %v1743_v52, %v2354_v20 }
 0x163   :  { %v1097_v56 = vadd.f32 %v1746_v53, %v2356_v23 }
 0x164   :  { %v1191_v58 = vadd.f32 %v2377_v15, %v1094_v5 }
 0x165   :  { %v1194_v59 = vadd.f32 %v1802_v55, %v1097_v56  ;;  %v1747_v61 = vpop.f32.mrb[56].mxu0 }
 0x166   :  { %v1334_v62 = vmul.f32 %v1191_v58, %v1191_v58  ;;  %v1748_v0 = vpop.f32.mrb[57].mxu0  ;;  %v1309_v3 = vadd.f32 %v1308_v48, %v1191_v58  ;;  %v1323_v48 = vld [vmem:[%s2435_s5] sm:$0x1] }
 0x167   :  { %v1548_v4 = vpack.c.bf16 %v1194_v59, %v1191_v58  ;;  %v1335_v6 = vmul.f32 %v1194_v59, %v1194_v59  ;;  %v1749_v7 = vadd.f32 %v1748_v0, %v1747_v61  ;;  %v1750_v8 = vpop.f32.mrb[58].mxu0 }
 0x168   :  { %v1751_v9 = vpop.f32.mrb[59].mxu0  ;;  %v1310_v10 = vadd.f32 %v1309_v3, %v1194_v59  ;;  %v1349_v49 = vadd.f32 %v1348_v1, %v1334_v62 }
 0x169   :  { %1564 = vst [vmem:[%s2436_s3 + $0x28] sm:$0xff] %v1548_v4   ;;  %v1752_v20 = vadd.f32 %v1751_v9, %v1750_v8  ;;  %v1102_v23 = vadd.f32 %v1749_v7, %v2360_v38 }
 0x16a   :  { %v1350_v15 = vadd.f32 %v1349_v49, %v1335_v6 }
 0x16b   :  { %v1199_v55 = vadd.f32 %v1198_v13, %v1102_v23  ;;  %v1105_v11 = vadd.f32 %v1752_v20, %v2362_v41 }
 0x16d   :  { %v1311_v34 = vadd.f32 %v1310_v10, %v1199_v55  ;;  %v1336_v12 = vmul.f32 %v1199_v55, %v1199_v55  ;;  %v1202_v14 = vadd.f32 %v1201_v19, %v1105_v11  ;;  %v1753_v17 = vpop.f32.mrb[60].mxu0 }
 0x16e   :  { %v1754_v21 = vpop.f32.mrb[61].mxu0 }
 0x16f   :  { %v1351_v22 = vadd.f32 %v1350_v15, %v1336_v12  ;;  %v1553_v24 = vpack.c.bf16 %v1202_v14, %v1199_v55  ;;  %v1312_v25 = vadd.f32 %v1311_v34, %v1202_v14  ;;  %v1337_v63 = vmul.f32 %v1202_v14, %v1202_v14  ;;  %v1756_v27 = vpop.f32.mrb[62].mxu0 }
 0x170   :  { %v1755_v2 = vadd.f32 %v1754_v21, %v1753_v17  ;;  %v1757_v28 = vpop.f32.mrb[63].mxu0 }
 0x171   :  { %1565 = vst [vmem:[%s2436_s3 + $0x30] sm:$0xff] %v1553_v24   ;;  %v1352_v38 = vadd.f32 %v1351_v22, %v1337_v63  ;;  %v1758_v13 = vadd.f32 %v1757_v28, %v1756_v27 }
 0x172   :  { %v1110_v41 = vadd.f32 %v1755_v2, %v2366_v57 }
 0x173   :  { %v1113_v30 = vadd.f32 %v1758_v13, %v2368_v60 }
 0x174   :  { %v1207_v19 = vadd.f32 %v2384_v31, %v1110_v41 }
 0x175   :  { %v1210_v32 = vadd.f32 %v2390_v16, %v1113_v30 }
 0x176   :  { %v1313_v33 = vadd.f32 %v1312_v25, %v1207_v19  ;;  %v1338_v35 = vmul.f32 %v1207_v19, %v1207_v19 }
 0x177   :  { %v1558_v36 = vpack.c.bf16 %v1210_v32, %v1207_v19  ;;  %v1339_v47 = vmul.f32 %v1210_v32, %v1210_v32 }
 0x178   :  { %v1353_v51 = vadd.f32 %v1352_v38, %v1338_v35  ;;  %v1314_v26 = vadd.f32 %v1313_v33, %v1210_v32 }
 0x179   :  { %1566 = vst [vmem:[%s2436_s3 + $0x38] sm:$0xff] %v1558_v36  }
 0x17a   :  { %v1315_v29 = vrot.slane %v1314_v26, 4  ;;  %v1354_v37 = vadd.f32 %v1353_v51, %v1339_v47 }
 0x17c   :  { %v1316_v39 = vadd.f32 %v1315_v29, %v1314_v26  ;;  %v1355_v57 = vrot.slane %v1354_v37, 4 }
 0x17e   :  { %v1317_v40 = vrot.slane %v1316_v39, 2  ;;  %v1356_v60 = vadd.f32 %v1355_v57, %v1354_v37 }
 0x180   :  { %v1318_v42 = vadd.f32 %v1317_v40, %v1316_v39  ;;  %v1357_v31 = vrot.slane %v1356_v60, 2 }
 0x182   :  { %v1319_v43 = vrot.slane %v1318_v42, 1  ;;  %v1358_v16 = vadd.f32 %v1357_v31, %v1356_v60 }
 0x184   :  { %v1320_v45 = vadd.f32 %v1319_v43, %v1318_v42  ;;  %v1359_v46 = vrot.slane %v1358_v16, 1 }
 0x186   :  { %v1321_v50 = vadd.f32 %v1320_v45, %v1299_v44  ;;  %v1360_v18 = vadd.f32 %v1359_v46, %v1358_v16 }
 0x188   :  { %1322 = vst [vmem:[%s2434_s4] sm:$0x1] %v1321_v50  ;;  %v1361_v52 = vadd.f32 %v1360_v18, %v1323_v48 }
 0x18a   :  { %1362 = vst [vmem:[%s2435_s5] sm:$0x1] %v1361_v52 }

// kernel: net_forward.15
= control target key start
LH: loop header
LB: loop body
LE: loop exit
PB: predicated region body
PF: predicated region fallthrough
CT: control target
= control target key end

     0   :  { %v4361_v0 = vmov 0   ;;  %s5974_s1 = inlined_call_operand.vmem [shape: bf16[896,128], index: 1, kind: input, shape index: {}]   ;;  %s5975_s0 = inlined_call_operand.vmem [shape: bf16[512,896], index: 0, kind: input, shape index: {}]   ;;  %s5976_s2 = inlined_call_operand.vmem [shape: f32[1,128], index: 2, kind: input, shape index: {}]   ;;  %s5977_s3 = inlined_call_operand.vmem [shape: f32[512,128], index: 3, kind: output, shape index: {}]  }
   0x1   :  { %1878 = vmatprep.subr.bf16.mxu1 %v4361_v0  ;;  %2167 = vmatprep.subr.bf16.mxu0 %v4361_v0  ;;  %v3856_v1 = vld [vmem:[%s5974_s1] sm:$0xff]   ;;  %v3858_v3 = vld [vmem:[%s5974_s1 + $0x8] sm:$0xff]   ;;  %v3860_v5 = vld [vmem:[%s5974_s1 + $0x10] sm:$0xff]  }
   0x2   :  { %v4390_v2 = vld [vmem:[%s5974_s1 + $0x80] sm:$0xff]   ;;  %1879 = vmatpush1.bf16.msra.mxu1 %v3856_v1  ;;  %v4400_v4 = vld [vmem:[%s5974_s1 + $0x88] sm:$0xff]   ;;  %v4411_v6 = vld [vmem:[%s5974_s1 + $0x90] sm:$0xff]  }
   0x3   :  { %2168 = vmatpush1.bf16.msra.mxu0 %v4390_v2  ;;  %1880 = vmatprep.subr.bf16.mxu1 %v4361_v0  ;;  %v3862_v7 = vld [vmem:[%s5974_s1 + $0x18] sm:$0xff]   ;;  %v3864_v9 = vld [vmem:[%s5974_s1 + $0x20] sm:$0xff]   ;;  %v3866_v11 = vld [vmem:[%s5974_s1 + $0x28] sm:$0xff]  }
   0x4   :  { %2169 = vmatprep.subr.bf16.mxu0 %v4361_v0  ;;  %v4422_v8 = vld [vmem:[%s5974_s1 + $0x98] sm:$0xff]   ;;  %v4433_v10 = vld [vmem:[%s5974_s1 + $0xa0] sm:$0xff]   ;;  %v4444_v12 = vld [vmem:[%s5974_s1 + $0xa8] sm:$0xff]  }
   0x5   :  { %v3868_v13 = vld [vmem:[%s5974_s1 + $0x30] sm:$0xff]   ;;  %v3870_v15 = vld [vmem:[%s5974_s1 + $0x38] sm:$0xff]   ;;  %v3872_v17 = vld [vmem:[%s5974_s1 + $0x40] sm:$0xff]  }
   0x6   :  { %1881 = vmatpush1.bf16.msra.mxu1 %v3858_v3  ;;  %v4455_v14 = vld [vmem:[%s5974_s1 + $0xb0] sm:$0xff]   ;;  %v4466_v16 = vld [vmem:[%s5974_s1 + $0xb8] sm:$0xff]   ;;  %v4477_v18 = vld [vmem:[%s5974_s1 + $0xc0] sm:$0xff]  }
   0x7   :  { %2170 = vmatpush1.bf16.msra.mxu0 %v4400_v4  ;;  %1882 = vmatprep.subr.bf16.mxu1 %v4361_v0  ;;  %v3890_v19 = vld [vmem:[%s5975_s0 + $0x4] ss:$28 sps:$4 sm:$0xff]   ;;  %v3874_v20 = vld [vmem:[%s5974_s1 + $0x48] sm:$0xff]   ;;  %v3876_v23 = vld [vmem:[%s5974_s1 + $0x50] sm:$0xff]  }
   0x8   :  { %2171 = vmatprep.subr.bf16.mxu0 %v4361_v0  ;;  %v3893_v21 = vld [vmem:[%s5975_s0 + $0xc] ss:$28 sps:$4 sm:$0xff]   ;;  %1910 = vmatprep.mubr.bf16.mxu1 %v3890_v19  ;;  %v4505_v24 = vld [vmem:[%s5974_s1 + $0xd0] sm:$0xff]   ;;  %v3878_v25 = vld [vmem:[%s5974_s1 + $0x58] sm:$0xff]  }
   0x9   :  { %v4494_v22 = vld [vmem:[%s5974_s1 + $0xc8] sm:$0xff]   ;;  %2199 = vmatprep.mubr.bf16.mxu0 %v3893_v21  ;;  %v4516_v26 = vld [vmem:[%s5974_s1 + $0xd8] sm:$0xff]   ;;  %v3880_v27 = vld [vmem:[%s5974_s1 + $0x60] sm:$0xff]  }
   0xa   :  { %1883 = vmatpush1.bf16.msra.mxu1 %v3860_v5  ;;  %v4527_v28 = vld [vmem:[%s5974_s1 + $0xe0] sm:$0xff]   ;;  %v3882_v29 = vld [vmem:[%s5974_s1 + $0x68] sm:$0xff]   ;;  %v3884_v31 = vld [vmem:[%s5974_s1 + $0x70] sm:$0xff]  }
   0xb   :  { %2172 = vmatpush1.bf16.msra.mxu0 %v4411_v6  ;;  %1884 = vmatprep.subr.bf16.mxu1 %v4361_v0  ;;  %v4538_v30 = vld [vmem:[%s5974_s1 + $0xe8] sm:$0xff]   ;;  %v4549_v32 = vld [vmem:[%s5974_s1 + $0xf0] sm:$0xff]   ;;  %v3886_v33 = vld [vmem:[%s5974_s1 + $0x78] sm:$0xff]  }
   0xc   :  { %2173 = vmatprep.subr.bf16.mxu0 %v4361_v0  ;;  %v4560_v34 = vld [vmem:[%s5974_s1 + $0xf8] sm:$0xff]   ;;  %v3891_v36 = vld [vmem:[%s5975_s0 + $0x8] ss:$28 sps:$4 sm:$0xff]   ;;  %v3902_v43 = vld [vmem:[%s5975_s0 + $0x74] ss:$28 sps:$4 sm:$0xff]  }
   0xd   :  { %v3888_v35 = vld [vmem:[%s5975_s0] ss:$28 sps:$4 sm:$0xff]   ;;  %v3901_v40 = vld [vmem:[%s5974_s1 + $0x108] sm:$0xff]   ;;  %v3899_v41 = vld [vmem:[%s5975_s0 + $0x38] ss:$28 sps:$4 sm:$0xff]  }
   0xe   :  { %1885 = vmatpush1.bf16.msra.mxu1 %v3862_v7  ;;  %v3894_v37 = vld [vmem:[%s5974_s1 + $0x100] sm:$0xff]   ;;  %v3895_v38 = vld [vmem:[%s5975_s0 + $0x3c] ss:$28 sps:$4 sm:$0xff]   ;;  %v3914_v45 = vld [vmem:[%s5974_s1 + $0x110] sm:$0xff]  }
   0xf   :  { %2174 = vmatpush1.bf16.msra.mxu0 %v4422_v8  ;;  %1886 = vmatprep.subr.bf16.mxu1 %v4361_v0  ;;  %v3897_v39 = vld [vmem:[%s5975_s0 + $0x44] ss:$28 sps:$4 sm:$0xff]   ;;  %v3904_v44 = vld [vmem:[%s5975_s0 + $0x7c] ss:$28 sps:$4 sm:$0xff]   ;;  %v3906_v47 = vld [vmem:[%s5975_s0 + $0x70] ss:$28 sps:$4 sm:$0xff]  }
  0x10   :  { %2175 = vmatprep.subr.bf16.mxu0 %v4361_v0  ;;  %v3900_v42 = vld [vmem:[%s5975_s0 + $0x40] ss:$28 sps:$4 sm:$0xff]   ;;  %v3907_v48 = vld [vmem:[%s5975_s0 + $0x78] ss:$28 sps:$4 sm:$0xff]   ;;  %v3908_v49 = vld [vmem:[%s5975_s0 + $0xac] ss:$28 sps:$4 sm:$0xff]  }
  0x11   :  { %v3921_v46 = vld [vmem:[%s5974_s1 + $0x118] sm:$0xff]   ;;  %v3910_v50 = vld [vmem:[%s5975_s0 + $0xb4] ss:$28 sps:$4 sm:$0xff]   ;;  %v3934_v51 = vld [vmem:[%s5974_s1 + $0x120] sm:$0xff]  }
  0x12   :  { %1887 = vmatpush1.bf16.msra.mxu1 %v3864_v9  ;;  %v3941_v52 = vld [vmem:[%s5974_s1 + $0x128] sm:$0xff]   ;;  %v3915_v55 = vld [vmem:[%s5975_s0 + $0xe4] ss:$28 sps:$4 sm:$0xff]   ;;  %v3954_v57 = vld [vmem:[%s5974_s1 + $0x130] sm:$0xff]  }
  0x13   :  { %2176 = vmatpush1.bf16.msra.mxu0 %v4433_v10  ;;  %1888 = vmatprep.subr.bf16.mxu1 %v4361_v0  ;;  %v3912_v53 = vld [vmem:[%s5975_s0 + $0xa8] ss:$28 sps:$4 sm:$0xff]   ;;  %v3913_v54 = vld [vmem:[%s5975_s0 + $0xb0] ss:$28 sps:$4 sm:$0xff]   ;;  %v3961_v58 = vld [vmem:[%s5974_s1 + $0x138] sm:$0xff]  }
  0x14   :  { %2177 = vmatprep.subr.bf16.mxu0 %v4361_v0  ;;  %v3917_v56 = vld [vmem:[%s5975_s0 + $0xec] ss:$28 sps:$4 sm:$0xff]   ;;  %v3919_v59 = vld [vmem:[%s5975_s0 + $0xe0] ss:$28 sps:$4 sm:$0xff]   ;;  %v3933_v9 = vld [vmem:[%s5975_s0 + $0x158] ss:$28 sps:$4 sm:$0xff]  }
  0x15   :  { %v3920_v60 = vld [vmem:[%s5975_s0 + $0xe8] ss:$28 sps:$4 sm:$0xff]   ;;  %v3922_v61 = vld [vmem:[%s5975_s0 + $0x11c] ss:$28 sps:$4 sm:$0xff]   ;;  %v3932_v7 = vld [vmem:[%s5975_s0 + $0x150] ss:$28 sps:$4 sm:$0xff]  }
  0x16   :  { %1889 = vmatpush1.bf16.msra.mxu1 %v3866_v11  ;;  %v3924_v62 = vld [vmem:[%s5975_s0 + $0x124] ss:$28 sps:$4 sm:$0xff]   ;;  %v3981_v1 = vld [vmem:[%s5974_s1 + $0x148] sm:$0xff]   ;;  %v3930_v5 = vld [vmem:[%s5975_s0 + $0x15c] ss:$28 sps:$4 sm:$0xff]  }
  0x17   :  { %2178 = vmatpush1.bf16.msra.mxu0 %v4444_v12  ;;  %1890 = vmatprep.subr.bf16.mxu1 %v4361_v0  ;;  %v3974_v63 = vld [vmem:[%s5974_s1 + $0x140] sm:$0xff]   ;;  %v3937_v11 = vld [vmem:[%s5975_s0 + $0x194] ss:$28 sps:$4 sm:$0xff]  }
  0x18   :  { %2179 = vmatprep.subr.bf16.mxu0 %v4361_v0  ;;  %v3927_v3 = vld [vmem:[%s5975_s0 + $0x120] ss:$28 sps:$4 sm:$0xff]   ;;  %v3947_v21 = vld [vmem:[%s5975_s0 + $0x1c8] ss:$28 sps:$4 sm:$0xff]  }
  0x19   :  { %v3946_v19 = vld [vmem:[%s5975_s0 + $0x1c0] ss:$28 sps:$4 sm:$0xff]  }
  0x1a   :  { %1891 = vmatpush1.bf16.msra.mxu1 %v3868_v13  ;;  %v3939_v13 = vld [vmem:[%s5975_s0 + $0x188] ss:$28 sps:$4 sm:$0xff]  }
  0x1b   :  { %2180 = vmatpush1.bf16.msra.mxu0 %v4455_v14  ;;  %1892 = vmatprep.subr.bf16.mxu1 %v4361_v0 }
  0x1c   :  { %2181 = vmatprep.subr.bf16.mxu0 %v4361_v0 }
  0x1e   :  { %1893 = vmatpush1.bf16.msra.mxu1 %v3870_v15  ;;  %v3940_v15 = vld [vmem:[%s5975_s0 + $0x190] ss:$28 sps:$4 sm:$0xff]  }
  0x1f   :  { %2182 = vmatpush1.bf16.msra.mxu0 %v4466_v16  ;;  %1894 = vmatprep.subr.bf16.mxu1 %v4361_v0 }
  0x20   :  { %2183 = vmatprep.subr.bf16.mxu0 %v4361_v0 }
  0x22   :  { %1895 = vmatpush1.bf16.msra.mxu1 %v3872_v17  ;;  %v3944_v17 = vld [vmem:[%s5975_s0 + $0x1cc] ss:$28 sps:$4 sm:$0xff]  }
  0x23   :  { %2184 = vmatpush1.bf16.msra.mxu0 %v4477_v18  ;;  %1896 = vmatprep.subr.bf16.mxu1 %v4361_v0 }
  0x24   :  { %2185 = vmatprep.subr.bf16.mxu0 %v4361_v0 }
  0x26   :  { %1897 = vmatpush1.bf16.msra.mxu1 %v3874_v20  ;;  %v4041_v20 = vld [vmem:[%s5974_s1 + $0x178] sm:$0xff]  }
  0x27   :  { %2186 = vmatpush1.bf16.msra.mxu0 %v4494_v22  ;;  %1898 = vmatprep.subr.bf16.mxu1 %v4361_v0 }
  0x28   :  { %2187 = vmatprep.subr.bf16.mxu0 %v4361_v0 }
  0x2a   :  { %1899 = vmatpush1.bf16.msra.mxu1 %v3876_v23  ;;  %v3950_v23 = vld [vmem:[%s5975_s0 + $0x204] ss:$28 sps:$4 sm:$0xff]  }
  0x2b   :  { %2188 = vmatpush1.bf16.msra.mxu0 %v4505_v24  ;;  %1900 = vmatprep.subr.bf16.mxu1 %v4361_v0 }
  0x2c   :  { %2189 = vmatprep.subr.bf16.mxu0 %v4361_v0 }
  0x2e   :  { %1901 = vmatpush1.bf16.msra.mxu1 %v3878_v25  ;;  %v3953_v25 = vld [vmem:[%s5975_s0 + $0x200] ss:$28 sps:$4 sm:$0xff]  }
  0x2f   :  { %2190 = vmatpush1.bf16.msra.mxu0 %v4516_v26  ;;  %1902 = vmatprep.subr.bf16.mxu1 %v4361_v0 }
  0x30   :  { %2191 = vmatprep.subr.bf16.mxu0 %v4361_v0 }
  0x32   :  { %1903 = vmatpush1.bf16.msra.mxu1 %v3880_v27  ;;  %v3959_v27 = vld [vmem:[%s5975_s0 + $0x230] ss:$28 sps:$4 sm:$0xff]  }
  0x33   :  { %2192 = vmatpush1.bf16.msra.mxu0 %v4527_v28  ;;  %1904 = vmatprep.subr.bf16.mxu1 %v4361_v0 }
  0x34   :  { %2193 = vmatprep.subr.bf16.mxu0 %v4361_v0 }
  0x36   :  { %1905 = vmatpush1.bf16.msra.mxu1 %v3882_v29  ;;  %v3962_v29 = vld [vmem:[%s5975_s0 + $0x26c] ss:$28 sps:$4 sm:$0xff]  }
  0x37   :  { %2194 = vmatpush1.bf16.msra.mxu0 %v4538_v30  ;;  %1906 = vmatprep.subr.bf16.mxu1 %v4361_v0 }
  0x38   :  { %2195 = vmatprep.subr.bf16.mxu0 %v4361_v0 }
  0x3a   :  { %1907 = vmatpush1.bf16.msra.mxu1 %v3884_v31  ;;  %v3966_v31 = vld [vmem:[%s5975_s0 + $0x268] ss:$28 sps:$4 sm:$0xff]  }
  0x3b   :  { %2196 = vmatpush1.bf16.msra.mxu0 %v4549_v32  ;;  %1908 = vmatprep.subr.bf16.mxu1 %v4361_v0 }
  0x3c   :  { %2197 = vmatprep.subr.bf16.mxu0 %v4361_v0 }
  0x3e   :  { %1909 = vmatpush1.bf16.msra.mxu1 %v3886_v33  ;;  %v3968_v33 = vld [vmem:[%s5975_s0 + $0x2a4] ss:$28 sps:$4 sm:$0xff]  }
  0x3f   :  { %2198 = vmatpush1.bf16.msra.mxu0 %v4560_v34  ;;  %3567 = vmatprep.subr.bf16.mxu1 %v4361_v0 }
  0x40   :  { %2456 = vmatprep.subr.bf16.mxu0 %v4361_v0 }
  0x41   :  { %1911 = vmatmul.mubr.bf16.vlgmr.msra.gmra.mrb[0].mxu1 %v3888_v35  ;;  %v3972_v35 = vld [vmem:[%s5975_s0 + $0x2a0] ss:$28 sps:$4 sm:$0xff]  }
  0x42   :  { %2200 = vmatmul.mubr.bf16.vlgmr.msra.gmra.mrb[0].mxu0 %v3891_v36  ;;  %3583 = vmatpush1.bf16.msra.mxu1 %v4390_v2  ;;  %v3926_v2 = vld [vmem:[%s5975_s0 + $0x118] ss:$28 sps:$4 sm:$0xff]   ;;  %v3973_v36 = vld [vmem:[%s5975_s0 + $0x2a8] ss:$28 sps:$4 sm:$0xff]  }
  0x43   :  { %2457 = vmatpush1.bf16.msra.mxu0 %v3894_v37  ;;  %1918 = vmatprep.mubr.bf16.mxu1 %v3895_v38  ;;  %v3975_v37 = vld [vmem:[%s5975_s0 + $0x2dc] ss:$28 sps:$4 sm:$0xff]   ;;  %v3977_v38 = vld [vmem:[%s5975_s0 + $0x2e4] ss:$28 sps:$4 sm:$0xff]  }
  0x44   :  { %2207 = vmatprep.mubr.bf16.mxu0 %v3897_v39  ;;  %2458 = vmatprep.subr.bf16.mxu0 %v4361_v0  ;;  %v3979_v39 = vld [vmem:[%s5975_s0 + $0x2d8] ss:$28 sps:$4 sm:$0xff]  }
  0x45   :  { %3568 = vmatprep.subr.bf16.mxu1 %v4361_v0 }
  0x46   :  { %3584 = vmatpush1.bf16.msra.mxu1 %v4400_v4  ;;  %v3928_v4 = vld [vmem:[%s5975_s0 + $0x154] ss:$28 sps:$4 sm:$0xff]  }
  0x47   :  { %2459 = vmatpush1.bf16.msra.mxu0 %v3901_v40  ;;  %3569 = vmatprep.subr.bf16.mxu1 %v4361_v0  ;;  %v3980_v40 = vld [vmem:[%s5975_s0 + $0x2e0] ss:$28 sps:$4 sm:$0xff]  }
  0x48   :  { %2460 = vmatprep.subr.bf16.mxu0 %v4361_v0 }
  0x49   :  { %1919 = vmatmul.mubr.bf16.gmra.mrb[4].mxu1 %v3899_v41  ;;  %v3982_v41 = vld [vmem:[%s5975_s0 + $0x314] ss:$28 sps:$4 sm:$0xff]  }
  0x4a   :  { %2208 = vmatmul.mubr.bf16.gmra.mrb[4].mxu0 %v3900_v42  ;;  %1926 = vmatprep.mubr.bf16.mxu1 %v3902_v43  ;;  %v3984_v42 = vld [vmem:[%s5975_s0 + $0x31c] ss:$28 sps:$4 sm:$0xff]   ;;  %v3986_v43 = vld [vmem:[%s5975_s0 + $0x310] ss:$28 sps:$4 sm:$0xff]  }
  0x4b   :  { %2215 = vmatprep.mubr.bf16.mxu0 %v3904_v44  ;;  %2461 = vmatpush1.bf16.msra.mxu0 %v3914_v45  ;;  %v3987_v44 = vld [vmem:[%s5975_s0 + $0x318] ss:$28 sps:$4 sm:$0xff]   ;;  %v3988_v45 = vld [vmem:[%s5975_s0 + $0x34c] ss:$28 sps:$4 sm:$0xff]  }
  0x4c   :  { %3585 = vmatpush1.bf16.msra.mxu1 %v4411_v6  ;;  %2462 = vmatprep.subr.bf16.mxu0 %v4361_v0  ;;  %v3994_v6 = vld [vmem:[%s5974_s1 + $0x150] sm:$0xff]  }
  0x4d   :  { %3570 = vmatprep.subr.bf16.mxu1 %v4361_v0 }
  0x4f   :  { %2463 = vmatpush1.bf16.msra.mxu0 %v3921_v46  ;;  %v3990_v46 = vld [vmem:[%s5975_s0 + $0x354] ss:$28 sps:$4 sm:$0xff]  }
  0x50   :  { %2464 = vmatprep.subr.bf16.mxu0 %v4361_v0  ;;  %3586 = vmatpush1.bf16.msra.mxu1 %v4422_v8  ;;  %v4001_v8 = vld [vmem:[%s5974_s1 + $0x158] sm:$0xff]  }
  0x51   :  { %1927 = vmatmul.mubr.bf16.gmra.mrb[8].mxu1 %v3906_v47  ;;  %3571 = vmatprep.subr.bf16.mxu1 %v4361_v0  ;;  %v3992_v47 = vld [vmem:[%s5975_s0 + $0x348] ss:$28 sps:$4 sm:$0xff]  }
  0x52   :  { %2216 = vmatmul.mubr.bf16.gmra.mrb[8].mxu0 %v3907_v48  ;;  %1934 = vmatprep.mubr.bf16.mxu1 %v3908_v49  ;;  %v3993_v48 = vld [vmem:[%s5975_s0 + $0x350] ss:$28 sps:$4 sm:$0xff]   ;;  %v3995_v49 = vld [vmem:[%s5975_s0 + $0x384] ss:$28 sps:$4 sm:$0xff]  }
  0x53   :  { %2223 = vmatprep.mubr.bf16.mxu0 %v3910_v50  ;;  %2465 = vmatpush1.bf16.msra.mxu0 %v3934_v51  ;;  %v3997_v50 = vld [vmem:[%s5975_s0 + $0x38c] ss:$28 sps:$4 sm:$0xff]   ;;  %v3999_v51 = vld [vmem:[%s5975_s0 + $0x380] ss:$28 sps:$4 sm:$0xff]  }
  0x54   :  { %2466 = vmatprep.subr.bf16.mxu0 %v4361_v0  ;;  %3587 = vmatpush1.bf16.msra.mxu1 %v4433_v10  ;;  %v3935_v10 = vld [vmem:[%s5975_s0 + $0x18c] ss:$28 sps:$4 sm:$0xff]  }
  0x55   :  { %3572 = vmatprep.subr.bf16.mxu1 %v4361_v0 }
  0x57   :  { %2467 = vmatpush1.bf16.msra.mxu0 %v3941_v52  ;;  %v4000_v52 = vld [vmem:[%s5975_s0 + $0x388] ss:$28 sps:$4 sm:$0xff]  }
  0x58   :  { %2468 = vmatprep.subr.bf16.mxu0 %v4361_v0  ;;  %3588 = vmatpush1.bf16.msra.mxu1 %v4444_v12  ;;  %v4014_v12 = vld [vmem:[%s5974_s1 + $0x160] sm:$0xff]  }
  0x59   :  { %1935 = vmatmul.mubr.bf16.gmra.mrb[12].mxu1 %v3912_v53  ;;  %3573 = vmatprep.subr.bf16.mxu1 %v4361_v0  ;;  %v4002_v53 = vld [vmem:[%s5975_s0 + $0x3bc] ss:$28 sps:$4 sm:$0xff]  }
  0x5a   :  { %2224 = vmatmul.mubr.bf16.gmra.mrb[12].mxu0 %v3913_v54  ;;  %1942 = vmatprep.mubr.bf16.mxu1 %v3915_v55  ;;  %v4004_v54 = vld [vmem:[%s5975_s0 + $0x3c4] ss:$28 sps:$4 sm:$0xff]  }
  0x5b   :  { %2231 = vmatprep.mubr.bf16.mxu0 %v3917_v56  ;;  %2469 = vmatpush1.bf16.msra.mxu0 %v3954_v57  ;;  %v4867_v55 = vld [vmem:[%s5974_s1 + $0x180] sm:$0xff]   ;;  %v4006_v56 = vld [vmem:[%s5975_s0 + $0x3b8] ss:$28 sps:$4 sm:$0xff]  }
  0x5c   :  { %2470 = vmatprep.subr.bf16.mxu0 %v4361_v0  ;;  %3589 = vmatpush1.bf16.msra.mxu1 %v4455_v14  ;;  %v4021_v14 = vld [vmem:[%s5974_s1 + $0x168] sm:$0xff]   ;;  %v4007_v57 = vld [vmem:[%s5975_s0 + $0x3c0] ss:$28 sps:$4 sm:$0xff]  }
  0x5d   :  { %3574 = vmatprep.subr.bf16.mxu1 %v4361_v0 }
  0x5f   :  { %2471 = vmatpush1.bf16.msra.mxu0 %v3961_v58  ;;  %v4008_v58 = vld [vmem:[%s5975_s0 + $0x3f4] ss:$28 sps:$4 sm:$0xff]  }
  0x60   :  { %2472 = vmatprep.subr.bf16.mxu0 %v4361_v0  ;;  %3590 = vmatpush1.bf16.msra.mxu1 %v4466_v16  ;;  %v3942_v16 = vld [vmem:[%s5975_s0 + $0x1c4] ss:$28 sps:$4 sm:$0xff]  }
  0x61   :  { %1943 = vmatmul.mubr.bf16.gmra.mrb[16].mxu1 %v3919_v59  ;;  %3575 = vmatprep.subr.bf16.mxu1 %v4361_v0  ;;  %v4010_v59 = vld [vmem:[%s5975_s0 + $0x3fc] ss:$28 sps:$4 sm:$0xff]  }
  0x62   :  { %2232 = vmatmul.mubr.bf16.gmra.mrb[16].mxu0 %v3920_v60  ;;  %1950 = vmatprep.mubr.bf16.mxu1 %v3922_v61  ;;  %v4012_v60 = vld [vmem:[%s5975_s0 + $0x3f0] ss:$28 sps:$4 sm:$0xff]   ;;  %v4013_v61 = vld [vmem:[%s5975_s0 + $0x3f8] ss:$28 sps:$4 sm:$0xff]  }
  0x63   :  { %2239 = vmatprep.mubr.bf16.mxu0 %v3924_v62  ;;  %2473 = vmatpush1.bf16.msra.mxu0 %v3974_v63  ;;  %v4015_v62 = vld [vmem:[%s5975_s0 + $0x42c] ss:$28 sps:$4 sm:$0xff]   ;;  %v4017_v63 = vld [vmem:[%s5975_s0 + $0x434] ss:$28 sps:$4 sm:$0xff]  }
  0x64   :  { %2474 = vmatprep.subr.bf16.mxu0 %v4361_v0  ;;  %3591 = vmatpush1.bf16.msra.mxu1 %v4477_v18  ;;  %v4034_v18 = vld [vmem:[%s5974_s1 + $0x170] sm:$0xff]  }
  0x65   :  { %3576 = vmatprep.subr.bf16.mxu1 %v4361_v0 }
  0x67   :  { %2475 = vmatpush1.bf16.msra.mxu0 %v3981_v1  ;;  %v4019_v1 = vld [vmem:[%s5975_s0 + $0x428] ss:$28 sps:$4 sm:$0xff]  }
  0x68   :  { %2476 = vmatprep.subr.bf16.mxu0 %v4361_v0  ;;  %3592 = vmatpush1.bf16.msra.mxu1 %v4494_v22  ;;  %v3948_v22 = vld [vmem:[%s5975_s0 + $0x1fc] ss:$28 sps:$4 sm:$0xff]  }
  0x69   :  { %1951 = vmatmul.mubr.bf16.gmra.mrb[20].mxu1 %v3926_v2  ;;  %3577 = vmatprep.subr.bf16.mxu1 %v4361_v0  ;;  %v4020_v2 = vld [vmem:[%s5975_s0 + $0x430] ss:$28 sps:$4 sm:$0xff]  }
  0x6a   :  { %2240 = vmatmul.mubr.bf16.gmra.mrb[20].mxu0 %v3927_v3  ;;  %1958 = vmatprep.mubr.bf16.mxu1 %v3928_v4  ;;  %v4022_v3 = vld [vmem:[%s5975_s0 + $0x464] ss:$28 sps:$4 sm:$0xff]   ;;  %v4024_v4 = vld [vmem:[%s5975_s0 + $0x46c] ss:$28 sps:$4 sm:$0xff]  }
  0x6b   :  { %2247 = vmatprep.mubr.bf16.mxu0 %v3930_v5  ;;  %2477 = vmatpush1.bf16.msra.mxu0 %v3994_v6  ;;  %v4026_v5 = vld [vmem:[%s5975_s0 + $0x460] ss:$28 sps:$4 sm:$0xff]   ;;  %v4027_v6 = vld [vmem:[%s5975_s0 + $0x468] ss:$28 sps:$4 sm:$0xff]  }
  0x6c   :  { %2478 = vmatprep.subr.bf16.mxu0 %v4361_v0  ;;  %3593 = vmatpush1.bf16.msra.mxu1 %v4505_v24  ;;  %v3952_v24 = vld [vmem:[%s5975_s0 + $0x1f8] ss:$28 sps:$4 sm:$0xff]  }
  0x6d   :  { %3578 = vmatprep.subr.bf16.mxu1 %v4361_v0 }
  0x6f   :  { %2479 = vmatpush1.bf16.msra.mxu0 %v4001_v8  ;;  %v4030_v8 = vld [vmem:[%s5975_s0 + $0x4a4] ss:$28 sps:$4 sm:$0xff]  }
  0x70   :  { %2480 = vmatprep.subr.bf16.mxu0 %v4361_v0  ;;  %3594 = vmatpush1.bf16.msra.mxu1 %v4516_v26  ;;  %v3955_v26 = vld [vmem:[%s5975_s0 + $0x234] ss:$28 sps:$4 sm:$0xff]  }
  0x71   :  { %1959 = vmatmul.mubr.bf16.gmra.mrb[24].mxu1 %v3932_v7  ;;  %3579 = vmatprep.subr.bf16.mxu1 %v4361_v0  ;;  %v4028_v7 = vld [vmem:[%s5975_s0 + $0x49c] ss:$28 sps:$4 sm:$0xff]  }
  0x72   :  { %2248 = vmatmul.mubr.bf16.gmra.mrb[24].mxu0 %v3933_v9  ;;  %1966 = vmatprep.mubr.bf16.mxu1 %v3935_v10  ;;  %v4032_v9 = vld [vmem:[%s5975_s0 + $0x498] ss:$28 sps:$4 sm:$0xff]   ;;  %v4033_v10 = vld [vmem:[%s5975_s0 + $0x4a0] ss:$28 sps:$4 sm:$0xff]  }
  0x73   :  { %2255 = vmatprep.mubr.bf16.mxu0 %v3937_v11  ;;  %2481 = vmatpush1.bf16.msra.mxu0 %v4014_v12  ;;  %v4035_v11 = vld [vmem:[%s5975_s0 + $0x4d4] ss:$28 sps:$4 sm:$0xff]   ;;  %v4037_v12 = vld [vmem:[%s5975_s0 + $0x4dc] ss:$28 sps:$4 sm:$0xff]  }
  0x74   :  { %2482 = vmatprep.subr.bf16.mxu0 %v4361_v0  ;;  %3595 = vmatpush1.bf16.msra.mxu1 %v4527_v28  ;;  %v3960_v28 = vld [vmem:[%s5975_s0 + $0x238] ss:$28 sps:$4 sm:$0xff]  }
  0x75   :  { %3580 = vmatprep.subr.bf16.mxu1 %v4361_v0 }
  0x77   :  { %2483 = vmatpush1.bf16.msra.mxu0 %v4021_v14  ;;  %v4040_v14 = vld [vmem:[%s5975_s0 + $0x4d8] ss:$28 sps:$4 sm:$0xff]  }
  0x78   :  { %2484 = vmatprep.subr.bf16.mxu0 %v4361_v0  ;;  %3596 = vmatpush1.bf16.msra.mxu1 %v4538_v30  ;;  %v3964_v30 = vld [vmem:[%s5975_s0 + $0x274] ss:$28 sps:$4 sm:$0xff]  }
  0x79   :  { %1967 = vmatmul.mubr.bf16.gmra.mrb[28].mxu1 %v3939_v13  ;;  %3581 = vmatprep.subr.bf16.mxu1 %v4361_v0  ;;  %v4039_v13 = vld [vmem:[%s5975_s0 + $0x4d0] ss:$28 sps:$4 sm:$0xff]  }
  0x7a   :  { %2256 = vmatmul.mubr.bf16.gmra.mrb[28].mxu0 %v3940_v15  ;;  %1974 = vmatprep.mubr.bf16.mxu1 %v3942_v16  ;;  %v4042_v15 = vld [vmem:[%s5975_s0 + $0x50c] ss:$28 sps:$4 sm:$0xff]   ;;  %v4044_v16 = vld [vmem:[%s5975_s0 + $0x514] ss:$28 sps:$4 sm:$0xff]  }
  0x7b   :  { %2263 = vmatprep.mubr.bf16.mxu0 %v3944_v17  ;;  %2485 = vmatpush1.bf16.msra.mxu0 %v4034_v18  ;;  %v4046_v17 = vld [vmem:[%s5975_s0 + $0x508] ss:$28 sps:$4 sm:$0xff]   ;;  %v4047_v18 = vld [vmem:[%s5975_s0 + $0x510] ss:$28 sps:$4 sm:$0xff]  }
  0x7c   :  { %2486 = vmatprep.subr.bf16.mxu0 %v4361_v0  ;;  %3597 = vmatpush1.bf16.msra.mxu1 %v4549_v32  ;;  %v3967_v32 = vld [vmem:[%s5975_s0 + $0x270] ss:$28 sps:$4 sm:$0xff]  }
  0x7d   :  { %3582 = vmatprep.subr.bf16.mxu1 %v4361_v0  ;;  %v3957_v0 = vld [vmem:[%s5975_s0 + $0x23c] ss:$28 sps:$4 sm:$0xff]  }
  0x7f   :  { %2487 = vmatpush1.bf16.msra.mxu0 %v4041_v20  ;;  %v4052_v20 = vld [vmem:[%s5975_s0 + $0x14] ss:$28 sps:$4 sm:$0xff]  }
  0x80   :  { %3598 = vmatpush1.bf16.msra.mxu1 %v4560_v34  ;;  %v3970_v34 = vld [vmem:[%s5975_s0 + $0x2ac] ss:$28 sps:$4 sm:$0xff]  }
  0x81   :  { %1975 = vmatmul.mubr.bf16.gmra.mrb[32].mxu1 %v3946_v19  ;;  %3487 = vmatprep.subr.bf16.mxu1 %v4867_v55  ;;  %v4048_v19 = vld [vmem:[%s5975_s0 + $0x544] ss:$28 sps:$4 sm:$0xff]  }
  0x82   :  { %2264 = vmatmul.mubr.bf16.gmra.mrb[32].mxu0 %v3947_v21  ;;  %1982 = vmatprep.mubr.bf16.mxu1 %v3948_v22  ;;  %v4053_v21 = vld [vmem:[%s5975_s0 + $0x540] ss:$28 sps:$4 sm:$0xff]   ;;  %v4050_v22 = vld [vmem:[%s5975_s0 + $0x10] ss:$28 sps:$4 sm:$0xff]  }
  0x83   :  { %2271 = vmatprep.mubr.bf16.mxu0 %v3950_v23  ;;  %v4054_v23 = vld [vmem:[%s5975_s0 + $0x57c] ss:$28 sps:$4 sm:$0xff]  }
  0x89   :  { %1983 = vmatmul.mubr.bf16.gmra.mrb[36].mxu1 %v3952_v24  ;;  %v4056_v24 = vld [vmem:[%s5975_s0 + $0x4c] ss:$28 sps:$4 sm:$0xff]  }
  0x8a   :  { %2272 = vmatmul.mubr.bf16.gmra.mrb[36].mxu0 %v3953_v25  ;;  %1990 = vmatprep.mubr.bf16.mxu1 %v3955_v26  ;;  %v4058_v25 = vld [vmem:[%s5975_s0 + $0x578] ss:$28 sps:$4 sm:$0xff]   ;;  %v4059_v26 = vld [vmem:[%s5975_s0 + $0x48] ss:$28 sps:$4 sm:$0xff]  }
  0x8b   :  { %2279 = vmatprep.mubr.bf16.mxu0 %v3957_v0  ;;  %v4060_v0 = vld [vmem:[%s5975_s0 + $0x5b4] ss:$28 sps:$4 sm:$0xff]  }
  0x91   :  { %1991 = vmatmul.mubr.bf16.gmra.mrb[40].mxu1 %v3959_v27  ;;  %v4062_v27 = vld [vmem:[%s5975_s0 + $0x84] ss:$28 sps:$4 sm:$0xff]  }
  0x92   :  { %2280 = vmatmul.mubr.bf16.gmra.mrb[40].mxu0 %v3960_v28  ;;  %1998 = vmatprep.mubr.bf16.mxu1 %v3962_v29  ;;  %v4064_v28 = vld [vmem:[%s5975_s0 + $0x5b0] ss:$28 sps:$4 sm:$0xff]   ;;  %v4065_v29 = vld [vmem:[%s5975_s0 + $0x80] ss:$28 sps:$4 sm:$0xff]  }
  0x93   :  { %2287 = vmatprep.mubr.bf16.mxu0 %v3964_v30  ;;  %v4066_v30 = vld [vmem:[%s5975_s0 + $0x5ec] ss:$28 sps:$4 sm:$0xff]  }
  0x99   :  { %1999 = vmatmul.mubr.bf16.gmra.mrb[44].mxu1 %v3966_v31  ;;  %v4068_v31 = vld [vmem:[%s5975_s0 + $0xbc] ss:$28 sps:$4 sm:$0xff]  }
  0x9a   :  { %2288 = vmatmul.mubr.bf16.gmra.mrb[44].mxu0 %v3967_v32  ;;  %2006 = vmatprep.mubr.bf16.mxu1 %v3968_v33 }
  0x9b   :  { %2295 = vmatprep.mubr.bf16.mxu0 %v3970_v34  ;;  %v4070_v34 = vld [vmem:[%s5975_s0 + $0x5e8] ss:$28 sps:$4 sm:$0xff]  }
  0xa1   :  { %2007 = vmatmul.mubr.bf16.gmra.mrb[48].mxu1 %v3972_v35 }
  0xa2   :  { %2296 = vmatmul.mubr.bf16.gmra.mrb[48].mxu0 %v3973_v36  ;;  %2014 = vmatprep.mubr.bf16.mxu1 %v3975_v37  ;;  %v4071_v36 = vld [vmem:[%s5975_s0 + $0xb8] ss:$28 sps:$4 sm:$0xff]   ;;  %v4072_v37 = vld [vmem:[%s5975_s0 + $0x624] ss:$28 sps:$4 sm:$0xff]  }
  0xa3   :  { %2303 = vmatprep.mubr.bf16.mxu0 %v3977_v38 }
  0xa9   :  { %2015 = vmatmul.mubr.bf16.gmra.mrb[52].mxu1 %v3979_v39  ;;  %v4074_v39 = vld [vmem:[%s5975_s0 + $0xf4] ss:$28 sps:$4 sm:$0xff]  }
  0xaa   :  { %2304 = vmatmul.mubr.bf16.gmra.mrb[52].mxu0 %v3980_v40  ;;  %2022 = vmatprep.mubr.bf16.mxu1 %v3982_v41 }
  0xab   :  { %2311 = vmatprep.mubr.bf16.mxu0 %v3984_v42  ;;  %v4076_v42 = vld [vmem:[%s5975_s0 + $0x620] ss:$28 sps:$4 sm:$0xff]  }
  0xb1   :  { %2023 = vmatmul.mubr.bf16.gmra.mrb[56].mxu1 %v3986_v43 }
  0xb2   :  { %2312 = vmatmul.mubr.bf16.gmra.mrb[56].mxu0 %v3987_v44  ;;  %2030 = vmatprep.mubr.bf16.mxu1 %v3988_v45  ;;  %v4077_v44 = vld [vmem:[%s5975_s0 + $0xf0] ss:$28 sps:$4 sm:$0xff]   ;;  %v4078_v45 = vld [vmem:[%s5975_s0 + $0x65c] ss:$28 sps:$4 sm:$0xff]  }
  0xb3   :  { %2319 = vmatprep.mubr.bf16.mxu0 %v3990_v46 }
  0xb9   :  { %2031 = vmatmul.mubr.bf16.gmra.mrb[60].mxu1 %v3992_v47  ;;  %v4080_v47 = vld [vmem:[%s5975_s0 + $0x12c] ss:$28 sps:$4 sm:$0xff]  }
  0xba   :  { %2320 = vmatmul.mubr.bf16.gmra.mrb[60].mxu0 %v3993_v48  ;;  %2038 = vmatprep.mubr.bf16.mxu1 %v3995_v49 }
  0xbb   :  { %2327 = vmatprep.mubr.bf16.mxu0 %v3997_v50  ;;  %v4082_v50 = vld [vmem:[%s5975_s0 + $0x658] ss:$28 sps:$4 sm:$0xff]  }
  0xc1   :  { %2039 = vmatmul.mubr.bf16.gmra.mrb[64].mxu1 %v3999_v51 }
  0xc2   :  { %2328 = vmatmul.mubr.bf16.gmra.mrb[64].mxu0 %v4000_v52  ;;  %2046 = vmatprep.mubr.bf16.mxu1 %v4002_v53  ;;  %v4083_v52 = vld [vmem:[%s5975_s0 + $0x128] ss:$28 sps:$4 sm:$0xff]   ;;  %v4084_v53 = vld [vmem:[%s5975_s0 + $0x694] ss:$28 sps:$4 sm:$0xff]  }
  0xc3   :  { %2335 = vmatprep.mubr.bf16.mxu0 %v4004_v54 }
  0xc9   :  { %2047 = vmatmul.mubr.bf16.gmra.mrb[68].mxu1 %v4006_v56  ;;  %v4086_v56 = vld [vmem:[%s5975_s0 + $0x164] ss:$28 sps:$4 sm:$0xff]  }
  0xca   :  { %2336 = vmatmul.mubr.bf16.gmra.mrb[68].mxu0 %v4007_v57  ;;  %2054 = vmatprep.mubr.bf16.mxu1 %v4008_v58 }
  0xcb   :  { %2343 = vmatprep.mubr.bf16.mxu0 %v4010_v59  ;;  %v4088_v59 = vld [vmem:[%s5975_s0 + $0x690] ss:$28 sps:$4 sm:$0xff]  }
  0xd1   :  { %2055 = vmatmul.mubr.bf16.gmra.mrb[72].mxu1 %v4012_v60 }
  0xd2   :  { %2344 = vmatmul.mubr.bf16.gmra.mrb[72].mxu0 %v4013_v61  ;;  %2062 = vmatprep.mubr.bf16.mxu1 %v4015_v62  ;;  %v4089_v61 = vld [vmem:[%s5975_s0 + $0x160] ss:$28 sps:$4 sm:$0xff]   ;;  %v4090_v62 = vld [vmem:[%s5975_s0 + $0x6cc] ss:$28 sps:$4 sm:$0xff]  }
  0xd3   :  { %2351 = vmatprep.mubr.bf16.mxu0 %v4017_v63 }
  0xd9   :  { %2063 = vmatmul.mubr.bf16.gmra.mrb[76].mxu1 %v4019_v1  ;;  %v4092_v1 = vld [vmem:[%s5975_s0 + $0x19c] ss:$28 sps:$4 sm:$0xff]  }
  0xda   :  { %2352 = vmatmul.mubr.bf16.gmra.mrb[76].mxu0 %v4020_v2  ;;  %2070 = vmatprep.mubr.bf16.mxu1 %v4022_v3 }
  0xdb   :  { %2359 = vmatprep.mubr.bf16.mxu0 %v4024_v4  ;;  %v4094_v4 = vld [vmem:[%s5975_s0 + $0x6c8] ss:$28 sps:$4 sm:$0xff]  }
  0xe1   :  { %2071 = vmatmul.mubr.bf16.gmra.mrb[80].mxu1 %v4026_v5 }
  0xe2   :  { %2360 = vmatmul.mubr.bf16.gmra.mrb[80].mxu0 %v4027_v6  ;;  %2078 = vmatprep.mubr.bf16.mxu1 %v4028_v7  ;;  %v4095_v6 = vld [vmem:[%s5975_s0 + $0x198] ss:$28 sps:$4 sm:$0xff]   ;;  %v4098_v7 = vld [vmem:[%s5975_s0 + $0x54c] ss:$28 sps:$4 sm:$0xff]  }
  0xe3   :  { %2367 = vmatprep.mubr.bf16.mxu0 %v4030_v8 }
  0xe9   :  { %2079 = vmatmul.mubr.bf16.gmra.mrb[84].mxu1 %v4032_v9  ;;  %v4099_v9 = vld [vmem:[%s5975_s0 + $0x1d4] ss:$28 sps:$4 sm:$0xff]  }
  0xea   :  { %2368 = vmatmul.mubr.bf16.gmra.mrb[84].mxu0 %v4033_v10  ;;  %2086 = vmatprep.mubr.bf16.mxu1 %v4035_v11 }
  0xeb   :  { %2375 = vmatprep.mubr.bf16.mxu0 %v4037_v12  ;;  %v4096_v12 = vld [vmem:[%s5975_s0 + $0x548] ss:$28 sps:$4 sm:$0xff]  }
  0xf1   :  { %2087 = vmatmul.mubr.bf16.gmra.mrb[88].mxu1 %v4039_v13 }
  0xf2   :  { %2376 = vmatmul.mubr.bf16.gmra.mrb[88].mxu0 %v4040_v14  ;;  %2094 = vmatprep.mubr.bf16.mxu1 %v4042_v15  ;;  %v4101_v14 = vld [vmem:[%s5975_s0 + $0x1d0] ss:$28 sps:$4 sm:$0xff]  }
  0xf3   :  { %2383 = vmatprep.mubr.bf16.mxu0 %v4044_v16  ;;  %v4103_v16 = vld [vmem:[%s5975_s0 + $0x584] ss:$28 sps:$4 sm:$0xff]  }
  0xf9   :  { %2095 = vmatmul.mubr.bf16.gmra.mrb[92].mxu1 %v4046_v17  ;;  %v4105_v17 = vld [vmem:[%s5975_s0 + $0x20c] ss:$28 sps:$4 sm:$0xff]  }
  0xfa   :  { %2384 = vmatmul.mubr.bf16.gmra.mrb[92].mxu0 %v4047_v18  ;;  %2102 = vmatprep.mubr.bf16.mxu1 %v4048_v19  ;;  %v4109_v18 = vld [vmem:[%s5974_s1 + $0x188] sm:$0xff]   ;;  %v4116_v19 = vld [vmem:[%s5974_s1 + $0x190] sm:$0xff]  }
  0xfb   :  { %2488 = vmatprep.mubr.bf16.mxu0 %v4052_v20 }
 0x101   :  { %2103 = vmatmul.mubr.bf16.gmra.mrb[96].mxu1 %v4053_v21 }
 0x102   :  { %2489 = vmatmul.mubr.bf16.vlgmr.msra.gmra.mrb[0].mxu0 %v4050_v22  ;;  %2110 = vmatprep.mubr.bf16.mxu1 %v4054_v23  ;;  %v4107_v22 = vld [vmem:[%s5975_s0 + $0x580] ss:$28 sps:$4 sm:$0xff]  }
 0x103   :  { %2496 = vmatprep.mubr.bf16.mxu0 %v4056_v24  ;;  %v4110_v24 = vld [vmem:[%s5975_s0 + $0x5bc] ss:$28 sps:$4 sm:$0xff]  }
 0x109   :  { %2111 = vmatmul.mubr.bf16.gmra.mrb[100].mxu1 %v4058_v25 }
 0x10a   :  { %2497 = vmatmul.mubr.bf16.gmra.mrb[4].mxu0 %v4059_v26  ;;  %2118 = vmatprep.mubr.bf16.mxu1 %v4060_v0  ;;  %v4112_v26 = vld [vmem:[%s5975_s0 + $0x244] ss:$28 sps:$4 sm:$0xff]   ;;  %v4123_v0 = vld [vmem:[%s5974_s1 + $0x198] sm:$0xff]  }
 0x10b   :  { %2504 = vmatprep.mubr.bf16.mxu0 %v4062_v27 }
 0x111   :  { %2119 = vmatmul.mubr.bf16.gmra.mrb[104].mxu1 %v4064_v28  ;;  %v4130_v28 = vld [vmem:[%s5974_s1 + $0x1a0] sm:$0xff]  }
 0x112   :  { %2505 = vmatmul.mubr.bf16.gmra.mrb[8].mxu0 %v4065_v29  ;;  %2126 = vmatprep.mubr.bf16.mxu1 %v4066_v30  ;;  %v4114_v30 = vld [vmem:[%s5975_s0 + $0x5b8] ss:$28 sps:$4 sm:$0xff]  }
 0x113   :  { %2512 = vmatprep.mubr.bf16.mxu0 %v4068_v31 }
 0x114   :  { %v4990_v32 = vpop.f32.mrb[0].mxu1 }
 0x115   :  { %v1914_v33 = vpop.f32.mrb[1].mxu1 }
 0x116   :  { %v4995_v35 = vpop.f32.mrb[2].mxu1  ;;  %v4115_v33 = vld [vmem:[%s5975_s0 + $0x240] ss:$28 sps:$4 sm:$0xff]  }
 0x117   :  { %v1917_v38 = vpop.f32.mrb[3].mxu1 }
 0x118   :  { %v4137_v38 = vld [vmem:[%s5974_s1 + $0x1a8] sm:$0xff]  }
 0x119   :  { %2127 = vmatmul.mubr.bf16.gmra.mrb[108].mxu1 %v4070_v34  ;;  %v4117_v34 = vld [vmem:[%s5975_s0 + $0x5f4] ss:$28 sps:$4 sm:$0xff]  }
 0x11a   :  { %2513 = vmatmul.mubr.bf16.gmra.mrb[12].mxu0 %v4071_v36  ;;  %2134 = vmatprep.mubr.bf16.mxu1 %v4072_v37  ;;  %v4119_v37 = vld [vmem:[%s5975_s0 + $0x27c] ss:$28 sps:$4 sm:$0xff]  }
 0x11b   :  { %2520 = vmatprep.mubr.bf16.mxu0 %v4074_v39 }
 0x11c   :  { %v5006_v40 = vpop.f32.mrb[4].mxu1 }
 0x11d   :  { %v1922_v41 = vpop.f32.mrb[5].mxu1 }
 0x11e   :  { %v5011_v43 = vpop.f32.mrb[6].mxu1  ;;  %v4144_v41 = vld [vmem:[%s5974_s1 + $0x1b0] sm:$0xff]  }
 0x11f   :  { %v1925_v46 = vpop.f32.mrb[7].mxu1 }
 0x120   :  { %v4122_v46 = vld [vmem:[%s5975_s0 + $0x278] ss:$28 sps:$4 sm:$0xff]  }
 0x121   :  { %2135 = vmatmul.mubr.bf16.gmra.mrb[112].mxu1 %v4076_v42 }
 0x122   :  { %2521 = vmatmul.mubr.bf16.gmra.mrb[16].mxu0 %v4077_v44  ;;  %2142 = vmatprep.mubr.bf16.mxu1 %v4078_v45  ;;  %v4121_v44 = vld [vmem:[%s5975_s0 + $0x5f0] ss:$28 sps:$4 sm:$0xff]  }
 0x123   :  { %2528 = vmatprep.mubr.bf16.mxu0 %v4080_v47  ;;  %v4124_v47 = vld [vmem:[%s5975_s0 + $0x62c] ss:$28 sps:$4 sm:$0xff]  }
 0x124   :  { %v5022_v48 = vpop.f32.mrb[8].mxu1 }
 0x125   :  { %v1930_v49 = vpop.f32.mrb[9].mxu1 }
 0x126   :  { %v5027_v51 = vpop.f32.mrb[10].mxu1 }
 0x127   :  { %v1933_v54 = vpop.f32.mrb[11].mxu1 }
 0x129   :  { %2143 = vmatmul.mubr.bf16.gmra.mrb[116].mxu1 %v4082_v50  ;;  %v4126_v50 = vld [vmem:[%s5975_s0 + $0x2b4] ss:$28 sps:$4 sm:$0xff]  }
 0x12a   :  { %2529 = vmatmul.mubr.bf16.gmra.mrb[20].mxu0 %v4083_v52  ;;  %2150 = vmatprep.mubr.bf16.mxu1 %v4084_v53  ;;  %v4151_v52 = vld [vmem:[%s5974_s1 + $0x1b8] sm:$0xff]  }
 0x12b   :  { %2536 = vmatprep.mubr.bf16.mxu0 %v4086_v56  ;;  %v4128_v56 = vld [vmem:[%s5975_s0 + $0x628] ss:$28 sps:$4 sm:$0xff]  }
 0x12c   :  { %v5038_v57 = vpop.f32.mrb[12].mxu1 }
 0x12d   :  { %v1938_v58 = vpop.f32.mrb[13].mxu1 }
 0x12e   :  { %v5043_v60 = vpop.f32.mrb[14].mxu1 }
 0x12f   :  { %v1941_v63 = vpop.f32.mrb[15].mxu1 }
 0x130   :  { %v4133_v63 = vld [vmem:[%s5975_s0 + $0x2ec] ss:$28 sps:$4 sm:$0xff]  }
 0x131   :  { %2151 = vmatmul.mubr.bf16.gmra.mrb[120].mxu1 %v4088_v59  ;;  %v4129_v59 = vld [vmem:[%s5975_s0 + $0x2b0] ss:$28 sps:$4 sm:$0xff]  }
 0x132   :  { %2537 = vmatmul.mubr.bf16.gmra.mrb[24].mxu0 %v4089_v61  ;;  %2158 = vmatprep.mubr.bf16.mxu1 %v4090_v62  ;;  %v4131_v61 = vld [vmem:[%s5975_s0 + $0x664] ss:$28 sps:$4 sm:$0xff]  }
 0x133   :  { %2544 = vmatprep.mubr.bf16.mxu0 %v4092_v1 }
 0x134   :  { %v5054_v2 = vpop.f32.mrb[16].mxu1 }
 0x135   :  { %v1946_v3 = vpop.f32.mrb[17].mxu1 }
 0x136   :  { %v5059_v5 = vpop.f32.mrb[18].mxu1 }
 0x137   :  { %v1949_v8 = vpop.f32.mrb[19].mxu1 }
 0x138   :  { %v4138_v8 = vld [vmem:[%s5975_s0 + $0x69c] ss:$28 sps:$4 sm:$0xff]  }
 0x139   :  { %2159 = vmatmul.mubr.bf16.gmra.mrb[124].mxu1 %v4094_v4  ;;  %v4135_v4 = vld [vmem:[%s5975_s0 + $0x660] ss:$28 sps:$4 sm:$0xff]  }
 0x13a   :  { %2545 = vmatmul.mubr.bf16.gmra.mrb[28].mxu0 %v4095_v6  ;;  %2391 = vmatprep.mubr.bf16.mxu1 %v4098_v7  ;;  %v4136_v7 = vld [vmem:[%s5975_s0 + $0x2e8] ss:$28 sps:$4 sm:$0xff]  }
 0x13b   :  { %2552 = vmatprep.mubr.bf16.mxu0 %v4099_v9 }
 0x13c   :  { %v5070_v10 = vpop.f32.mrb[20].mxu1 }
 0x13d   :  { %v1954_v11 = vpop.f32.mrb[21].mxu1 }
 0x13e   :  { %v5075_v13 = vpop.f32.mrb[22].mxu1  ;;  %v4140_v11 = vld [vmem:[%s5975_s0 + $0x324] ss:$28 sps:$4 sm:$0xff]  }
 0x13f   :  { %v1957_v15 = vpop.f32.mrb[23].mxu1 }
 0x140   :  { %v4142_v15 = vld [vmem:[%s5975_s0 + $0x698] ss:$28 sps:$4 sm:$0xff]  }
 0x141   :  { %2392 = vmatmul.mubr.bf16.vlgmr.msra.gmra.mrb[96].mxu1 %v4096_v12 }
 0x142   :  { %2553 = vmatmul.mubr.bf16.gmra.mrb[32].mxu0 %v4101_v14  ;;  %3488 = vmatpush3.bf16.msra.mxu1 %v4867_v55  ;;  %v4108_v55 = vld [vmem:[%s5975_s0 + $0x208] ss:$28 sps:$4 sm:$0xff]  }
 0x143   :  { %2399 = vmatprep.mubr.bf16.mxu1 %v4103_v16  ;;  %2560 = vmatprep.mubr.bf16.mxu0 %v4105_v17  ;;  %v4143_v17 = vld [vmem:[%s5975_s0 + $0x320] ss:$28 sps:$4 sm:$0xff]  }
 0x144   :  { %v5093_v20 = vpop.f32.mrb[24].mxu1  ;;  %3489 = vmatprep.subr.bf16.mxu1 %v4109_v18 }
 0x145   :  { %v1962_v21 = vpop.f32.mrb[25].mxu1 }
 0x146   :  { %v5098_v23 = vpop.f32.mrb[26].mxu1  ;;  %3490 = vmatpush3.bf16.msra.mxu1 %v4109_v18  ;;  %v4145_v18 = vld [vmem:[%s5975_s0 + $0x6d4] ss:$28 sps:$4 sm:$0xff]   ;;  %v4147_v21 = vld [vmem:[%s5975_s0 + $0x35c] ss:$28 sps:$4 sm:$0xff]  }
 0x147   :  { %v1965_v25 = vpop.f32.mrb[27].mxu1  ;;  %3491 = vmatprep.subr.bf16.mxu1 %v4116_v19 }
 0x149   :  { %2400 = vmatmul.mubr.bf16.gmra.mrb[100].mxu1 %v4107_v22 }
 0x14a   :  { %2561 = vmatmul.mubr.bf16.gmra.mrb[36].mxu0 %v4108_v55  ;;  %2407 = vmatprep.mubr.bf16.mxu1 %v4110_v24  ;;  %v4149_v24 = vld [vmem:[%s5975_s0 + $0x6d0] ss:$28 sps:$4 sm:$0xff]  }
 0x14b   :  { %2568 = vmatprep.mubr.bf16.mxu0 %v4112_v26  ;;  %3492 = vmatpush3.bf16.msra.mxu1 %v4116_v19  ;;  %v4150_v26 = vld [vmem:[%s5975_s0 + $0x358] ss:$28 sps:$4 sm:$0xff]  }
 0x14c   :  { %v5112_v27 = vpop.f32.mrb[28].mxu1  ;;  %3493 = vmatprep.subr.bf16.mxu1 %v4123_v0 }
 0x14d   :  { %v1970_v29 = vpop.f32.mrb[29].mxu1 }
 0x14e   :  { %v5120_v31 = vpop.f32.mrb[30].mxu1  ;;  %v4152_v29 = vld [vmem:[%s5975_s0 + $0x394] ss:$28 sps:$4 sm:$0xff]  }
 0x14f   :  { %v1973_v36 = vpop.f32.mrb[31].mxu1  ;;  %3494 = vmatpush3.bf16.msra.mxu1 %v4123_v0  ;;  %v4154_v0 = vld [vmem:[%s5975_s0 + $0x18] ss:$28 sps:$4 sm:$0xff]  }
 0x150   :  { %3495 = vmatprep.subr.bf16.mxu1 %v4130_v28 }
 0x151   :  { %2408 = vmatmul.mubr.bf16.gmra.mrb[104].mxu1 %v4114_v30 }
 0x152   :  { %2569 = vmatmul.mubr.bf16.gmra.mrb[40].mxu0 %v4115_v33  ;;  %2415 = vmatprep.mubr.bf16.mxu1 %v4117_v34  ;;  %v4156_v34 = vld [vmem:[%s5975_s0 + $0x50] ss:$28 sps:$4 sm:$0xff]  }
 0x153   :  { %2576 = vmatprep.mubr.bf16.mxu0 %v4119_v37  ;;  %3496 = vmatpush3.bf16.msra.mxu1 %v4130_v28  ;;  %v4155_v37 = vld [vmem:[%s5975_s0 + $0x390] ss:$28 sps:$4 sm:$0xff]  }
 0x154   :  { %v5134_v39 = vpop.f32.mrb[32].mxu1  ;;  %3497 = vmatprep.subr.bf16.mxu1 %v4137_v38 }
 0x155   :  { %v1978_v42 = vpop.f32.mrb[33].mxu1 }
 0x156   :  { %v5142_v45 = vpop.f32.mrb[34].mxu1  ;;  %v4157_v42 = vld [vmem:[%s5975_s0 + $0x3cc] ss:$28 sps:$4 sm:$0xff]  }
 0x157   :  { %v1981_v49 = vpop.f32.mrb[35].mxu1  ;;  %3498 = vmatpush3.bf16.msra.mxu1 %v4137_v38  ;;  %v4159_v38 = vld [vmem:[%s5975_s0 + $0x88] ss:$28 sps:$4 sm:$0xff]  }
 0x158   :  { %3499 = vmatprep.subr.bf16.mxu1 %v4144_v41 }
 0x159   :  { %2416 = vmatmul.mubr.bf16.gmra.mrb[108].mxu1 %v4121_v44 }
 0x15a   :  { %2577 = vmatmul.mubr.bf16.gmra.mrb[44].mxu0 %v4122_v46  ;;  %2423 = vmatprep.mubr.bf16.mxu1 %v4124_v47  ;;  %v4161_v47 = vld [vmem:[%s5975_s0 + $0xc0] ss:$28 sps:$4 sm:$0xff]  }
 0x15b   :  { %2584 = vmatprep.mubr.bf16.mxu0 %v4126_v50  ;;  %3500 = vmatpush3.bf16.msra.mxu1 %v4144_v41  ;;  %v4160_v50 = vld [vmem:[%s5975_s0 + $0x3c8] ss:$28 sps:$4 sm:$0xff]  }
 0x15c   :  { %v5156_v53 = vpop.f32.mrb[36].mxu1  ;;  %3501 = vmatprep.subr.bf16.mxu1 %v4151_v52 }
 0x15d   :  { %v1986_v54 = vpop.f32.mrb[37].mxu1 }
 0x15e   :  { %v5161_v58 = vpop.f32.mrb[38].mxu1 }
 0x15f   :  { %v1989_v62 = vpop.f32.mrb[39].mxu1  ;;  %3502 = vmatpush3.bf16.msra.mxu1 %v4151_v52  ;;  %v4164_v52 = vld [vmem:[%s5975_s0 + $0xf8] ss:$28 sps:$4 sm:$0xff]  }
 0x160   :  { %v4166_v62 = vld [vmem:[%s5975_s0 + $0x130] ss:$28 sps:$4 sm:$0xff]  }
 0x161   :  { %2424 = vmatmul.mubr.bf16.gmra.mrb[112].mxu1 %v4128_v56  ;;  %v4162_v56 = vld [vmem:[%s5975_s0 + $0x404] ss:$28 sps:$4 sm:$0xff]  }
 0x162   :  { %2585 = vmatmul.mubr.bf16.gmra.mrb[48].mxu0 %v4129_v59  ;;  %2431 = vmatprep.mubr.bf16.mxu1 %v4131_v61 }
 0x163   :  { %2592 = vmatprep.mubr.bf16.mxu0 %v4133_v63 }
 0x164   :  { %v5172_v1 = vpop.f32.mrb[40].mxu1 }
 0x165   :  { %v1994_v3 = vpop.f32.mrb[41].mxu1 }
 0x166   :  { %v5177_v6 = vpop.f32.mrb[42].mxu1  ;;  %v4165_v3 = vld [vmem:[%s5975_s0 + $0x400] ss:$28 sps:$4 sm:$0xff]  }
 0x167   :  { %v1997_v9 = vpop.f32.mrb[43].mxu1 }
 0x169   :  { %2432 = vmatmul.mubr.bf16.gmra.mrb[116].mxu1 %v4135_v4  ;;  %v4169_v4 = vld [vmem:[%s5975_s0 + $0x168] ss:$28 sps:$4 sm:$0xff]  }
 0x16a   :  { %2593 = vmatmul.mubr.bf16.gmra.mrb[52].mxu0 %v4136_v7  ;;  %2439 = vmatprep.mubr.bf16.mxu1 %v4138_v8  ;;  %v4167_v8 = vld [vmem:[%s5975_s0 + $0x43c] ss:$28 sps:$4 sm:$0xff]  }
 0x16b   :  { %2600 = vmatprep.mubr.bf16.mxu0 %v4140_v11 }
 0x16c   :  { %v5188_v12 = vpop.f32.mrb[44].mxu1 }
 0x16d   :  { %v2002_v14 = vpop.f32.mrb[45].mxu1 }
 0x16e   :  { %v5193_v16 = vpop.f32.mrb[46].mxu1  ;;  %v4171_v14 = vld [vmem:[%s5975_s0 + $0x1a0] ss:$28 sps:$4 sm:$0xff]  }
 0x16f   :  { %v2005_v19 = vpop.f32.mrb[47].mxu1 }
 0x171   :  { %2440 = vmatmul.mubr.bf16.gmra.mrb[120].mxu1 %v4142_v15 }
 0x172   :  { %2601 = vmatmul.mubr.bf16.gmra.mrb[56].mxu0 %v4143_v17  ;;  %2447 = vmatprep.mubr.bf16.mxu1 %v4145_v18  ;;  %v4170_v17 = vld [vmem:[%s5975_s0 + $0x438] ss:$28 sps:$4 sm:$0xff]  }
 0x173   :  { %2608 = vmatprep.mubr.bf16.mxu0 %v4147_v21  ;;  %v4174_v18 = vld [vmem:[%s5975_s0 + $0x1d8] ss:$28 sps:$4 sm:$0xff]  }
 0x174   :  { %v5204_v22 = vpop.f32.mrb[48].mxu1  ;;  %v4172_v21 = vld [vmem:[%s5975_s0 + $0x474] ss:$28 sps:$4 sm:$0xff]  }
 0x175   :  { %v2010_v55 = vpop.f32.mrb[49].mxu1 }
 0x176   :  { %v5209_v25 = vpop.f32.mrb[50].mxu1 }
 0x177   :  { %v2013_v28 = vpop.f32.mrb[51].mxu1 }
 0x178   :  { %v4175_v28 = vld [vmem:[%s5975_s0 + $0x470] ss:$28 sps:$4 sm:$0xff]  }
 0x179   :  { %2448 = vmatmul.mubr.bf16.gmra.mrb[124].mxu1 %v4149_v24 }
 0x17a   :  { %2609 = vmatmul.mubr.bf16.gmra.mrb[60].mxu0 %v4150_v26  ;;  %3503 = vmatprep.mubr.bf16.mxu1 %v4154_v0  ;;  %v4176_v26 = vld [vmem:[%s5975_s0 + $0x210] ss:$28 sps:$4 sm:$0xff]  }
 0x17b   :  { %2616 = vmatprep.mubr.bf16.mxu0 %v4152_v29  ;;  %v4179_v29 = vld [vmem:[%s5975_s0 + $0x248] ss:$28 sps:$4 sm:$0xff]  }
 0x17c   :  { %v5220_v30 = vpop.f32.mrb[52].mxu1 }
 0x17d   :  { %v2018_v33 = vpop.f32.mrb[53].mxu1 }
 0x17e   :  { %v5225_v36 = vpop.f32.mrb[54].mxu1 }
 0x17f   :  { %v2021_v41 = vpop.f32.mrb[55].mxu1 }
 0x180   :  { %v4181_v41 = vld [vmem:[%s5975_s0 + $0x280] ss:$28 sps:$4 sm:$0xff]  }
 0x181   :  { %3504 = vmatmul.mubr.bf16.vlgmr.msra.gmra.mrb[128].mxu1 %v4156_v34  ;;  %v4177_v34 = vld [vmem:[%s5975_s0 + $0x4ac] ss:$28 sps:$4 sm:$0xff]  }
 0x182   :  { %2617 = vmatmul.mubr.bf16.gmra.mrb[64].mxu0 %v4155_v37  ;;  %3507 = vmatprep.mubr.bf16.mxu1 %v4159_v38 }
 0x183   :  { %2624 = vmatprep.mubr.bf16.mxu0 %v4157_v42 }
 0x184   :  { %v5236_v44 = vpop.f32.mrb[56].mxu1 }
 0x185   :  { %v2026_v46 = vpop.f32.mrb[57].mxu1 }
 0x186   :  { %v5241_v49 = vpop.f32.mrb[58].mxu1  ;;  %v4180_v46 = vld [vmem:[%s5975_s0 + $0x4a8] ss:$28 sps:$4 sm:$0xff]  }
 0x187   :  { %v2029_v54 = vpop.f32.mrb[59].mxu1 }
 0x189   :  { %3508 = vmatmul.mubr.bf16.gmra.mrb[132].mxu1 %v4161_v47  ;;  %v4184_v47 = vld [vmem:[%s5975_s0 + $0x2b8] ss:$28 sps:$4 sm:$0xff]  }
 0x18a   :  { %2625 = vmatmul.mubr.bf16.gmra.mrb[68].mxu0 %v4160_v50  ;;  %3511 = vmatprep.mubr.bf16.mxu1 %v4164_v52  ;;  %v4182_v52 = vld [vmem:[%s5975_s0 + $0x4e4] ss:$28 sps:$4 sm:$0xff]  }
 0x18b   :  { %2632 = vmatprep.mubr.bf16.mxu0 %v4162_v56 }
 0x18c   :  { %v5252_v59 = vpop.f32.mrb[60].mxu1 }
 0x18d   :  { %v2034_v61 = vpop.f32.mrb[61].mxu1 }
 0x18e   :  { %v5257_v63 = vpop.f32.mrb[62].mxu1  ;;  %v4186_v61 = vld [vmem:[%s5975_s0 + $0x2f0] ss:$28 sps:$4 sm:$0xff]  }
 0x18f   :  { %v2037_v7 = vpop.f32.mrb[63].mxu1 }
 0x191   :  { %3512 = vmatmul.mubr.bf16.gmra.mrb[136].mxu1 %v4166_v62 }
 0x192   :  { %2633 = vmatmul.mubr.bf16.gmra.mrb[72].mxu0 %v4165_v3  ;;  %3515 = vmatprep.mubr.bf16.mxu1 %v4169_v4  ;;  %v4185_v3 = vld [vmem:[%s5975_s0 + $0x4e0] ss:$28 sps:$4 sm:$0xff]   ;;  %v4189_v4 = vld [vmem:[%s5975_s0 + $0x328] ss:$28 sps:$4 sm:$0xff]  }
 0x193   :  { %2640 = vmatprep.mubr.bf16.mxu0 %v4167_v8  ;;  %v4187_v8 = vld [vmem:[%s5975_s0 + $0x51c] ss:$28 sps:$4 sm:$0xff]  }
 0x194   :  { %v5268_v9 = vpop.f32.mrb[64].mxu1 }
 0x195   :  { %v2042_v11 = vpop.f32.mrb[65].mxu1 }
 0x196   :  { %v5273_v15 = vpop.f32.mrb[66].mxu1 }
 0x197   :  { %v2045_v19 = vpop.f32.mrb[67].mxu1 }
 0x198   :  { %v4190_v19 = vld [vmem:[%s5975_s0 + $0x518] ss:$28 sps:$4 sm:$0xff]  }
 0x199   :  { %3516 = vmatmul.mubr.bf16.gmra.mrb[140].mxu1 %v4171_v14 }
 0x19a   :  { %2641 = vmatmul.mubr.bf16.gmra.mrb[76].mxu0 %v4170_v17  ;;  %3519 = vmatprep.mubr.bf16.mxu1 %v4174_v18  ;;  %v4191_v17 = vld [vmem:[%s5975_s0 + $0x360] ss:$28 sps:$4 sm:$0xff]  }
 0x19b   :  { %2648 = vmatprep.mubr.bf16.mxu0 %v4172_v21  ;;  %v4194_v21 = vld [vmem:[%s5975_s0 + $0x398] ss:$28 sps:$4 sm:$0xff]  }
 0x19c   :  { %v5284_v55 = vpop.f32.mrb[68].mxu1 }
 0x19d   :  { %v2050_v24 = vpop.f32.mrb[69].mxu1 }
 0x19e   :  { %v5289_v0 = vpop.f32.mrb[70].mxu1 }
 0x19f   :  { %v2053_v33 = vpop.f32.mrb[71].mxu1 }
 0x1a0   :  { %v4196_v33 = vld [vmem:[%s5975_s0 + $0x3d0] ss:$28 sps:$4 sm:$0xff]  }
 0x1a1   :  { %3520 = vmatmul.mubr.bf16.gmra.mrb[144].mxu1 %v4176_v26  ;;  %v4192_v26 = vld [vmem:[%s5975_s0 + $0x554] ss:$28 sps:$4 sm:$0xff]  }
 0x1a2   :  { %2649 = vmatmul.mubr.bf16.gmra.mrb[80].mxu0 %v4175_v28  ;;  %3523 = vmatprep.mubr.bf16.mxu1 %v4179_v29 }
 0x1a3   :  { %2656 = vmatprep.mubr.bf16.mxu0 %v4177_v34 }
 0x1a4   :  { %v5300_v37 = vpop.f32.mrb[72].mxu1 }
 0x1a5   :  { %v2058_v38 = vpop.f32.mrb[73].mxu1 }
 0x1a6   :  { %v5305_v42 = vpop.f32.mrb[74].mxu1  ;;  %v4195_v38 = vld [vmem:[%s5975_s0 + $0x550] ss:$28 sps:$4 sm:$0xff]  }
 0x1a7   :  { %v2061_v50 = vpop.f32.mrb[75].mxu1 }
 0x1a9   :  { %3524 = vmatmul.mubr.bf16.gmra.mrb[148].mxu1 %v4181_v41  ;;  %v4199_v41 = vld [vmem:[%s5975_s0 + $0x408] ss:$28 sps:$4 sm:$0xff]  }
 0x1aa   :  { %2657 = vmatmul.mubr.bf16.gmra.mrb[84].mxu0 %v4180_v46  ;;  %3527 = vmatprep.mubr.bf16.mxu1 %v4184_v47  ;;  %v4197_v47 = vld [vmem:[%s5975_s0 + $0x58c] ss:$28 sps:$4 sm:$0xff]  }
 0x1ab   :  { %2664 = vmatprep.mubr.bf16.mxu0 %v4182_v52 }
 0x1ac   :  { %v5316_v54 = vpop.f32.mrb[76].mxu1 }
 0x1ad   :  { %v2066_v56 = vpop.f32.mrb[77].mxu1 }
 0x1ae   :  { %v5321_v62 = vpop.f32.mrb[78].mxu1  ;;  %v4201_v56 = vld [vmem:[%s5975_s0 + $0x440] ss:$28 sps:$4 sm:$0xff]  }
 0x1af   :  { %v2069_v7 = vpop.f32.mrb[79].mxu1 }
 0x1b1   :  { %3528 = vmatmul.mubr.bf16.gmra.mrb[152].mxu1 %v4186_v61 }
 0x1b2   :  { %2665 = vmatmul.mubr.bf16.gmra.mrb[88].mxu0 %v4185_v3  ;;  %3531 = vmatprep.mubr.bf16.mxu1 %v4189_v4  ;;  %v4200_v3 = vld [vmem:[%s5975_s0 + $0x588] ss:$28 sps:$4 sm:$0xff]   ;;  %v4204_v4 = vld [vmem:[%s5975_s0 + $0x478] ss:$28 sps:$4 sm:$0xff]  }
 0x1b3   :  { %2672 = vmatprep.mubr.bf16.mxu0 %v4187_v8  ;;  %v4202_v8 = vld [vmem:[%s5975_s0 + $0x5c4] ss:$28 sps:$4 sm:$0xff]  }
 0x1b4   :  { %v5332_v11 = vpop.f32.mrb[80].mxu1 }
 0x1b5   :  { %v2074_v14 = vpop.f32.mrb[81].mxu1 }
 0x1b6   :  { %v5337_v18 = vpop.f32.mrb[82].mxu1 }
 0x1b7   :  { %v2077_v24 = vpop.f32.mrb[83].mxu1 }
 0x1b8   :  { %v4205_v24 = vld [vmem:[%s5975_s0 + $0x5c0] ss:$28 sps:$4 sm:$0xff]  }
 0x1b9   :  { %3532 = vmatmul.mubr.bf16.gmra.mrb[156].mxu1 %v4191_v17 }
 0x1ba   :  { %2673 = vmatmul.mubr.bf16.gmra.mrb[92].mxu0 %v4190_v19  ;;  %3535 = vmatprep.mubr.bf16.mxu1 %v4194_v21  ;;  %v4206_v19 = vld [vmem:[%s5975_s0 + $0x4b0] ss:$28 sps:$4 sm:$0xff]  }
 0x1bb   :  { %2680 = vmatprep.mubr.bf16.mxu0 %v4192_v26  ;;  %v4209_v26 = vld [vmem:[%s5975_s0 + $0x4e8] ss:$28 sps:$4 sm:$0xff]  }
 0x1bc   :  { %v5348_v28 = vpop.f32.mrb[84].mxu1 }
 0x1bd   :  { %v2082_v29 = vpop.f32.mrb[85].mxu1 }
 0x1be   :  { %v5353_v34 = vpop.f32.mrb[86].mxu1 }
 0x1bf   :  { %v2085_v46 = vpop.f32.mrb[87].mxu1 }
 0x1c1   :  { %3536 = vmatmul.mubr.bf16.gmra.mrb[160].mxu1 %v4196_v33  ;;  %v4207_v33 = vld [vmem:[%s5975_s0 + $0x5fc] ss:$28 sps:$4 sm:$0xff]  }
 0x1c2   :  { %2681 = vmatmul.mubr.bf16.gmra.mrb[96].mxu0 %v4195_v38  ;;  %3539 = vmatprep.mubr.bf16.mxu1 %v4199_v41  ;;  %v5399_v38 = vld [vmem:[%s5976_s2] ss:$0 sm:$0xff] }
 0x1c3   :  { %2688 = vmatprep.mubr.bf16.mxu0 %v4197_v47  ;;  %v1913_v41 = vadd.f32 %v5399_v38, %v4990_v32  ;;  %v4211_v47 = vld [vmem:[%s5975_s0 + $0x520] ss:$28 sps:$4 sm:$0xff]  }
 0x1c4   :  { %v5364_v50 = vpop.f32.mrb[88].mxu1 }
 0x1c5   :  { %v2090_v52 = vpop.f32.mrb[89].mxu1 }
 0x1c6   :  { %v5369_v61 = vpop.f32.mrb[90].mxu1  ;;  %v1916_v52 = vadd.f32 %v5399_v38, %v4995_v35  ;;  %v1921_v35 = vadd.f32 %v5399_v38, %v5006_v40 }
 0x1c7   :  { %v2093_v7 = vpop.f32.mrb[91].mxu1 }
 0x1c8   :  { %v4214_v7 = vld [vmem:[%s5975_s0 + $0x558] ss:$28 sps:$4 sm:$0xff]  }
 0x1c9   :  { %3540 = vmatmul.mubr.bf16.gmra.mrb[164].mxu1 %v4201_v56 }
 0x1ca   :  { %2689 = vmatmul.mubr.bf16.gmra.mrb[100].mxu0 %v4200_v3  ;;  %3543 = vmatprep.mubr.bf16.mxu1 %v4204_v4  ;;  %v4210_v4 = vld [vmem:[%s5975_s0 + $0x5f8] ss:$28 sps:$4 sm:$0xff]  }
 0x1cb   :  { %2696 = vmatprep.mubr.bf16.mxu0 %v4202_v8  ;;  %v4212_v8 = vld [vmem:[%s5975_s0 + $0x634] ss:$28 sps:$4 sm:$0xff]  }
 0x1cc   :  { %v5380_v14 = vpop.f32.mrb[92].mxu1 }
 0x1cd   :  { %v2098_v17 = vpop.f32.mrb[93].mxu1 }
 0x1ce   :  { %v5385_v21 = vpop.f32.mrb[94].mxu1 }
 0x1cf   :  { %v2101_v29 = vpop.f32.mrb[95].mxu1 }
 0x1d0   :  { %v1924_v29 = vadd.f32 %v5399_v38, %v5011_v43  ;;  %v1929_v43 = vadd.f32 %v5399_v38, %v5022_v48 }
 0x1d1   :  { %3544 = vmatmul.mubr.bf16.gmra.mrb[168].mxu1 %v4206_v19 }
 0x1d2   :  { %2697 = vmatmul.mubr.bf16.gmra.mrb[104].mxu0 %v4205_v24  ;;  %3547 = vmatprep.mubr.bf16.mxu1 %v4209_v26  ;;  %v4216_v26 = vld [vmem:[%s5975_s0 + $0x590] ss:$28 sps:$4 sm:$0xff]  }
 0x1d3   :  { %2704 = vmatprep.mubr.bf16.mxu0 %v4207_v33 }
 0x1d5   :  { %v2490_v46 = vpop.f32.mrb[0].mxu0 }
 0x1d6   :  { %v5408_v56 = vadd.f32 %v2490_v46, %v1913_v41  ;;  %v2492_v3 = vpop.f32.mrb[1].mxu0  ;;  %v4215_v46 = vld [vmem:[%s5975_s0 + $0x630] ss:$28 sps:$4 sm:$0xff]  }
 0x1d7   :  { %v2493_v32 = vpop.f32.mrb[2].mxu0 }
 0x1d8   :  { %v5419_v17 = vadd.f32 %v2493_v32, %v1916_v52  ;;  %v2495_v19 = vpop.f32.mrb[3].mxu0  ;;  %v4217_v52 = vld [vmem:[%s5975_s0 + $0x66c] ss:$28 sps:$4 sm:$0xff]   ;;  %v4221_v32 = vld [vmem:[%s5975_s0 + $0x600] ss:$28 sps:$4 sm:$0xff]  }
 0x1d9   :  { %3548 = vmatmul.mubr.bf16.gmra.mrb[172].mxu1 %v4211_v47  ;;  %v4219_v47 = vld [vmem:[%s5975_s0 + $0x5c8] ss:$28 sps:$4 sm:$0xff]  }
 0x1da   :  { %2705 = vmatmul.mubr.bf16.gmra.mrb[108].mxu0 %v4210_v4  ;;  %3551 = vmatprep.mubr.bf16.mxu1 %v4214_v7 }
 0x1db   :  { %2712 = vmatprep.mubr.bf16.mxu0 %v4212_v8  ;;  %v1932_v8 = vadd.f32 %v5399_v38, %v5027_v51  ;;  %v1937_v51 = vadd.f32 %v5399_v38, %v5038_v57 }
 0x1dd   :  { %v2498_v24 = vpop.f32.mrb[4].mxu0 }
 0x1de   :  { %v5428_v33 = vadd.f32 %v2498_v24, %v1921_v35  ;;  %v2500_v41 = vpop.f32.mrb[5].mxu0  ;;  %v4220_v24 = vld [vmem:[%s5975_s0 + $0x668] ss:$28 sps:$4 sm:$0xff]  }
 0x1df   :  { %v2501_v40 = vpop.f32.mrb[6].mxu0 }
 0x1e0   :  { %v5439_v3 = vadd.f32 %v2501_v40, %v1924_v29  ;;  %v2503_v4 = vpop.f32.mrb[7].mxu0  ;;  %v4222_v29 = vld [vmem:[%s5975_s0 + $0x6a4] ss:$28 sps:$4 sm:$0xff]   ;;  %v4226_v40 = vld [vmem:[%s5975_s0 + $0x670] ss:$28 sps:$4 sm:$0xff]  }
 0x1e1   :  { %3552 = vmatmul.mubr.bf16.gmra.mrb[176].mxu1 %v4216_v26  ;;  %v4224_v26 = vld [vmem:[%s5975_s0 + $0x638] ss:$28 sps:$4 sm:$0xff]  }
 0x1e2   :  { %2713 = vmatmul.mubr.bf16.gmra.mrb[112].mxu0 %v4215_v46  ;;  %3555 = vmatprep.mubr.bf16.mxu1 %v4219_v47 }
 0x1e3   :  { %2720 = vmatprep.mubr.bf16.mxu0 %v4217_v52  ;;  %v1940_v52 = vadd.f32 %v5399_v38, %v5043_v60  ;;  %v1945_v60 = vadd.f32 %v5399_v38, %v5054_v2  ;;  %v1953_v2 = vadd.f32 %v5399_v38, %v5070_v10 }
 0x1e5   :  { %v2506_v7 = vpop.f32.mrb[8].mxu0 }
 0x1e6   :  { %v5448_v19 = vadd.f32 %v2506_v7, %v1929_v43  ;;  %v2508_v35 = vpop.f32.mrb[9].mxu0  ;;  %v4225_v7 = vld [vmem:[%s5975_s0 + $0x6a0] ss:$28 sps:$4 sm:$0xff]  }
 0x1e7   :  { %v2509_v48 = vpop.f32.mrb[10].mxu0 }
 0x1e8   :  { %v5459_v41 = vadd.f32 %v2509_v48, %v1932_v8  ;;  %v2511_v46 = vpop.f32.mrb[11].mxu0  ;;  %v4227_v8 = vld [vmem:[%s5975_s0 + $0x6dc] ss:$28 sps:$4 sm:$0xff]  }
 0x1e9   :  { %3556 = vmatmul.mubr.bf16.gmra.mrb[180].mxu1 %v4221_v32  ;;  %v4229_v32 = vld [vmem:[%s5975_s0 + $0x6a8] ss:$28 sps:$4 sm:$0xff]   ;;  %v4231_v48 = vld [vmem:[%s5975_s0 + $0x6e0] ss:$28 sps:$4 sm:$0xff]  }
 0x1ea   :  { %2721 = vmatmul.mubr.bf16.gmra.mrb[116].mxu0 %v4220_v24  ;;  %3559 = vmatprep.mubr.bf16.mxu1 %v4224_v26 }
 0x1eb   :  { %2728 = vmatprep.mubr.bf16.mxu0 %v4222_v29  ;;  %v1948_v29 = vadd.f32 %v5399_v38, %v5059_v5  ;;  %v1956_v5 = vadd.f32 %v5399_v38, %v5075_v13 }
 0x1ed   :  { %v2514_v47 = vpop.f32.mrb[12].mxu0 }
 0x1ee   :  { %v5468_v4 = vadd.f32 %v2514_v47, %v1937_v51  ;;  %v2516_v43 = vpop.f32.mrb[13].mxu0  ;;  %v4230_v47 = vld [vmem:[%s5975_s0 + $0x6d8] ss:$28 sps:$4 sm:$0xff]  }
 0x1ef   :  { %v2517_v57 = vpop.f32.mrb[14].mxu0 }
 0x1f0   :  { %v5479_v35 = vadd.f32 %v2517_v57, %v1940_v52  ;;  %v2519_v24 = vpop.f32.mrb[15].mxu0 }
 0x1f1   :  { %3560 = vmatmul.mubr.bf16.gmra.mrb[184].mxu1 %v4226_v40 }
 0x1f2   :  { %2729 = vmatmul.mubr.bf16.gmra.mrb[120].mxu0 %v4225_v7  ;;  %3563 = vmatprep.mubr.bf16.mxu1 %v4229_v32 }
 0x1f3   :  { %2736 = vmatprep.mubr.bf16.mxu0 %v4227_v8 }
 0x1f5   :  { %v2522_v26 = vpop.f32.mrb[16].mxu0 }
 0x1f6   :  { %v5488_v46 = vadd.f32 %v2522_v26, %v1945_v60  ;;  %v2524_v51 = vpop.f32.mrb[17].mxu0  ;;  %v1961_v26 = vadd.f32 %v5399_v38, %v5093_v20 }
 0x1f7   :  { %v2525_v40 = vpop.f32.mrb[18].mxu0 }
 0x1f8   :  { %v5493_v52 = vadd.f32 %v2525_v40, %v1948_v29  ;;  %v2527_v43 = vpop.f32.mrb[19].mxu0 }
 0x1f9   :  { %3564 = vmatmul.mubr.bf16.gmra.mrb[188].mxu1 %v4231_v48  ;;  %v1964_v48 = vadd.f32 %v5399_v38, %v5098_v23  ;;  %v1969_v43 = vadd.f32 %v5399_v38, %v5112_v27  ;;  %v1980_v27 = vadd.f32 %v5399_v38, %v5142_v45  ;;  %v1988_v45 = vadd.f32 %v5399_v38, %v5161_v58 }
 0x1fa   :  { %2737 = vmatmul.mubr.bf16.gmra.mrb[124].mxu0 %v4230_v47  ;;  %v1996_v58 = vadd.f32 %v5399_v38, %v5177_v6  ;;  %v2004_v6 = vadd.f32 %v5399_v38, %v5193_v16  ;;  %v2012_v16 = vadd.f32 %v5399_v38, %v5209_v25  ;;  %v2020_v25 = vadd.f32 %v5399_v38, %v5225_v36 }
 0x1fb   :  { %v2028_v36 = vadd.f32 %v5399_v38, %v5241_v49  ;;  %v2036_v49 = vadd.f32 %v5399_v38, %v5257_v63  ;;  %v2044_v63 = vadd.f32 %v5399_v38, %v5273_v15  ;;  %v2049_v15 = vadd.f32 %v5399_v38, %v5284_v55 }
 0x1fd   :  { %v2530_v7 = vpop.f32.mrb[20].mxu0 }
 0x1fe   :  { %v5499_v32 = vadd.f32 %v2530_v7, %v1953_v2  ;;  %v2532_v57 = vpop.f32.mrb[21].mxu0  ;;  %v1972_v7 = vadd.f32 %v5399_v38, %v5120_v31 }
 0x1ff   :  { %v2533_v8 = vpop.f32.mrb[22].mxu0 }
 0x200   :  { %v5501_v24 = vadd.f32 %v2533_v8, %v1956_v5  ;;  %v2535_v60 = vpop.f32.mrb[23].mxu0 }
 0x201   :  { %v1977_v60 = vadd.f32 %v5399_v38, %v5134_v39  ;;  %v1985_v39 = vadd.f32 %v5399_v38, %v5156_v53  ;;  %v1993_v53 = vadd.f32 %v5399_v38, %v5172_v1  ;;  %v2001_v1 = vadd.f32 %v5399_v38, %v5188_v12 }
 0x202   :  { %v2009_v12 = vadd.f32 %v5399_v38, %v5204_v22  ;;  %v2017_v22 = vadd.f32 %v5399_v38, %v5220_v30  ;;  %v2025_v30 = vadd.f32 %v5399_v38, %v5236_v44  ;;  %v2033_v44 = vadd.f32 %v5399_v38, %v5252_v59 }
 0x203   :  { %v2041_v59 = vadd.f32 %v5399_v38, %v5268_v9 }
 0x205   :  { %v2538_v29 = vpop.f32.mrb[24].mxu0 }
 0x206   :  { %v5507_v51 = vadd.f32 %v2538_v29, %v1961_v26  ;;  %v2540_v10 = vpop.f32.mrb[25].mxu0 }
 0x207   :  { %v2541_v47 = vpop.f32.mrb[26].mxu0 }
 0x208   :  { %v5509_v40 = vadd.f32 %v2541_v47, %v1964_v48  ;;  %v2543_v13 = vpop.f32.mrb[27].mxu0 }
 0x20d   :  { %v2546_v2 = vpop.f32.mrb[28].mxu0 }
 0x20e   :  { %v5515_v5 = vadd.f32 %v2546_v2, %v1969_v43  ;;  %v2548_v20 = vpop.f32.mrb[29].mxu0 }
 0x20f   :  { %v2549_v57 = vpop.f32.mrb[30].mxu0 }
 0x210   :  { %v5517_v8 = vadd.f32 %v2549_v57, %v1972_v7  ;;  %v2551_v23 = vpop.f32.mrb[31].mxu0 }
 0x214   :  { %v5521_v26 = vpop.f32.mrb[96].mxu1 }
 0x215   :  { %v2554_v29 = vpop.f32.mrb[32].mxu0  ;;  %v2395_v48 = vpop.f32.mrb[97].mxu1 }
 0x216   :  { %v5525_v10 = vadd.f32 %v2554_v29, %v1977_v60  ;;  %v2556_v31 = vpop.f32.mrb[33].mxu0  ;;  %v5527_v47 = vpop.f32.mrb[98].mxu1 }
 0x217   :  { %5978 = vst [vmem:[#allocation2_spill] sm:$0xff] %v5527_v47  ;;  %v2557_v13 = vpop.f32.mrb[34].mxu0  ;;  %v2398_v43 = vpop.f32.mrb[99].mxu1 }
 0x218   :  { %v5529_v2 = vadd.f32 %v2557_v13, %v1980_v27  ;;  %v2559_v7 = vpop.f32.mrb[35].mxu0 }
 0x21c   :  { %v5533_v20 = vpop.f32.mrb[100].mxu1 }
 0x21d   :  { %5979 = vst [vmem:[#allocation3_spill] sm:$0xff] %v5533_v20  ;;  %v2562_v57 = vpop.f32.mrb[36].mxu0  ;;  %v2403_v23 = vpop.f32.mrb[101].mxu1 }
 0x21e   :  { %v5537_v60 = vadd.f32 %v2562_v57, %v1985_v39  ;;  %v2564_v29 = vpop.f32.mrb[37].mxu0  ;;  %v5539_v48 = vpop.f32.mrb[102].mxu1 }
 0x21f   :  { %5980 = vst [vmem:[#allocation4_spill] sm:$0xff] %v5539_v48  ;;  %v2565_v31 = vpop.f32.mrb[38].mxu0  ;;  %v2406_v43 = vpop.f32.mrb[103].mxu1 }
 0x220   :  { %v5541_v27 = vadd.f32 %v2565_v31, %v1988_v45  ;;  %v2567_v13 = vpop.f32.mrb[39].mxu0 }
 0x224   :  { %v5545_v7 = vpop.f32.mrb[104].mxu1 }
 0x225   :  { %5981 = vst [vmem:[#allocation5_spill] sm:$0xff] %v5545_v7  ;;  %v2570_v20 = vpop.f32.mrb[40].mxu0  ;;  %v2411_v23 = vpop.f32.mrb[105].mxu1 }
 0x226   :  { %v5549_v39 = vadd.f32 %v2570_v20, %v1993_v53  ;;  %v2572_v57 = vpop.f32.mrb[41].mxu0  ;;  %v5551_v29 = vpop.f32.mrb[106].mxu1 }
 0x227   :  { %5982 = vst [vmem:[#allocation6_spill] sm:$0xff] %v5551_v29  ;;  %v2573_v48 = vpop.f32.mrb[42].mxu0  ;;  %v2414_v43 = vpop.f32.mrb[107].mxu1 }
 0x228   :  { %v5553_v45 = vadd.f32 %v2573_v48, %v1996_v58  ;;  %v2575_v31 = vpop.f32.mrb[43].mxu0 }
 0x22c   :  { %v5557_v13 = vpop.f32.mrb[108].mxu1 }
 0x22d   :  { %5983 = vst [vmem:[#allocation7_spill] sm:$0xff] %v5557_v13  ;;  %v2578_v7 = vpop.f32.mrb[44].mxu0  ;;  %v2419_v23 = vpop.f32.mrb[109].mxu1 }
 0x22e   :  { %v5561_v20 = vadd.f32 %v2578_v7, %v2001_v1  ;;  %v2580_v53 = vpop.f32.mrb[45].mxu0  ;;  %v5563_v57 = vpop.f32.mrb[110].mxu1 }
 0x22f   :  { %5984 = vst [vmem:[#allocation8_spill] sm:$0xff] %v5563_v57  ;;  %v2581_v29 = vpop.f32.mrb[46].mxu0  ;;  %v2422_v43 = vpop.f32.mrb[111].mxu1 }
 0x230   :  { %v5565_v48 = vadd.f32 %v2581_v29, %v2004_v6  ;;  %v2583_v58 = vpop.f32.mrb[47].mxu0 }
 0x234   :  { %v5569_v31 = vpop.f32.mrb[112].mxu1 }
 0x235   :  { %5985 = vst [vmem:[#allocation9_spill] sm:$0xff] %v5569_v31  ;;  %v2586_v13 = vpop.f32.mrb[48].mxu0  ;;  %v2427_v23 = vpop.f32.mrb[113].mxu1 }
 0x236   :  { %v5573_v7 = vadd.f32 %v2586_v13, %v2009_v12  ;;  %v2588_v1 = vpop.f32.mrb[49].mxu0  ;;  %v5575_v53 = vpop.f32.mrb[114].mxu1 }
 0x237   :  { %5986 = vst [vmem:[#allocation10_spill] sm:$0xff] %v5575_v53  ;;  %v2589_v57 = vpop.f32.mrb[50].mxu0  ;;  %v2430_v43 = vpop.f32.mrb[115].mxu1 }
 0x238   :  { %v5577_v29 = vadd.f32 %v2589_v57, %v2012_v16  ;;  %v2591_v6 = vpop.f32.mrb[51].mxu0 }
 0x23c   :  { %v5581_v58 = vpop.f32.mrb[116].mxu1 }
 0x23d   :  { %5987 = vst [vmem:[#allocation11_spill] sm:$0xff] %v5581_v58  ;;  %v2594_v31 = vpop.f32.mrb[52].mxu0  ;;  %v2435_v23 = vpop.f32.mrb[117].mxu1 }
 0x23e   :  { %v5585_v13 = vadd.f32 %v2594_v31, %v2017_v22  ;;  %v2596_v12 = vpop.f32.mrb[53].mxu0  ;;  %v5587_v1 = vpop.f32.mrb[118].mxu1 }
 0x23f   :  { %5988 = vst [vmem:[#allocation12_spill] sm:$0xff] %v5587_v1  ;;  %v2597_v53 = vpop.f32.mrb[54].mxu0  ;;  %v2438_v43 = vpop.f32.mrb[119].mxu1 }
 0x240   :  { %v5589_v57 = vadd.f32 %v2597_v53, %v2020_v25  ;;  %v2599_v16 = vpop.f32.mrb[55].mxu0 }
 0x244   :  { %v5593_v6 = vpop.f32.mrb[120].mxu1 }
 0x245   :  { %5989 = vst [vmem:[#allocation13_spill] sm:$0xff] %v5593_v6  ;;  %v2602_v58 = vpop.f32.mrb[56].mxu0  ;;  %v2443_v23 = vpop.f32.mrb[121].mxu1 }
 0x246   :  { %v5597_v31 = vadd.f32 %v2602_v58, %v2025_v30  ;;  %v2604_v22 = vpop.f32.mrb[57].mxu0  ;;  %v5599_v12 = vpop.f32.mrb[122].mxu1 }
 0x247   :  { %5990 = vst [vmem:[#allocation14_spill] sm:$0xff] %v5599_v12  ;;  %v2605_v1 = vpop.f32.mrb[58].mxu0  ;;  %v2446_v43 = vpop.f32.mrb[123].mxu1 }
 0x248   :  { %v5601_v53 = vadd.f32 %v2605_v1, %v2028_v36  ;;  %v2607_v25 = vpop.f32.mrb[59].mxu0 }
 0x24c   :  { %v5605_v16 = vpop.f32.mrb[124].mxu1 }
 0x24d   :  { %5991 = vst [vmem:[#allocation15_spill] sm:$0xff] %v5605_v16  ;;  %v2610_v6 = vpop.f32.mrb[60].mxu0  ;;  %v2451_v23 = vpop.f32.mrb[125].mxu1 }
 0x24e   :  { %v5609_v58 = vadd.f32 %v2610_v6, %v2033_v44  ;;  %v2612_v30 = vpop.f32.mrb[61].mxu0  ;;  %v5611_v22 = vpop.f32.mrb[126].mxu1 }
 0x24f   :  { %5992 = vst [vmem:[#allocation16_spill] sm:$0xff] %v5611_v22  ;;  %v2613_v12 = vpop.f32.mrb[62].mxu0  ;;  %v2454_v43 = vpop.f32.mrb[127].mxu1 }
 0x250   :  { %v5613_v1 = vadd.f32 %v2613_v12, %v2036_v49  ;;  %v2615_v36 = vpop.f32.mrb[63].mxu0 }
 0x254   :  { %v3505_v25 = vpop.f32.mrb[128].mxu1 }
 0x255   :  { %v2618_v16 = vpop.f32.mrb[64].mxu0  ;;  %v2788_v23 = vadd.f32 %v5428_v33, %v3505_v25  ;;  %v2779_v47 = vpop.f32.mrb[129].mxu1 }
 0x256   :  { %v5620_v6 = vadd.f32 %v2618_v16, %v2041_v59  ;;  %v2620_v44 = vpop.f32.mrb[65].mxu0  ;;  %v2780_v30 = vadd.f32 %v5408_v56, %v2779_v47  ;;  %v3506_v43 = vpop.f32.mrb[130].mxu1 }
 0x257   :  { %4232 = vtanh.f32 %v2788_v23  ;;  %v2621_v12 = vpop.f32.mrb[66].mxu0  ;;  %v2791_v49 = vadd.f32 %v5439_v3, %v3506_v43  ;;  %v2782_v36 = vpop.f32.mrb[131].mxu1  ;;  %v2052_v3 = vadd.f32 %v5399_v38, %v5289_v0 }
 0x258   :  { %4234 = vtanh.f32 %v2780_v30  ;;  %v5624_v9 = vadd.f32 %v2621_v12, %v2044_v63  ;;  %v2623_v22 = vpop.f32.mrb[67].mxu0  ;;  %v2783_v33 = vadd.f32 %v5419_v17, %v2782_v36 }
 0x259   :  { %4236 = vtanh.f32 %v2791_v49  ;;  %v2057_v49 = vadd.f32 %v5399_v38, %v5300_v37 }
 0x25a   :  { %4238 = vtanh.f32 %v2783_v33 }
 0x25c   :  { %v3509_v16 = vpop.f32.mrb[132].mxu1 }
 0x25d   :  { %v2626_v59 = vpop.f32.mrb[68].mxu0  ;;  %v2804_v56 = vadd.f32 %v5468_v4, %v3509_v16  ;;  %v2795_v47 = vpop.f32.mrb[133].mxu1  ;;  %v2060_v16 = vadd.f32 %v5399_v38, %v5305_v42 }
 0x25e   :  { %v5632_v25 = vadd.f32 %v2626_v59, %v2049_v15  ;;  %v2628_v23 = vpop.f32.mrb[69].mxu0  ;;  %v2796_v22 = vadd.f32 %v5448_v19, %v2795_v47  ;;  %v3510_v63 = vpop.f32.mrb[134].mxu1 }
 0x25f   :  { %4240 = vtanh.f32 %v2804_v56  ;;  %v2629_v17 = vpop.f32.mrb[70].mxu0  ;;  %v2807_v44 = vadd.f32 %v5479_v35, %v3510_v63  ;;  %v2798_v30 = vpop.f32.mrb[135].mxu1 }
 0x260   :  { %4242 = vtanh.f32 %v2796_v22  ;;  %v5636_v55 = vadd.f32 %v2629_v17, %v2052_v3  ;;  %v2631_v43 = vpop.f32.mrb[71].mxu0  ;;  %v2799_v4 = vadd.f32 %v5459_v41, %v2798_v30  ;;  %v2065_v30 = vadd.f32 %v5399_v38, %v5316_v54 }
 0x261   :  { %v4233_v12 = vpop.eup %4232  ;;  %4244 = vtanh.f32 %v2807_v44 }
 0x262   :  { %v4235_v0 = vpop.eup %4234  ;;  %3100 = vst [vmem:[%s5977_s3 + $0x10] sm:$0xff] %v4233_v12  ;;  %4246 = vtanh.f32 %v2799_v4 }
 0x263   :  { %v4237_v19 = vpop.eup %4236  ;;  %3098 = vst [vmem:[%s5977_s3] sm:$0xff] %v4235_v0  ;;  %v2068_v0 = vadd.f32 %v5399_v38, %v5321_v62 }
 0x264   :  { %v4239_v35 = vpop.eup %4238  ;;  %3101 = vst [vmem:[%s5977_s3 + $0x18] sm:$0xff] %v4237_v19  ;;  %v3513_v41 = vpop.f32.mrb[136].mxu1 }
 0x265   :  { %3099 = vst [vmem:[%s5977_s3 + $0x8] sm:$0xff] %v4239_v35  ;;  %v2634_v36 = vpop.f32.mrb[72].mxu0  ;;  %v2820_v33 = vadd.f32 %v5499_v32, %v3513_v41  ;;  %v2811_v15 = vpop.f32.mrb[137].mxu1 }
 0x266   :  { %v5656_v59 = vadd.f32 %v2634_v36, %v2057_v49  ;;  %v2636_v56 = vpop.f32.mrb[73].mxu0  ;;  %v2812_v37 = vadd.f32 %v5488_v46, %v2811_v15  ;;  %v3514_v47 = vpop.f32.mrb[138].mxu1 }
 0x267   :  { %4248 = vtanh.f32 %v2820_v33  ;;  %v2637_v3 = vpop.f32.mrb[74].mxu0  ;;  %v2823_v23 = vadd.f32 %v5501_v24, %v3514_v47  ;;  %v2814_v22 = vpop.f32.mrb[139].mxu1 }
 0x268   :  { %4250 = vtanh.f32 %v2812_v37  ;;  %v5660_v63 = vadd.f32 %v2637_v3, %v2060_v16  ;;  %v2639_v17 = vpop.f32.mrb[75].mxu0  ;;  %v2815_v32 = vadd.f32 %v5493_v52, %v2814_v22  ;;  %v2073_v37 = vadd.f32 %v5399_v38, %v5332_v11 }
 0x269   :  { %v4241_v44 = vpop.eup %4240  ;;  %4252 = vtanh.f32 %v2823_v23  ;;  %v2076_v22 = vadd.f32 %v5399_v38, %v5337_v18 }
 0x26a   :  { %v4243_v42 = vpop.eup %4242  ;;  %3104 = vst [vmem:[%s5977_s3 + $0x30] sm:$0xff] %v4241_v44  ;;  %4254 = vtanh.f32 %v2815_v32 }
 0x26b   :  { %v4245_v46 = vpop.eup %4244  ;;  %3102 = vst [vmem:[%s5977_s3 + $0x20] sm:$0xff] %v4243_v42 }
 0x26c   :  { %v4247_v24 = vpop.eup %4246  ;;  %3105 = vst [vmem:[%s5977_s3 + $0x38] sm:$0xff] %v4245_v46  ;;  %v3517_v52 = vpop.f32.mrb[140].mxu1 }
 0x26d   :  { %3103 = vst [vmem:[%s5977_s3 + $0x28] sm:$0xff] %v4247_v24  ;;  %v2642_v43 = vpop.f32.mrb[76].mxu0  ;;  %v2836_v4 = vadd.f32 %v5515_v5, %v3517_v52  ;;  %v2827_v12 = vpop.f32.mrb[141].mxu1 }
 0x26e   :  { %v5680_v19 = vadd.f32 %v2642_v43, %v2065_v30  ;;  %v2644_v35 = vpop.f32.mrb[77].mxu0  ;;  %v2828_v54 = vadd.f32 %v5507_v51, %v2827_v12  ;;  %v3518_v49 = vpop.f32.mrb[142].mxu1 }
 0x26f   :  { %4256 = vtanh.f32 %v2836_v4  ;;  %v2645_v41 = vpop.f32.mrb[78].mxu0  ;;  %v2839_v36 = vadd.f32 %v5517_v8, %v3518_v49  ;;  %v2830_v33 = vpop.f32.mrb[143].mxu1  ;;  %v2081_v4 = vadd.f32 %v5399_v38, %v5348_v28 }
 0x270   :  { %4258 = vtanh.f32 %v2828_v54  ;;  %v5684_v15 = vadd.f32 %v2645_v41, %v2068_v0  ;;  %v2647_v16 = vpop.f32.mrb[79].mxu0  ;;  %v2831_v5 = vadd.f32 %v5509_v40, %v2830_v33  ;;  %v2084_v54 = vadd.f32 %v5399_v38, %v5353_v34 }
 0x271   :  { %v4249_v56 = vpop.eup %4248  ;;  %4260 = vtanh.f32 %v2839_v36 }
 0x272   :  { %v4251_v62 = vpop.eup %4250  ;;  %3108 = vst [vmem:[%s5977_s3 + $0x50] sm:$0xff] %v4249_v56  ;;  %4262 = vtanh.f32 %v2831_v5 }
 0x273   :  { %v4253_v51 = vpop.eup %4252  ;;  %3106 = vst [vmem:[%s5977_s3 + $0x40] sm:$0xff] %v4251_v62 }
 0x274   :  { %v4255_v8 = vpop.eup %4254  ;;  %3109 = vst [vmem:[%s5977_s3 + $0x58] sm:$0xff] %v4253_v51  ;;  %v3521_v40 = vpop.f32.mrb[144].mxu1 }
 0x275   :  { %3107 = vst [vmem:[%s5977_s3 + $0x48] sm:$0xff] %v4255_v8  ;;  %v2650_v47 = vpop.f32.mrb[80].mxu0  ;;  %v2852_v3 = vadd.f32 %v5537_v60, %v3521_v40  ;;  %v2843_v23 = vpop.f32.mrb[145].mxu1  ;;  %v2089_v8 = vadd.f32 %v5399_v38, %v5364_v50 }
 0x276   :  { %v5704_v17 = vadd.f32 %v2650_v47, %v2073_v37  ;;  %v2652_v32 = vpop.f32.mrb[81].mxu0  ;;  %v2844_v11 = vadd.f32 %v5525_v10, %v2843_v23  ;;  %v3522_v44 = vpop.f32.mrb[146].mxu1 }
 0x277   :  { %4264 = vtanh.f32 %v2852_v3  ;;  %v2653_v42 = vpop.f32.mrb[82].mxu0  ;;  %v2855_v46 = vadd.f32 %v5541_v27, %v3522_v44  ;;  %v2846_v24 = vpop.f32.mrb[147].mxu1  ;;  %v2092_v3 = vadd.f32 %v5399_v38, %v5369_v61 }
 0x278   :  { %4266 = vtanh.f32 %v2844_v11  ;;  %v5708_v30 = vadd.f32 %v2653_v42, %v2076_v22  ;;  %v2655_v52 = vpop.f32.mrb[83].mxu0  ;;  %v2847_v60 = vadd.f32 %v5529_v2, %v2846_v24 }
 0x279   :  { %v4257_v43 = vpop.eup %4256  ;;  %4268 = vtanh.f32 %v2855_v46 }
 0x27a   :  { %v4259_v18 = vpop.eup %4258  ;;  %3112 = vst [vmem:[%s5977_s3 + $0x70] sm:$0xff] %v4257_v43  ;;  %4270 = vtanh.f32 %v2847_v60  ;;  %v2097_v60 = vadd.f32 %v5399_v38, %v5380_v14 }
 0x27b   :  { %v4261_v10 = vpop.eup %4260  ;;  %3110 = vst [vmem:[%s5977_s3 + $0x60] sm:$0xff] %v4259_v18 }
 0x27c   :  { %v4263_v27 = vpop.eup %4262  ;;  %3113 = vst [vmem:[%s5977_s3 + $0x78] sm:$0xff] %v4261_v10  ;;  %v3525_v2 = vpop.f32.mrb[148].mxu1 }
 0x27d   :  { %3111 = vst [vmem:[%s5977_s3 + $0x68] sm:$0xff] %v4263_v27  ;;  %v2658_v12 = vpop.f32.mrb[84].mxu0  ;;  %v2868_v0 = vadd.f32 %v5561_v20, %v3525_v2  ;;  %v2859_v35 = vpop.f32.mrb[149].mxu1  ;;  %v2100_v27 = vadd.f32 %v5399_v38, %v5385_v21 }
 0x27e   :  { %v5728_v49 = vadd.f32 %v2658_v12, %v2081_v4  ;;  %v2660_v41 = vpop.f32.mrb[85].mxu0  ;;  %v2860_v28 = vadd.f32 %v5549_v39, %v2859_v35  ;;  %v3526_v36 = vpop.f32.mrb[150].mxu1 }
 0x27f   :  { %4272 = vtanh.f32 %v2868_v0  ;;  %v2661_v33 = vpop.f32.mrb[86].mxu0  ;;  %v2871_v16 = vadd.f32 %v5565_v48, %v3526_v36  ;;  %v2862_v5 = vpop.f32.mrb[151].mxu1 }
 0x280   :  { %4274 = vtanh.f32 %v2860_v28  ;;  %v5732_v56 = vadd.f32 %v2661_v33, %v2084_v54  ;;  %v2663_v62 = vpop.f32.mrb[87].mxu0  ;;  %v2863_v20 = vadd.f32 %v5553_v45, %v2862_v5  ;;  %v3695_v33 = vadd.f32 %v5399_v38, %v5521_v26 }
 0x281   :  { %v4265_v51 = vpop.eup %4264  ;;  %4276 = vtanh.f32 %v2871_v16 }
 0x282   :  { %v4267_v34 = vpop.eup %4266  ;;  %3116 = vst [vmem:[%s5977_s3 + $0x90] sm:$0xff] %v4265_v51  ;;  %4278 = vtanh.f32 %v2863_v20  ;;  %v5993_v20 = vld [vmem:[#allocation2_spill] sm:$0xff] }
 0x283   :  { %v4269_v39 = vpop.eup %4268  ;;  %3114 = vst [vmem:[%s5977_s3 + $0x80] sm:$0xff] %v4267_v34  ;;  %v3697_v51 = vadd.f32 %v5399_v38, %v5993_v20 }
 0x284   :  { %v4271_v48 = vpop.eup %4270  ;;  %3117 = vst [vmem:[%s5977_s3 + $0x98] sm:$0xff] %v4269_v39  ;;  %v3529_v45 = vpop.f32.mrb[152].mxu1 }
 0x285   :  { %3115 = vst [vmem:[%s5977_s3 + $0x88] sm:$0xff] %v4271_v48  ;;  %v2666_v37 = vpop.f32.mrb[88].mxu0  ;;  %v2884_v40 = vadd.f32 %v5585_v13, %v3529_v45  ;;  %v2875_v47 = vpop.f32.mrb[153].mxu1 }
 0x286   :  { %v5752_v23 = vadd.f32 %v2666_v37, %v2089_v8  ;;  %v2668_v22 = vpop.f32.mrb[89].mxu0  ;;  %v2876_v50 = vadd.f32 %v5573_v7, %v2875_v47  ;;  %v3530_v32 = vpop.f32.mrb[154].mxu1 }
 0x287   :  { %4280 = vtanh.f32 %v2884_v40  ;;  %v2669_v11 = vpop.f32.mrb[90].mxu0  ;;  %v2887_v44 = vadd.f32 %v5589_v57, %v3530_v32  ;;  %v2878_v42 = vpop.f32.mrb[155].mxu1 }
 0x288   :  { %4282 = vtanh.f32 %v2876_v50  ;;  %v5756_v46 = vadd.f32 %v2669_v11, %v2092_v3  ;;  %v2671_v24 = vpop.f32.mrb[91].mxu0  ;;  %v2879_v13 = vadd.f32 %v5577_v29, %v2878_v42  ;;  %v5994_v50 = vld [vmem:[#allocation3_spill] sm:$0xff] }
 0x289   :  { %v4273_v52 = vpop.eup %4272  ;;  %4284 = vtanh.f32 %v2887_v44  ;;  %v3699_v32 = vadd.f32 %v5399_v38, %v5994_v50  ;;  %v5995_v24 = vld [vmem:[#allocation4_spill] sm:$0xff] }
 0x28a   :  { %v4275_v61 = vpop.eup %4274  ;;  %3120 = vst [vmem:[%s5977_s3 + $0xb0] sm:$0xff] %v4273_v52  ;;  %4286 = vtanh.f32 %v2879_v13  ;;  %v3701_v13 = vadd.f32 %v5399_v38, %v5995_v24 }
 0x28b   :  { %v4277_v7 = vpop.eup %4276  ;;  %3118 = vst [vmem:[%s5977_s3 + $0xa0] sm:$0xff] %v4275_v61 }
 0x28c   :  { %v4279_v57 = vpop.eup %4278  ;;  %3121 = vst [vmem:[%s5977_s3 + $0xb8] sm:$0xff] %v4277_v7  ;;  %v3533_v29 = vpop.f32.mrb[156].mxu1 }
 0x28d   :  { %3119 = vst [vmem:[%s5977_s3 + $0xa8] sm:$0xff] %v4279_v57  ;;  %v2674_v43 = vpop.f32.mrb[92].mxu0  ;;  %v2900_v18 = vadd.f32 %v5609_v58, %v3533_v29  ;;  %v2891_v10 = vpop.f32.mrb[157].mxu1 }
 0x28e   :  { %v5776_v4 = vadd.f32 %v2674_v43, %v2097_v60  ;;  %v2676_v2 = vpop.f32.mrb[93].mxu0  ;;  %v2892_v14 = vadd.f32 %v5597_v31, %v2891_v10  ;;  %v3534_v12 = vpop.f32.mrb[158].mxu1 }
 0x28f   :  { %4288 = vtanh.f32 %v2900_v18  ;;  %v2677_v0 = vpop.f32.mrb[94].mxu0  ;;  %v2903_v35 = vadd.f32 %v5613_v1, %v3534_v12  ;;  %v2894_v54 = vpop.f32.mrb[159].mxu1 }
 0x290   :  { %4290 = vtanh.f32 %v2892_v14  ;;  %v5780_v41 = vadd.f32 %v2677_v0, %v2100_v27  ;;  %v2679_v28 = vpop.f32.mrb[95].mxu0  ;;  %v2895_v58 = vadd.f32 %v5601_v53, %v2894_v54  ;;  %v5996_v14 = vld [vmem:[#allocation5_spill] sm:$0xff] }
 0x291   :  { %v4281_v36 = vpop.eup %4280  ;;  %4292 = vtanh.f32 %v2903_v35  ;;  %v3703_v12 = vadd.f32 %v5399_v38, %v5996_v14  ;;  %v5997_v28 = vld [vmem:[#allocation6_spill] sm:$0xff] }
 0x292   :  { %v4283_v21 = vpop.eup %4282  ;;  %3124 = vst [vmem:[%s5977_s3 + $0xd0] sm:$0xff] %v4281_v36  ;;  %4294 = vtanh.f32 %v2895_v58  ;;  %v3705_v58 = vadd.f32 %v5399_v38, %v5997_v28 }
 0x293   :  { %v4285_v31 = vpop.eup %4284  ;;  %3122 = vst [vmem:[%s5977_s3 + $0xc0] sm:$0xff] %v4283_v21 }
 0x294   :  { %v4287_v1 = vpop.eup %4286  ;;  %3125 = vst [vmem:[%s5977_s3 + $0xd8] sm:$0xff] %v4285_v31  ;;  %v3537_v53 = vpop.f32.mrb[160].mxu1 }
 0x295   :  { %3123 = vst [vmem:[%s5977_s3 + $0xc8] sm:$0xff] %v4287_v1  ;;  %v2682_v16 = vpop.f32.mrb[96].mxu0  ;;  %v2916_v5 = vadd.f32 %v5632_v25, %v3537_v53  ;;  %v2907_v62 = vpop.f32.mrb[161].mxu1 }
 0x296   :  { %v5800_v34 = vadd.f32 %v3695_v33, %v2682_v16  ;;  %v2684_v39 = vpop.f32.mrb[97].mxu0  ;;  %v2908_v26 = vadd.f32 %v5620_v6, %v2907_v62  ;;  %v3538_v48 = vpop.f32.mrb[162].mxu1 }
 0x297   :  { %4296 = vtanh.f32 %v2916_v5  ;;  %v2685_v8 = vpop.f32.mrb[98].mxu0  ;;  %v2919_v45 = vadd.f32 %v5636_v55, %v3538_v48  ;;  %v2910_v37 = vpop.f32.mrb[163].mxu1  ;;  %v5998_v39 = vld [vmem:[#allocation7_spill] sm:$0xff] }
 0x298   :  { %4298 = vtanh.f32 %v2908_v26  ;;  %v5804_v40 = vadd.f32 %v3697_v51, %v2685_v8  ;;  %v2687_v47 = vpop.f32.mrb[99].mxu0  ;;  %v2911_v25 = vadd.f32 %v5624_v9, %v2910_v37  ;;  %v3707_v26 = vadd.f32 %v5399_v38, %v5998_v39  ;;  %v5999_v37 = vld [vmem:[#allocation8_spill] sm:$0xff] }
 0x299   :  { %v4289_v3 = vpop.eup %4288  ;;  %4300 = vtanh.f32 %v2919_v45  ;;  %v3709_v47 = vadd.f32 %v5399_v38, %v5999_v37 }
 0x29a   :  { %v4291_v22 = vpop.eup %4290  ;;  %3128 = vst [vmem:[%s5977_s3 + $0xf0] sm:$0xff] %v4289_v3  ;;  %4302 = vtanh.f32 %v2911_v25 }
 0x29b   :  { %v4293_v6 = vpop.eup %4292  ;;  %3126 = vst [vmem:[%s5977_s3 + $0xe0] sm:$0xff] %v4291_v22 }
 0x29c   :  { %v4295_v55 = vpop.eup %4294  ;;  %3129 = vst [vmem:[%s5977_s3 + $0xf8] sm:$0xff] %v4293_v6  ;;  %v3541_v9 = vpop.f32.mrb[164].mxu1 }
 0x29d   :  { %3127 = vst [vmem:[%s5977_s3 + $0xe8] sm:$0xff] %v4295_v55  ;;  %v2690_v11 = vpop.f32.mrb[100].mxu0  ;;  %v2932_v44 = vadd.f32 %v5680_v19, %v3541_v9  ;;  %v2923_v42 = vpop.f32.mrb[165].mxu1 }
 0x29e   :  { %v5824_v52 = vadd.f32 %v3699_v32, %v2690_v11  ;;  %v2692_v61 = vpop.f32.mrb[101].mxu0  ;;  %v2924_v7 = vadd.f32 %v5656_v59, %v2923_v42  ;;  %v3542_v57 = vpop.f32.mrb[166].mxu1 }
 0x29f   :  { %4304 = vtanh.f32 %v2932_v44  ;;  %v2693_v60 = vpop.f32.mrb[102].mxu0  ;;  %v2935_v29 = vadd.f32 %v5684_v15, %v3542_v57  ;;  %v2926_v43 = vpop.f32.mrb[167].mxu1 }
 0x2a0   :  { %4306 = vtanh.f32 %v2924_v7  ;;  %v5828_v18 = vadd.f32 %v3701_v13, %v2693_v60  ;;  %v2695_v10 = vpop.f32.mrb[103].mxu0  ;;  %v2927_v19 = vadd.f32 %v5660_v63, %v2926_v43  ;;  %v6001_v60 = vld [vmem:[#allocation10_spill] sm:$0xff] }
 0x2a1   :  { %v4297_v27 = vpop.eup %4296  ;;  %4308 = vtanh.f32 %v2935_v29 }
 0x2a2   :  { %v4299_v2 = vpop.eup %4298  ;;  %3132 = vst [vmem:[%s5977_s3 + $0x110] sm:$0xff] %v4297_v27  ;;  %4310 = vtanh.f32 %v2927_v19 }
 0x2a3   :  { %v4301_v59 = vpop.eup %4300  ;;  %3130 = vst [vmem:[%s5977_s3 + $0x100] sm:$0xff] %v4299_v2 }
 0x2a4   :  { %v4303_v15 = vpop.eup %4302  ;;  %3133 = vst [vmem:[%s5977_s3 + $0x118] sm:$0xff] %v4301_v59  ;;  %v3545_v63 = vpop.f32.mrb[168].mxu1 }
 0x2a5   :  { %3131 = vst [vmem:[%s5977_s3 + $0x108] sm:$0xff] %v4303_v15  ;;  %v2698_v0 = vpop.f32.mrb[104].mxu0  ;;  %v2948_v35 = vadd.f32 %v5728_v49, %v3545_v63  ;;  %v2939_v54 = vpop.f32.mrb[169].mxu1 }
 0x2a6   :  { %v5848_v36 = vadd.f32 %v3703_v12, %v2698_v0  ;;  %v2700_v21 = vpop.f32.mrb[105].mxu0  ;;  %v2940_v31 = vadd.f32 %v5704_v17, %v2939_v54  ;;  %v3546_v1 = vpop.f32.mrb[170].mxu1 }
 0x2a7   :  { %4312 = vtanh.f32 %v2948_v35  ;;  %v2701_v33 = vpop.f32.mrb[106].mxu0  ;;  %v2951_v53 = vadd.f32 %v5732_v56, %v3546_v1  ;;  %v2942_v16 = vpop.f32.mrb[171].mxu1  ;;  %v6002_v35 = vld [vmem:[#allocation11_spill] sm:$0xff] }
 0x2a8   :  { %4314 = vtanh.f32 %v2940_v31  ;;  %v5852_v5 = vadd.f32 %v3705_v58, %v2701_v33  ;;  %v2703_v62 = vpop.f32.mrb[107].mxu0  ;;  %v2943_v49 = vadd.f32 %v5708_v30, %v2942_v16  ;;  %v6003_v31 = vld [vmem:[#allocation12_spill] sm:$0xff] }
 0x2a9   :  { %v4305_v20 = vpop.eup %4304  ;;  %4316 = vtanh.f32 %v2951_v53 }
 0x2aa   :  { %v4307_v51 = vpop.eup %4306  ;;  %3136 = vst [vmem:[%s5977_s3 + $0x130] sm:$0xff] %v4305_v20  ;;  %4318 = vtanh.f32 %v2943_v49 }
 0x2ab   :  { %v4309_v17 = vpop.eup %4308  ;;  %3134 = vst [vmem:[%s5977_s3 + $0x120] sm:$0xff] %v4307_v51 }
 0x2ac   :  { %v4311_v56 = vpop.eup %4310  ;;  %3137 = vst [vmem:[%s5977_s3 + $0x138] sm:$0xff] %v4309_v17  ;;  %v3549_v30 = vpop.f32.mrb[172].mxu1 }
 0x2ad   :  { %3135 = vst [vmem:[%s5977_s3 + $0x128] sm:$0xff] %v4311_v56  ;;  %v2706_v48 = vpop.f32.mrb[108].mxu0  ;;  %v2964_v8 = vadd.f32 %v5776_v4, %v3549_v30  ;;  %v2955_v45 = vpop.f32.mrb[173].mxu1 }
 0x2ae   :  { %v3708_v25 = vadd.f32 %v3707_v26, %v2706_v48  ;;  %v2708_v3 = vpop.f32.mrb[109].mxu0  ;;  %v2956_v22 = vadd.f32 %v5752_v23, %v2955_v45  ;;  %v3550_v6 = vpop.f32.mrb[174].mxu1 }
 0x2af   :  { %4320 = vtanh.f32 %v2964_v8  ;;  %v2709_v55 = vpop.f32.mrb[110].mxu0  ;;  %v2967_v50 = vadd.f32 %v5780_v41, %v3550_v6  ;;  %v2958_v32 = vpop.f32.mrb[175].mxu1  ;;  %v5884_v41 = vld [vmem:[%s5976_s2] ss:$0 sm:$0xff]  ;;  %v6004_v8 = vld [vmem:[#allocation13_spill] sm:$0xff] }
 0x2b0   :  { %4322 = vtanh.f32 %v2956_v22  ;;  %v3710_v9 = vadd.f32 %v3709_v47, %v2709_v55  ;;  %v2711_v11 = vpop.f32.mrb[111].mxu0  ;;  %v2959_v44 = vadd.f32 %v5756_v46, %v2958_v32  ;;  %v6000_v46 = vld [vmem:[#allocation9_spill] sm:$0xff]  ;;  %v3713_v29 = vadd.f32 %v5884_v41, %v6001_v60  ;;  %v6005_v3 = vld [vmem:[#allocation14_spill] sm:$0xff] }
 0x2b1   :  { %v4313_v4 = vpop.eup %4312  ;;  %4324 = vtanh.f32 %v2967_v50  ;;  %v3711_v24 = vadd.f32 %v5884_v41, %v6000_v46  ;;  %v3715_v54 = vadd.f32 %v5884_v41, %v6002_v35  ;;  %v3717_v1 = vadd.f32 %v5884_v41, %v6003_v31 }
 0x2b2   :  { %v4315_v42 = vpop.eup %4314  ;;  %3140 = vst [vmem:[%s5977_s3 + $0x150] sm:$0xff] %v4313_v4  ;;  %4326 = vtanh.f32 %v2959_v44  ;;  %v3719_v45 = vadd.f32 %v5884_v41, %v6004_v8  ;;  %v3721_v22 = vadd.f32 %v5884_v41, %v6005_v3 }
 0x2b3   :  { %v4317_v38 = vpop.eup %4316  ;;  %3138 = vst [vmem:[%s5977_s3 + $0x140] sm:$0xff] %v4315_v42 }
 0x2b4   :  { %v4319_v23 = vpop.eup %4318  ;;  %3141 = vst [vmem:[%s5977_s3 + $0x158] sm:$0xff] %v4317_v38  ;;  %v3553_v13 = vpop.f32.mrb[176].mxu1 }
 0x2b5   :  { %3139 = vst [vmem:[%s5977_s3 + $0x148] sm:$0xff] %v4319_v23  ;;  %v2714_v61 = vpop.f32.mrb[112].mxu0  ;;  %v2980_v7 = vadd.f32 %v5824_v52, %v3553_v13  ;;  %v2971_v57 = vpop.f32.mrb[177].mxu1 }
 0x2b6   :  { %v3712_v43 = vadd.f32 %v3711_v24, %v2714_v61  ;;  %v2716_v10 = vpop.f32.mrb[113].mxu0  ;;  %v2972_v19 = vadd.f32 %v5800_v34, %v2971_v57  ;;  %v3554_v27 = vpop.f32.mrb[178].mxu1  ;;  %v6006_v61 = vld [vmem:[#allocation15_spill] sm:$0xff] }
 0x2b7   :  { %4328 = vtanh.f32 %v2980_v7  ;;  %v2717_v2 = vpop.f32.mrb[114].mxu0  ;;  %v2983_v59 = vadd.f32 %v5828_v18, %v3554_v27  ;;  %v2974_v15 = vpop.f32.mrb[179].mxu1  ;;  %v3723_v7 = vadd.f32 %v5884_v41, %v6006_v61 }
 0x2b8   :  { %4330 = vtanh.f32 %v2972_v19  ;;  %v3714_v14 = vadd.f32 %v3713_v29, %v2717_v2  ;;  %v2719_v12 = vpop.f32.mrb[115].mxu0  ;;  %v2975_v63 = vadd.f32 %v5804_v40, %v2974_v15 }
 0x2b9   :  { %v4321_v52 = vpop.eup %4320  ;;  %4332 = vtanh.f32 %v2983_v59 }
 0x2ba   :  { %v4323_v0 = vpop.eup %4322  ;;  %3144 = vst [vmem:[%s5977_s3 + $0x170] sm:$0xff] %v4321_v52  ;;  %4334 = vtanh.f32 %v2975_v63 }
 0x2bb   :  { %v4325_v34 = vpop.eup %4324  ;;  %3142 = vst [vmem:[%s5977_s3 + $0x160] sm:$0xff] %v4323_v0 }
 0x2bc   :  { %v4327_v18 = vpop.eup %4326  ;;  %3145 = vst [vmem:[%s5977_s3 + $0x178] sm:$0xff] %v4325_v34  ;;  %v3557_v40 = vpop.f32.mrb[180].mxu1 }
 0x2bd   :  { %3143 = vst [vmem:[%s5977_s3 + $0x168] sm:$0xff] %v4327_v18  ;;  %v2722_v28 = vpop.f32.mrb[116].mxu0  ;;  %v2996_v58 = vadd.f32 %v3708_v25, %v3557_v40  ;;  %v2987_v21 = vpop.f32.mrb[181].mxu1 }
 0x2be   :  { %v3716_v33 = vadd.f32 %v3715_v54, %v2722_v28  ;;  %v2724_v53 = vpop.f32.mrb[117].mxu0  ;;  %v2988_v16 = vadd.f32 %v5848_v36, %v2987_v21  ;;  %v3558_v62 = vpop.f32.mrb[182].mxu1 }
 0x2bf   :  { %4336 = vtanh.f32 %v2996_v58  ;;  %v2725_v49 = vpop.f32.mrb[118].mxu0  ;;  %v2999_v20 = vadd.f32 %v3710_v9, %v3558_v62  ;;  %v2990_v51 = vpop.f32.mrb[183].mxu1 }
 0x2c0   :  { %4338 = vtanh.f32 %v2988_v16  ;;  %v3718_v17 = vadd.f32 %v3717_v1, %v2725_v49  ;;  %v2727_v56 = vpop.f32.mrb[119].mxu0  ;;  %v2991_v39 = vadd.f32 %v5852_v5, %v2990_v51 }
 0x2c1   :  { %v4329_v26 = vpop.eup %4328  ;;  %4340 = vtanh.f32 %v2999_v20 }
 0x2c2   :  { %v4331_v30 = vpop.eup %4330  ;;  %3148 = vst [vmem:[%s5977_s3 + $0x190] sm:$0xff] %v4329_v26  ;;  %4342 = vtanh.f32 %v2991_v39 }
 0x2c3   :  { %v4333_v48 = vpop.eup %4332  ;;  %3146 = vst [vmem:[%s5977_s3 + $0x180] sm:$0xff] %v4331_v30 }
 0x2c4   :  { %v4335_v36 = vpop.eup %4334  ;;  %3149 = vst [vmem:[%s5977_s3 + $0x198] sm:$0xff] %v4333_v48  ;;  %v3561_v5 = vpop.f32.mrb[184].mxu1 }
 0x2c5   :  { %3147 = vst [vmem:[%s5977_s3 + $0x188] sm:$0xff] %v4335_v36  ;;  %v2730_v37 = vpop.f32.mrb[120].mxu0  ;;  %v3012_v47 = vadd.f32 %v3716_v33, %v3561_v5  ;;  %v3003_v25 = vpop.f32.mrb[185].mxu1 }
 0x2c6   :  { %v3720_v6 = vadd.f32 %v3719_v45, %v2730_v37  ;;  %v2732_v55 = vpop.f32.mrb[121].mxu0  ;;  %v3004_v50 = vadd.f32 %v3712_v43, %v3003_v25  ;;  %v3562_v32 = vpop.f32.mrb[186].mxu1  ;;  %v6007_v43 = vld [vmem:[#allocation16_spill] sm:$0xff] }
 0x2c7   :  { %4344 = vtanh.f32 %v3012_v47  ;;  %v2733_v9 = vpop.f32.mrb[122].mxu0  ;;  %v3015_v11 = vadd.f32 %v3718_v17, %v3562_v32  ;;  %v3006_v44 = vpop.f32.mrb[187].mxu1  ;;  %v3725_v10 = vadd.f32 %v5884_v41, %v6007_v43 }
 0x2c8   :  { %4346 = vtanh.f32 %v3004_v50  ;;  %v3722_v4 = vadd.f32 %v3721_v22, %v2733_v9  ;;  %v2735_v42 = vpop.f32.mrb[123].mxu0  ;;  %v3007_v38 = vadd.f32 %v3714_v14, %v3006_v44 }
 0x2c9   :  { %v4337_v23 = vpop.eup %4336  ;;  %4348 = vtanh.f32 %v3015_v11 }
 0x2ca   :  { %v4339_v46 = vpop.eup %4338  ;;  %3152 = vst [vmem:[%s5977_s3 + $0x1b0] sm:$0xff] %v4337_v23  ;;  %4350 = vtanh.f32 %v3007_v38 }
 0x2cb   :  { %v4341_v24 = vpop.eup %4340  ;;  %3150 = vst [vmem:[%s5977_s3 + $0x1a0] sm:$0xff] %v4339_v46 }
 0x2cc   :  { %v4343_v13 = vpop.eup %4342  ;;  %3153 = vst [vmem:[%s5977_s3 + $0x1b8] sm:$0xff] %v4341_v24  ;;  %v3565_v57 = vpop.f32.mrb[188].mxu1 }
 0x2cd   :  { %3151 = vst [vmem:[%s5977_s3 + $0x1a8] sm:$0xff] %v4343_v13  ;;  %v2738_v60 = vpop.f32.mrb[124].mxu0  ;;  %v3019_v29 = vpop.f32.mrb[189].mxu1 }
 0x2ce   :  { %v3724_v19 = vadd.f32 %v3723_v7, %v2738_v60  ;;  %v2740_v27 = vpop.f32.mrb[125].mxu0  ;;  %v3020_v2 = vadd.f32 %v3720_v6, %v3019_v29  ;;  %v3566_v59 = vpop.f32.mrb[190].mxu1 }
 0x2cf   :  { %v2741_v15 = vpop.f32.mrb[126].mxu0  ;;  %v3022_v14 = vpop.f32.mrb[191].mxu1 }
 0x2d0   :  { %v3028_v12 = vadd.f32 %v3724_v19, %v3565_v57  ;;  %4352 = vtanh.f32 %v3020_v2  ;;  %v3726_v63 = vadd.f32 %v3725_v10, %v2741_v15  ;;  %v2743_v52 = vpop.f32.mrb[127].mxu0  ;;  %v3023_v0 = vadd.f32 %v3722_v4, %v3022_v14 }
 0x2d1   :  { %v4345_v34 = vpop.eup %4344 }
 0x2d2   :  { %v4347_v18 = vpop.eup %4346  ;;  %3156 = vst [vmem:[%s5977_s3 + $0x1d0] sm:$0xff] %v4345_v34  ;;  %4354 = vtanh.f32 %v3028_v12  ;;  %v3031_v35 = vadd.f32 %v3726_v63, %v3566_v59 }
 0x2d3   :  { %v4349_v41 = vpop.eup %4348  ;;  %3154 = vst [vmem:[%s5977_s3 + $0x1c0] sm:$0xff] %v4347_v18  ;;  %4356 = vtanh.f32 %v3023_v0 }
 0x2d4   :  { %v4351_v54 = vpop.eup %4350  ;;  %3157 = vst [vmem:[%s5977_s3 + $0x1d8] sm:$0xff] %v4349_v41  ;;  %4358 = vtanh.f32 %v3031_v35 }
 0x2d5   :  { %3155 = vst [vmem:[%s5977_s3 + $0x1c8] sm:$0xff] %v4351_v54 }
 0x2da   :  { %v4353_v40 = vpop.eup %4352 }
 0x2db   :  { %3158 = vst [vmem:[%s5977_s3 + $0x1e0] sm:$0xff] %v4353_v40 }
 0x2dc   :  { %v4355_v28 = vpop.eup %4354 }
 0x2dd   :  { %v4357_v58 = vpop.eup %4356  ;;  %3160 = vst [vmem:[%s5977_s3 + $0x1f0] sm:$0xff] %v4355_v28 }
 0x2de   :  { %v4359_v21 = vpop.eup %4358  ;;  %3159 = vst [vmem:[%s5977_s3 + $0x1e8] sm:$0xff] %v4357_v58 }
 0x2df   :  { %3161 = vst [vmem:[%s5977_s3 + $0x1f8] sm:$0xff] %v4359_v21 }

</bundles_post_ra>
